<compile_context>
chip_gen: v5e
topology: v5e:2x2
jax: 0.10.0
libtpu: 0.0.40
codegen_flags: <defaults>
</compile_context>

<pallas_src>
import math
import functools

import jax
import jax.numpy as jnp
from jax import lax
from jax.experimental import pallas as pl
from jax.experimental.pallas import tpu as pltpu

_NEG_BIG = float(-(1 << 32))   # PyTorch masked_fill value; exp() underflows to 0.
_LANE = 128


def _round_up(x, m):
    return ((x + m - 1) // m) * m


def _pad2(x, rows, cols):
    return jnp.pad(x, ((0, rows - x.shape[0]), (0, cols - x.shape[1])))


# ----------------------------------------------------------------------------
# Prologue kernel: grid-invariant work (K projection + drug_fc head), run once.
# ----------------------------------------------------------------------------
def _invariants_kernel(sub_ref, wk_ref, bk_ref, xd_ref, w1_ref, b1_ref,
                       w2_ref, b2_ref, k_out_ref, e_out_ref):
    # K = sub @ Wk + bk  (f32 compute, emitted bf16 for the main kernel's MXU).
    k = jnp.dot(sub_ref[...], wk_ref[...],
                preferred_element_type=jnp.float32) + bk_ref[...]
    k_out_ref[...] = k.astype(k_out_ref.dtype)

    # drug_fc: Linear -> LeakyReLU(0.01) -> (Dropout: eval identity) -> Linear.
    h = jnp.dot(xd_ref[...], w1_ref[...],
                preferred_element_type=jnp.float32) + b1_ref[...]
    h = jnp.where(h > 0.0, h, 0.01 * h)
    e = jnp.dot(h, w2_ref[...],
                preferred_element_type=jnp.float32) + b2_ref[...]
    # L2 normalization (EUP rsqrt). Padded zero feature columns stay zero.
    e_out_ref[...] = e * lax.rsqrt(jnp.sum(e * e, axis=-1, keepdims=True) + 1e-12)


# ----------------------------------------------------------------------------
# Main kernel: AdjAttenAgger (row tile) + L2-norm + scaled similarity logits.
# ----------------------------------------------------------------------------
def _align_kernel(proj_ref, mole_ref, sub_ref, k_ref, wq_ref, bq_ref, e_ref,
                  scale_ref, out_ref, *, inv_sqrt_d):
    # Q projection: bf16 MXU operands, f32 accumulation, f32 bias add.
    q = jnp.dot(mole_ref[...], wq_ref[...],
                preferred_element_type=jnp.float32) + bq_ref[...]

    # Q K^T without materializing a transpose: contract dim 1 of both operands.
    attn = lax.dot_general(q.astype(jnp.bfloat16), k_ref[...],
                           (((1,), (1,)), ((), ())),
                           preferred_element_type=jnp.float32) * inv_sqrt_d

    # masked_fill(logical_not(proj > 0), -(1<<32)); int8 mask compared in f32.
    attn = jnp.where(proj_ref[...].astype(jnp.float32) > 0.0, attn, _NEG_BIG)

    # Numerically-stable softmax; denominator on the EUP (uniform per-row scale
    # error cancels under the L2 normalization below).
    attn = attn - jnp.max(attn, axis=-1, keepdims=True)
    p = jnp.exp(attn)
    p = p * pl.reciprocal(jnp.sum(p, axis=-1, keepdims=True), approx=True)

    # O = A @ V  (bf16 MXU operands, f32 accumulation).
    o = jnp.dot(p.astype(jnp.bfloat16), sub_ref[...],
                preferred_element_type=jnp.float32)

    # L2 normalize O (EUP rsqrt), then scaled similarity against normalized e.
    o = o * lax.rsqrt(jnp.sum(o * o, axis=-1, keepdims=True) + 1e-12)
    out_ref[...] = scale_ref[0] * lax.dot_general(
        o, e_ref[...], (((1,), (1,)), ((), ())),
        preferred_element_type=jnp.float32)


# ----------------------------------------------------------------------------
# Host-side helper: exact zero-padding of the feature dim to a 128-lane multiple.
# (D=32 pads to 128 exactly; do NOT pad further — dp=128 already fills the v5e
#  MXU contraction natively.)
# ----------------------------------------------------------------------------
def pad_params(params, lane=_LANE):
    d = params["wq"].shape[0]
    dp = _round_up(d, lane)
    h = params["w1"].shape[1]
    out = dict(params)
    out["wq"] = _pad2(params["wq"], dp, dp)
    out["bq"] = _pad2(params["bq"], 1, dp)
    out["wk"] = _pad2(params["wk"], dp, dp)
    out["bk"] = _pad2(params["bk"], 1, dp)
    out["w1"] = _pad2(params["w1"], dp, h)
    out["b1"] = params["b1"]
    out["w2"] = _pad2(params["w2"], h, dp)
    out["b2"] = _pad2(params["b2"], 1, dp)
    return out


# ----------------------------------------------------------------------------
# Forward wrapper: prologue pallas_call + row-tiled main pallas_call.
# ----------------------------------------------------------------------------
def threed_align_forward(pparams, mole_features, sub_features,
                         sub_projection_matrix, xd_raw, *, emb_dim, tile_n=128):
    n = mole_features.shape[0]
    m = sub_features.shape[0]
    b = xd_raw.shape[0]
    dp = pparams["wq"].shape[0]
    hdim = pparams["w1"].shape[1]

    # --- tile / padding geometry ---------------------------------------------
    # int8 mask tile rule: (32, 128) min tile -> tile_n must be a multiple of 32.
    tile_n = max(32, (min(tile_n, _round_up(n, 32)) // 32) * 32)
    n_pad = _round_up(n, tile_n)          # no undefined input rows are read
    m_pad = _round_up(m, _LANE)           # lane-dense mask/attn, 128-mult K dim
    b_pad = _round_up(b, _LANE)           # lane-dense output stores

    # --- exact zero-padding + dtype staging ----------------------------------
    proj_i8 = _pad2((sub_projection_matrix > 0).astype(jnp.int8), n_pad, m_pad)
    mole_bf = _pad2(mole_features, n_pad, dp).astype(jnp.bfloat16)
    sub_f32 = _pad2(sub_features, m_pad, dp)
    sub_bf = sub_f32.astype(jnp.bfloat16)
    xd_f32 = _pad2(xd_raw, b_pad, dp)
    wq_bf = pparams["wq"].astype(jnp.bfloat16)

    # --- prologue: K and normalized drug embeddings, computed once -----------
    k_bf, e_f32 = pl.pallas_call(
        _invariants_kernel,
        out_shape=(jax.ShapeDtypeStruct((m_pad, dp), jnp.bfloat16),
                   jax.ShapeDtypeStruct((b_pad, dp), jnp.float32)),
        compiler_params=pltpu.CompilerParams(vmem_limit_bytes=48 * 1024 * 1024),
        cost_estimate=pl.CostEstimate(
            flops=2 * (m_pad * dp * dp + 2 * b_pad * dp * hdim),
            transcendentals=b_pad,
            bytes_accessed=(4 * (m_pad * dp + dp * dp + dp + b_pad * dp
                                 + dp * hdim + hdim + hdim * dp + dp
                                 + b_pad * dp) + 2 * m_pad * dp)),
    )(sub_f32, pparams["wk"], pparams["bk"], xd_f32,
      pparams["w1"], pparams["b1"], pparams["w2"], pparams["b2"])

    # --- main fused aggregator + logits kernel --------------------------------
    grid = (n_pad // tile_n,)
    row = lambda i: (i, 0)     # row-tiled operands / output
    inv = lambda i: (0, 0)     # grid-invariant operands (resident, not re-DMA'd)

    cost = pl.CostEstimate(
        flops=2 * n_pad * dp * (dp + 2 * m_pad + b_pad),
        transcendentals=n_pad * m_pad + 2 * n_pad,
        bytes_accessed=(n_pad * m_pad                                   # int8
                        + 2 * (n_pad * dp + 2 * m_pad * dp + dp * dp)   # bf16
                        + 4 * (dp + b_pad * dp + 1 + n_pad * b_pad)))   # f32

    out_pad = pl.pallas_call(
        functools.partial(_align_kernel, inv_sqrt_d=1.0 / math.sqrt(emb_dim)),
        grid=grid,
        out_shape=jax.ShapeDtypeStruct((n_pad, b_pad), jnp.float32),
        in_specs=[
            pl.BlockSpec((tile_n, m_pad), row),                    # mask (int8)
            pl.BlockSpec((tile_n, dp), row),                       # mole (bf16)
            pl.BlockSpec((m_pad, dp), inv),                        # sub/V (bf16)
            pl.BlockSpec((m_pad, dp), inv),                        # K     (bf16)
            pl.BlockSpec((dp, dp), inv),                           # Wq    (bf16)
            pl.BlockSpec((1, dp), inv),                            # bq    (f32)
            pl.BlockSpec((b_pad, dp), inv),                        # e     (f32)
            pl.BlockSpec(memory_space=pltpu.MemorySpace.SMEM),     # logit_scale
        ],
        out_specs=pl.BlockSpec((tile_n, b_pad), row),
        compiler_params=pltpu.CompilerParams(
            dimension_semantics=("parallel",),
            # <= v7x's 64 MiB physical VMEM; raise toward ~96-100 MiB on
            # v5e/v6e (128 MiB) when M grows.
            vmem_limit_bytes=48 * 1024 * 1024),
        cost_estimate=cost,
    )(proj_i8, mole_bf, sub_bf, k_bf, wq_bf, pparams["bq"], e_f32,
      pparams["logit_scale"])

    return out_pad[:n, :b]


# ----------------------------------------------------------------------------
# Pure-JAX f32 reference (mirrors the PyTorch forward) for verification.
# ----------------------------------------------------------------------------
def threed_align_reference(params, mole_features, sub_features,
                           sub_projection_matrix, xd_raw):
    d = mole_features.shape[1]
    q = mole_features @ params["wq"] + params["bq"]
    k = sub_features @ params["wk"] + params["bk"]
    attn = (q @ k.T) / math.sqrt(d)                    # mid_dim == emb_dim
    mask = jnp.logical_not(sub_projection_matrix > 0)
    attn = jnp.where(mask, jnp.float32(-(1 << 32)), attn)
    attn = jax.nn.softmax(attn, axis=-1)
    o = attn @ sub_features

    h = xd_raw @ params["w1"] + params["b1"]
    h = jnp.where(h > 0, h, 0.01 * h)                  # LeakyReLU
    xd = h @ params["w2"] + params["b2"]               # Dropout: eval mode

    s = o / jnp.linalg.norm(o, axis=1, keepdims=True)
    e = xd / jnp.linalg.norm(xd, axis=1, keepdims=True)
    return params["logit_scale"][0] * (s @ e.T)


if __name__ == "__main__":
    # Small, deterministic problem sizes consistent with the module.
    EMB_DIM = 32       # emb_dim  (aggregator mid_dim = max(emb_dim, emb_dim))
    N_MOL = 16         # molecules in the batch
    N_SUB = 16         # sub-structures
    N_DRUG = 8         # drug geometries
    FC_HIDDEN = 1024   # drug_fc_dims[0]

    key = jax.random.PRNGKey(0)
    ks = jax.random.split(key, 10)

    # External encoder outputs -> deterministic synthetic inputs.
    mole_features = jax.random.normal(ks[0], (N_MOL, EMB_DIM), jnp.float32)
    sub_features = jax.random.normal(ks[1], (N_SUB, EMB_DIM), jnp.float32)
    xd_raw = jax.random.normal(ks[2], (N_DRUG, EMB_DIM), jnp.float32)

    # Sub-projection matrix: 0/1 pattern, each row has at least one active column.
    sub_projection_matrix = (
        jax.random.uniform(ks[3], (N_MOL, N_SUB)) > 0.5).astype(jnp.float32)
    sub_projection_matrix = sub_projection_matrix.at[:, 0].set(1.0)

    def lin_init(k, fan_in, fan_out):
        kw, kb = jax.random.split(k)
        bound = 1.0 / math.sqrt(fan_in)
        w = jax.random.uniform(kw, (fan_in, fan_out), jnp.float32, -bound, bound)
        bvec = jax.random.uniform(kb, (1, fan_out), jnp.float32, -bound, bound)
        return w, bvec

    wq, bq = lin_init(ks[4], EMB_DIM, EMB_DIM)        # aggregator.Qdense
    wk, bk = lin_init(ks[5], EMB_DIM, EMB_DIM)        # aggregator.Kdense
    w1, b1 = lin_init(ks[6], EMB_DIM, FC_HIDDEN)      # drug_fc Linear(D, 1024)
    w2, b2 = lin_init(ks[7], FC_HIDDEN, EMB_DIM)      # drug_fc Linear(1024, D)
    logit_scale = jnp.array([math.exp(math.log(1.0 / 0.07))], jnp.float32)

    params = dict(wq=wq, bq=bq, wk=wk, bk=bk,
                  w1=w1, b1=b1, w2=w2, b2=b2, logit_scale=logit_scale)
    pparams = pad_params(params)          # done once, outside the hot path

    fwd = jax.jit(functools.partial(threed_align_forward, emb_dim=EMB_DIM))
    out = jax.block_until_ready(fwd(pparams, mole_features, sub_features,
                                    sub_projection_matrix, xd_raw))

    ref = threed_align_reference(params, mole_features, sub_features,
                                 sub_projection_matrix, xd_raw)
    assert out.shape == (N_MOL, N_DRUG), out.shape
    # bf16 MXU operands (f32 accumulation) vs the f32 reference: error budget
    # ~0.5% of the logit range (|logits| <= logit_scale ~= 14.3); real bugs
    # produce O(1)-O(10) discrepancies and are still caught.
    assert jnp.allclose(out, ref, rtol=3e-2, atol=7e-2), (out, ref)

    print("KERNEL_OK")
</pallas_src>

<mosaic_0001>
module attributes {stable_mosaic.version = 11 : i64} {
  func.func @_invariants_kernel(%arg0: memref<128x128xf32, #tpu.memory_space<vmem>>, %arg1: memref<128x128xf32, #tpu.memory_space<vmem>>, %arg2: memref<1x128xf32, #tpu.memory_space<vmem>>, %arg3: memref<128x128xf32, #tpu.memory_space<vmem>>, %arg4: memref<128x1024xf32, #tpu.memory_space<vmem>>, %arg5: memref<1x1024xf32, #tpu.memory_space<vmem>>, %arg6: memref<1024x128xf32, #tpu.memory_space<vmem>>, %arg7: memref<1x128xf32, #tpu.memory_space<vmem>>, %arg8: memref<128x128xbf16, #tpu.memory_space<vmem>>, %arg9: memref<128x128xf32, #tpu.memory_space<vmem>>) attributes {dimension_semantics = [], scalar_prefetch = 0 : i64, scratch_operands = 0 : i64, tpu.core_type = #tpu.core_type<tc>} {
    %c0 = arith.constant 0 : index
    %c0_0 = arith.constant 0 : index
    %0 = vector.load %arg0[%c0, %c0_0] : memref<128x128xf32, #tpu.memory_space<vmem>>, vector<128x128xf32>
    %c0_1 = arith.constant 0 : index
    %c0_2 = arith.constant 0 : index
    %1 = vector.load %arg1[%c0_1, %c0_2] : memref<128x128xf32, #tpu.memory_space<vmem>>, vector<128x128xf32>
    %cst = arith.constant dense<0.000000e+00> : vector<128x128xf32>
    %2 = tpu.matmul %0, %1, %cst {dimension_numbers = #tpu.dot_dimension_numbers<[1], [0], [0], [1], [0, 0, 1, 1], [], []>} : vector<128x128xf32>, vector<128x128xf32>, vector<128x128xf32> -> vector<128x128xf32>
    %c0_3 = arith.constant 0 : index
    %c0_4 = arith.constant 0 : index
    %3 = vector.load %arg2[%c0_3, %c0_4] : memref<1x128xf32, #tpu.memory_space<vmem>>, vector<1x128xf32>
    %4 = vector.broadcast %3 : vector<1x128xf32> to vector<128x128xf32>
    %5 = arith.addf %2, %4 : vector<128x128xf32>
    %6 = arith.truncf %5 : vector<128x128xf32> to vector<128x128xbf16>
    %c0_5 = arith.constant 0 : index
    %c0_6 = arith.constant 0 : index
    %7 = vector.load %arg8[%c0_5, %c0_6] : memref<128x128xbf16, #tpu.memory_space<vmem>>, vector<128x128xbf16>
    tpu.vector_store %arg8[%c0_5, %c0_6], %6 {strides = array<i32>} : memref<128x128xbf16, #tpu.memory_space<vmem>>, vector<128x128xbf16>,
    %c0_7 = arith.constant 0 : index
    %c0_8 = arith.constant 0 : index
    %8 = vector.load %arg3[%c0_7, %c0_8] : memref<128x128xf32, #tpu.memory_space<vmem>>, vector<128x128xf32>
    %c0_9 = arith.constant 0 : index
    %c0_10 = arith.constant 0 : index
    %9 = vector.load %arg4[%c0_9, %c0_10] : memref<128x1024xf32, #tpu.memory_space<vmem>>, vector<128x1024xf32>
    %cst_11 = arith.constant dense<0.000000e+00> : vector<128x1024xf32>
    %10 = tpu.matmul %8, %9, %cst_11 {dimension_numbers = #tpu.dot_dimension_numbers<[1], [0], [0], [1], [0, 0, 1, 1], [], []>} : vector<128x128xf32>, vector<128x1024xf32>, vector<128x1024xf32> -> vector<128x1024xf32>
    %c0_12 = arith.constant 0 : index
    %c0_13 = arith.constant 0 : index
    %11 = vector.load %arg5[%c0_12, %c0_13] : memref<1x1024xf32, #tpu.memory_space<vmem>>, vector<1x1024xf32>
    %12 = vector.broadcast %11 : vector<1x1024xf32> to vector<128x1024xf32>
    %13 = arith.addf %10, %12 : vector<128x1024xf32>
    %cst_14 = arith.constant 0.000000e+00 : f32
    %14 = vector.broadcast %cst_14 : f32 to vector<128x1024xf32>
    %15 = arith.cmpf ogt, %13, %14 : vector<128x1024xf32>
    %cst_15 = arith.constant 0.00999999977 : f32
    %16 = vector.broadcast %cst_15 : f32 to vector<128x1024xf32>
    %17 = arith.mulf %16, %13 : vector<128x1024xf32>
    %18 = arith.select %15, %13, %17 : vector<128x1024xi1>, vector<128x1024xf32>
    %c0_16 = arith.constant 0 : index
    %c0_17 = arith.constant 0 : index
    %19 = vector.load %arg6[%c0_16, %c0_17] : memref<1024x128xf32, #tpu.memory_space<vmem>>, vector<1024x128xf32>
    %cst_18 = arith.constant dense<0.000000e+00> : vector<128x128xf32>
    %20 = tpu.matmul %18, %19, %cst_18 {dimension_numbers = #tpu.dot_dimension_numbers<[1], [0], [0], [1], [0, 0, 1, 1], [], []>} : vector<128x1024xf32>, vector<1024x128xf32>, vector<128x128xf32> -> vector<128x128xf32>
    %c0_19 = arith.constant 0 : index
    %c0_20 = arith.constant 0 : index
    %21 = vector.load %arg7[%c0_19, %c0_20] : memref<1x128xf32, #tpu.memory_space<vmem>>, vector<1x128xf32>
    %22 = vector.broadcast %21 : vector<1x128xf32> to vector<128x128xf32>
    %23 = arith.addf %20, %22 : vector<128x128xf32>
    %24 = arith.mulf %23, %23 : vector<128x128xf32>
    %cst_21 = arith.constant dense<0.000000e+00> : vector<128xf32>
    %25 = vector.multi_reduction <add>, %24, %cst_21 [1] : vector<128x128xf32> to vector<128xf32>
    %26 = vector.shape_cast %25 : vector<128xf32> to vector<128x1xf32>
    %cst_22 = arith.constant 9.99999996E-13 : f32
    %27 = vector.broadcast %cst_22 : f32 to vector<128x1xf32>
    %28 = arith.addf %26, %27 : vector<128x1xf32>
    %29 = math.rsqrt %28 : vector<128x1xf32>
    %30 = vector.broadcast %29 : vector<128x1xf32> to vector<128x128xf32>
    %31 = arith.mulf %23, %30 : vector<128x128xf32>
    %c0_23 = arith.constant 0 : index
    %c0_24 = arith.constant 0 : index
    %32 = vector.load %arg9[%c0_23, %c0_24] : memref<128x128xf32, #tpu.memory_space<vmem>>, vector<128x128xf32>
    tpu.vector_store %arg9[%c0_23, %c0_24], %31 {strides = array<i32>} : memref<128x128xf32, #tpu.memory_space<vmem>>, vector<128x128xf32>,
    return
  }
}

module attributes {stable_mosaic.version = 11 : i64} {
  func.func @_align_kernel(%arg0: i32, %arg1: memref<32x128xi8, #tpu.memory_space<vmem>>, %arg2: memref<32x128xbf16, #tpu.memory_space<vmem>>, %arg3: memref<128x128xbf16, #tpu.memory_space<vmem>>, %arg4: memref<128x128xbf16, #tpu.memory_space<vmem>>, %arg5: memref<128x128xbf16, #tpu.memory_space<vmem>>, %arg6: memref<1x128xf32, #tpu.memory_space<vmem>>, %arg7: memref<128x128xf32, #tpu.memory_space<vmem>>, %arg8: memref<1xf32, #tpu.memory_space<smem>>, %arg9: memref<32x128xf32, #tpu.memory_space<vmem>>) attributes {dimension_semantics = [#tpu.dimension_semantics<parallel>], iteration_bounds = array<i64: 1>, scalar_prefetch = 0 : i64, scratch_operands = 0 : i64, tpu.core_type = #tpu.core_type<tc>, window_params = [{transform_indices = @transform_0, window_bounds = array<i64: 32, 128>}, {transform_indices = @transform_1, window_bounds = array<i64: 32, 128>}, {pipeline_mode = #tpu.pipeline_mode<synchronous>, transform_indices = @transform_2, window_bounds = array<i64: 128, 128>}, {pipeline_mode = #tpu.pipeline_mode<synchronous>, transform_indices = @transform_3, window_bounds = array<i64: 128, 128>}, {pipeline_mode = #tpu.pipeline_mode<synchronous>, transform_indices = @transform_4, window_bounds = array<i64: 128, 128>}, {pipeline_mode = #tpu.pipeline_mode<synchronous>, transform_indices = @transform_5, window_bounds = array<i64: 1, 128>}, {pipeline_mode = #tpu.pipeline_mode<synchronous>, transform_indices = @transform_6, window_bounds = array<i64: 128, 128>}, {transform_indices = @transform_7, window_bounds = array<i64: 1>}, {transform_indices = @transform_8, window_bounds = array<i64: 32, 128>}]} {
    %c0 = arith.constant 0 : index
    %c0_0 = arith.constant 0 : index
    %0 = vector.load %arg2[%c0, %c0_0] : memref<32x128xbf16, #tpu.memory_space<vmem>>, vector<32x128xbf16>
    %c0_1 = arith.constant 0 : index
    %c0_2 = arith.constant 0 : index
    %1 = vector.load %arg5[%c0_1, %c0_2] : memref<128x128xbf16, #tpu.memory_space<vmem>>, vector<128x128xbf16>
    %cst = arith.constant dense<0.000000e+00> : vector<32x128xf32>
    %2 = tpu.matmul %0, %1, %cst {dimension_numbers = #tpu.dot_dimension_numbers<[1], [0], [0], [1], [0, 0, 1, 1], [], []>} : vector<32x128xbf16>, vector<128x128xbf16>, vector<32x128xf32> -> vector<32x128xf32>
    %c0_3 = arith.constant 0 : index
    %c0_4 = arith.constant 0 : index
    %3 = vector.load %arg6[%c0_3, %c0_4] : memref<1x128xf32, #tpu.memory_space<vmem>>, vector<1x128xf32>
    %4 = vector.broadcast %3 : vector<1x128xf32> to vector<32x128xf32>
    %5 = arith.addf %2, %4 : vector<32x128xf32>
    %6 = arith.truncf %5 : vector<32x128xf32> to vector<32x128xbf16>
    %c0_5 = arith.constant 0 : index
    %c0_6 = arith.constant 0 : index
    %7 = vector.load %arg4[%c0_5, %c0_6] : memref<128x128xbf16, #tpu.memory_space<vmem>>, vector<128x128xbf16>
    %cst_7 = arith.constant dense<0.000000e+00> : vector<32x128xf32>
    %8 = tpu.matmul %6, %7, %cst_7 {dimension_numbers = #tpu.dot_dimension_numbers<[1], [1], [0], [0], [0, 0, 1, 0], [], []>} : vector<32x128xbf16>, vector<128x128xbf16>, vector<32x128xf32> -> vector<32x128xf32>
    %cst_8 = arith.constant 0.176776692 : f32
    %9 = vector.broadcast %cst_8 : f32 to vector<32x128xf32>
    %10 = arith.mulf %8, %9 : vector<32x128xf32>
    %c0_9 = arith.constant 0 : index
    %c0_10 = arith.constant 0 : index
    %11 = vector.load %arg1[%c0_9, %c0_10] : memref<32x128xi8, #tpu.memory_space<vmem>>, vector<32x128xi8>
    %12 = arith.sitofp %11 : vector<32x128xi8> to vector<32x128xf32>
    %cst_11 = arith.constant 0.000000e+00 : f32
    %13 = vector.broadcast %cst_11 : f32 to vector<32x128xf32>
    %14 = arith.cmpf ogt, %12, %13 : vector<32x128xf32>
    %cst_12 = arith.constant -4.2949673E+9 : f32
    %15 = vector.broadcast %cst_12 : f32 to vector<32x128xf32>
    %16 = arith.select %14, %10, %15 : vector<32x128xi1>, vector<32x128xf32>
    %cst_13 = arith.constant dense<0xFF800000> : vector<32xf32>
    %17 = vector.multi_reduction <maximumf>, %16, %cst_13 [1] : vector<32x128xf32> to vector<32xf32>
    %18 = vector.shape_cast %17 : vector<32xf32> to vector<32x1xf32>
    %19 = vector.broadcast %18 : vector<32x1xf32> to vector<32x128xf32>
    %20 = arith.subf %16, %19 : vector<32x128xf32>
    %21 = math.exp %20 : vector<32x128xf32>
    %cst_14 = arith.constant dense<0.000000e+00> : vector<32xf32>
    %22 = vector.multi_reduction <add>, %21, %cst_14 [1] : vector<32x128xf32> to vector<32xf32>
    %23 = vector.shape_cast %22 : vector<32xf32> to vector<32x1xf32>
    %24 = tpu.reciprocal %23 {approx = true} : vector<32x1xf32> -> vector<32x1xf32>
    %25 = vector.broadcast %24 : vector<32x1xf32> to vector<32x128xf32>
    %26 = arith.mulf %21, %25 : vector<32x128xf32>
    %27 = arith.truncf %26 : vector<32x128xf32> to vector<32x128xbf16>
    %c0_15 = arith.constant 0 : index
    %c0_16 = arith.constant 0 : index
    %28 = vector.load %arg3[%c0_15, %c0_16] : memref<128x128xbf16, #tpu.memory_space<vmem>>, vector<128x128xbf16>
    %cst_17 = arith.constant dense<0.000000e+00> : vector<32x128xf32>
    %29 = tpu.matmul %27, %28, %cst_17 {dimension_numbers = #tpu.dot_dimension_numbers<[1], [0], [0], [1], [0, 0, 1, 1], [], []>} : vector<32x128xbf16>, vector<128x128xbf16>, vector<32x128xf32> -> vector<32x128xf32>
    %30 = arith.mulf %29, %29 : vector<32x128xf32>
    %cst_18 = arith.constant dense<0.000000e+00> : vector<32xf32>
    %31 = vector.multi_reduction <add>, %30, %cst_18 [1] : vector<32x128xf32> to vector<32xf32>
    %32 = vector.shape_cast %31 : vector<32xf32> to vector<32x1xf32>
    %cst_19 = arith.constant 9.99999996E-13 : f32
    %33 = vector.broadcast %cst_19 : f32 to vector<32x1xf32>
    %34 = arith.addf %32, %33 : vector<32x1xf32>
    %35 = math.rsqrt %34 : vector<32x1xf32>
    %36 = vector.broadcast %35 : vector<32x1xf32> to vector<32x128xf32>
    %37 = arith.mulf %29, %36 : vector<32x128xf32>
    %c0_20 = arith.constant 0 : index
    %38 = memref.load %arg8[%c0_20] : memref<1xf32, #tpu.memory_space<smem>>
    %c0_21 = arith.constant 0 : index
    %c0_22 = arith.constant 0 : index
    %39 = vector.load %arg7[%c0_21, %c0_22] : memref<128x128xf32, #tpu.memory_space<vmem>>, vector<128x128xf32>
    %cst_23 = arith.constant dense<0.000000e+00> : vector<32x128xf32>
    %40 = tpu.matmul %37, %39, %cst_23 {dimension_numbers = #tpu.dot_dimension_numbers<[1], [1], [0], [0], [0, 0, 1, 0], [], []>} : vector<32x128xf32>, vector<128x128xf32>, vector<32x128xf32> -> vector<32x128xf32>
    %41 = vector.broadcast %38 : f32 to vector<32x128xf32>
    %42 = arith.mulf %41, %40 : vector<32x128xf32>
    %c0_24 = arith.constant 0 : index
    %c0_25 = arith.constant 0 : index
    %43 = vector.load %arg9[%c0_24, %c0_25] : memref<32x128xf32, #tpu.memory_space<vmem>>, vector<32x128xf32>
    tpu.vector_store %arg9[%c0_24, %c0_25], %42 {strides = array<i32>} : memref<32x128xf32, #tpu.memory_space<vmem>>, vector<32x128xf32>,
    return
  }
  func.func @transform_0(%arg0: i32) -> (i32, i32) {
    %c0_i32 = arith.constant 0 : i32
    %c0_i32_0 = arith.constant 0 : i32
    return %arg0, %c0_i32 : i32, i32
  }
  func.func @transform_1(%arg0: i32) -> (i32, i32) {
    %c0_i32 = arith.constant 0 : i32
    %c0_i32_0 = arith.constant 0 : i32
    return %arg0, %c0_i32 : i32, i32
  }
  func.func @transform_2(%arg0: i32) -> (i32, i32) {
    %c0_i32 = arith.constant 0 : i32
    %c0_i32_0 = arith.constant 0 : i32
    %c0_i32_1 = arith.constant 0 : i32
    return %c0_i32, %c0_i32_0 : i32, i32
  }
  func.func @transform_3(%arg0: i32) -> (i32, i32) {
    %c0_i32 = arith.constant 0 : i32
    %c0_i32_0 = arith.constant 0 : i32
    %c0_i32_1 = arith.constant 0 : i32
    return %c0_i32, %c0_i32_0 : i32, i32
  }
  func.func @transform_4(%arg0: i32) -> (i32, i32) {
    %c0_i32 = arith.constant 0 : i32
    %c0_i32_0 = arith.constant 0 : i32
    %c0_i32_1 = arith.constant 0 : i32
    return %c0_i32, %c0_i32_0 : i32, i32
  }
  func.func @transform_5(%arg0: i32) -> (i32, i32) {
    %c0_i32 = arith.constant 0 : i32
    %c0_i32_0 = arith.constant 0 : i32
    %c0_i32_1 = arith.constant 0 : i32
    return %c0_i32, %c0_i32_0 : i32, i32
  }
  func.func @transform_6(%arg0: i32) -> (i32, i32) {
    %c0_i32 = arith.constant 0 : i32
    %c0_i32_0 = arith.constant 0 : i32
    %c0_i32_1 = arith.constant 0 : i32
    return %c0_i32, %c0_i32_0 : i32, i32
  }
  func.func @transform_7(%arg0: i32) -> i32 {
    %c0_i32 = arith.constant 0 : i32
    %c0_i32_0 = arith.constant 0 : i32
    return %c0_i32 : i32
  }
  func.func @transform_8(%arg0: i32) -> (i32, i32) {
    %c0_i32 = arith.constant 0 : i32
    %c0_i32_0 = arith.constant 0 : i32
    return %arg0, %c0_i32 : i32, i32
  }
}

</mosaic_0001>

<bundles_post_ra>
// kernel: threed_align_forward.3
= control target key start
LH: loop header
LB: loop body
LE: loop exit
PB: predicated region body
PF: predicated region fallthrough
CT: control target
= control target key end

     0   :  { %s846_s4 = inlined_call_operand.vmem [shape: bf16[128,128], index: 4, kind: input, shape index: {}]   ;;  %s847_s5 = inlined_call_operand.vmem [shape: f32[1,128], index: 5, kind: input, shape index: {}]   ;;  %s848_s3 = inlined_call_operand.vmem [shape: bf16[128,128], index: 3, kind: input, shape index: {}]   ;;  %s849_s1 = inlined_call_operand.vmem [shape: bf16[32,128], index: 1, kind: input, shape index: {}]   ;;  %s850_s0 = inlined_call_operand.vmem [shape: s8[32,128], index: 0, kind: input, shape index: {}]   ;;  %s851_s2 = inlined_call_operand.vmem [shape: bf16[128,128], index: 2, kind: input, shape index: {}]   ;;  %s852_s6 = inlined_call_operand.vmem [shape: f32[128,128], index: 6, kind: input, shape index: {}]   ;;  %s853_s7 = inlined_call_operand.<no memory space> [shape: f32[1], index: 7, kind: input, shape index: {}]   ;;  %s854_s8 = inlined_call_operand.vmem [shape: f32[32,128], index: 8, kind: output, shape index: {}]  }
   0x1   :  { %v592_v0 = vld [vmem:[%s846_s4 + $0x38] sm:$0xff]  ;;  %v591_v1 = vld [vmem:[%s846_s4 + $0x30] sm:$0xff]  ;;  %v590_v2 = vld [vmem:[%s846_s4 + $0x28] sm:$0xff] }
   0x2   :  { %114 = vmatpush.bf16.msra.mxu0 %v592_v0  ;;  %v589_v3 = vld [vmem:[%s846_s4 + $0x20] sm:$0xff]  ;;  %v588_v4 = vld [vmem:[%s846_s4 + $0x18] sm:$0xff]  ;;  %v587_v6 = vld [vmem:[%s846_s4 + $0x10] sm:$0xff] }
   0x3   :  { %v600_v5 = vld [vmem:[%s848_s3 + $0x38] sm:$0xff]  ;;  %v586_v7 = vld [vmem:[%s846_s4 + $0x8] sm:$0xff]  ;;  %v599_v8 = vld [vmem:[%s848_s3 + $0x30] sm:$0xff] }
   0x4   :  { %199 = vmatpush.bf16.xpose.msra.mxu1 %v600_v5  ;;  %v585_v9 = vld [vmem:[%s846_s4] sm:$0xff]  ;;  %v598_v11 = vld [vmem:[%s848_s3 + $0x28] sm:$0xff]  ;;  %v596_v14 = vld [vmem:[%s848_s3 + $0x18] sm:$0xff] }
   0x5   :  { %v583_v10 = vld [vmem:[%s849_s1] sm:$0xff]  ;;  %v584_v13 = vld [vmem:[%s849_s1 + $0x8] sm:$0xff]  ;;  %v595_v15 = vld [vmem:[%s848_s3 + $0x10] sm:$0xff] }
   0x6   :  { %115 = vmatpush.bf16.msra.mxu0 %v591_v1  ;;  %v597_v12 = vld [vmem:[%s848_s3 + $0x20] sm:$0xff]  ;;  %v594_v16 = vld [vmem:[%s848_s3 + $0x8] sm:$0xff]  ;;  %v608_v53 = vld [vmem:[%s851_s2 + $0x38] sm:$0xff] }
   0x7   :  { %v593_v17 = vld [vmem:[%s848_s3] sm:$0xff]  ;;  %341 = vmatpush.bf16.msra.mxu2 %v608_v53  ;;  %v607_v54 = vld [vmem:[%s851_s2 + $0x30] sm:$0xff]  ;;  %v606_v57 = vld [vmem:[%s851_s2 + $0x28] sm:$0xff] }
   0x8   :  { %v609_v19 = vld [vmem:[%s847_s5] ss:$0 sm:$0xff] }
   0x9   :  { %v222_v29 = vld [vmem:[%s850_s0] sm:$0xff] }
   0xa   :  { %116 = vmatpush.bf16.msra.mxu0 %v590_v2  ;;  %v223_v30 = vunpack.c.0.s8 %v222_v29  ;;  %v224_v33 = vunpack.c.1.s8 %v222_v29  ;;  %v225_v38 = vunpack.c.2.s8 %v222_v29  ;;  %v226_v43 = vunpack.c.3.s8 %v222_v29  ;;  %v605_v5 = vld [vmem:[%s851_s2 + $0x20] sm:$0xff] }
   0xb   :  { %342 = vmatpush.bf16.msra.mxu2 %v607_v54  ;;  %v433_v29 = vld [vmem:[%s852_s6 + $0x60] sm:$0xff] }
   0xc   :  { %200 = vmatpush.bf16.xpose.msra.mxu1 %v599_v8  ;;  %v227_v31 = vcvt.s32.f32 %v223_v30  ;;  %v228_v36 = vcvt.s32.f32 %v224_v33  ;;  %v229_v41 = vcvt.s32.f32 %v225_v38  ;;  %v230_v46 = vcvt.s32.f32 %v226_v43  ;;  %v602_v8 = vld [vmem:[%s851_s2 + $0x8] sm:$0xff]  ;;  %v431_v33 = vld [vmem:[%s852_s6 + $0x50] sm:$0xff]  ;;  %v425_v43 = vld [vmem:[%s852_s6 + $0x20] sm:$0xff] }
   0xe   :  { %117 = vmatpush.bf16.msra.mxu0 %v589_v3  ;;  %vm231_vm0 = vcmp.gt.f32.partialorder %v227_v31, 0.0  ;;  %vm232_vm1 = vcmp.gt.f32.partialorder %v228_v36, 0.0  ;;  %vm233_vm2 = vcmp.gt.f32.partialorder %v229_v41, 0.0  ;;  %vm234_vm3 = vcmp.gt.f32.partialorder %v230_v46, 0.0  ;;  %v430_v36 = vld [vmem:[%s852_s6 + $0x48] sm:$0xff]  ;;  %v427_v41 = vld [vmem:[%s852_s6 + $0x30] sm:$0xff] }
   0xf   :  { %343 = vmatpush.bf16.msra.mxu2 %v606_v57  ;;  %v422_v46 = vld [vmem:[%s852_s6 + $0x8] sm:$0xff] }
  0x12   :  { %118 = vmatpush.bf16.msra.mxu0 %v588_v4 }
  0x13   :  { %344 = vmatpush.bf16.msra.mxu2 %v605_v5 }
  0x14   :  { %201 = vmatpush.bf16.xpose.msra.mxu1 %v598_v11 }
  0x16   :  { %119 = vmatpush.bf16.msra.mxu0 %v587_v6  ;;  %v604_v6 = vld [vmem:[%s851_s2 + $0x18] sm:$0xff] }
  0x17   :  { %345 = vmatpush.bf16.msra.mxu2 %v604_v6 }
  0x1a   :  { %120 = vmatpush.bf16.msra.mxu0 %v586_v7  ;;  %v603_v7 = vld [vmem:[%s851_s2 + $0x10] sm:$0xff] }
  0x1b   :  { %346 = vmatpush.bf16.msra.mxu2 %v603_v7 }
  0x1c   :  { %202 = vmatpush.bf16.xpose.msra.mxu1 %v597_v12 }
  0x1e   :  { %121 = vmatpush.bf16.msra.mxu0 %v585_v9  ;;  %v601_v9 = vld [vmem:[%s851_s2] sm:$0xff] }
  0x1f   :  { %347 = vmatpush.bf16.msra.mxu2 %v602_v8 }
  0x21   :  { %122 = vmatmul.bf16.vlgmr.msra.gmra.mxu0 %v583_v10 }
  0x23   :  { %348 = vmatpush.bf16.msra.mxu2 %v601_v9 }
  0x24   :  { %203 = vmatpush.bf16.xpose.msra.mxu1 %v596_v14 }
  0x2c   :  { %204 = vmatpush.bf16.xpose.msra.mxu1 %v595_v15 }
  0x31   :  { %127 = vmatmul.bf16.gmra.mxu0 %v584_v13 }
  0x34   :  { %205 = vmatpush.bf16.xpose.msra.mxu1 %v594_v16 }
  0x3c   :  { %206 = vmatpush.bf16.xpose.msra.mxu1 %v593_v17 }
  0x9e   :  { %v123_v18 = vpop.f32.mrf.mxu0 }
  0x9f   :  { %v124_v21 = vadd.f32 %v609_v19, %v123_v18 }
  0xa6   :  { %v125_v20 = vpop.f32.mrf.mxu0 }
  0xa7   :  { %v126_v22 = vadd.f32 %v609_v19, %v125_v20 }
  0xa9   :  { %v133_v23 = vpack.c.bf16 %v126_v22, %v124_v21 }
  0xab   :  { %207 = vmatmul.bf16.vlgmr.msra.gmra.mxu1 %v133_v23 }
  0xae   :  { %v128_v24 = vpop.f32.mrf.mxu0 }
  0xaf   :  { %v129_v26 = vadd.f32 %v609_v19, %v128_v24  ;;  %v436_v24 = vld [vmem:[%s852_s6 + $0x78] sm:$0xff] }
  0xb0   :  { %437 = vmatpush.xpose.msra.mxu3 %v436_v24  ;;  %v466_v24 = vstv %s853_s7 }
  0xb6   :  { %v130_v25 = vpop.f32.mrf.mxu0 }
  0xb7   :  { %v131_v27 = vadd.f32 %v609_v19, %v130_v25  ;;  %v435_v25 = vld [vmem:[%s852_s6 + $0x70] sm:$0xff] }
  0xb8   :  { %438 = vmatpush.xpose.msra.mxu3 %v435_v25 }
  0xb9   :  { %v134_v28 = vpack.c.bf16 %v131_v27, %v129_v26 }
  0xbb   :  { %212 = vmatmul.bf16.gmra.mxu1 %v134_v28  ;;  %v434_v28 = vld [vmem:[%s852_s6 + $0x68] sm:$0xff] }
  0xbc   :  { %439 = vmatpush.xpose.msra.mxu3 %v434_v28 }
  0xc0   :  { %440 = vmatpush.xpose.msra.mxu3 %v433_v29 }
 0x128   :  { %v208_v32 = vpop.f32.mrf.mxu1 }
 0x129   :  { %v218_v34 = vmul.f32 0.17677669, %v208_v32  ;;  %v432_v32 = vld [vmem:[%s852_s6 + $0x58] sm:$0xff] }
 0x12a   :  { %441 = vmatpush.xpose.msra.mxu3 %v432_v32 }
 0x12b   :  { %v235_v35 = vsel %vm231_vm0, %v218_v34, -4.2949673e+09 }
 0x12c   :  { %239 = vmax.xlane.f32.xlu0 %v235_v35 }
 0x12e   :  { %442 = vmatpush.xpose.msra.mxu3 %v431_v33 }
 0x130   :  { %v210_v37 = vpop.f32.mrf.mxu1 }
 0x131   :  { %v219_v39 = vmul.f32 0.17677669, %v210_v37  ;;  %v429_v37 = vld [vmem:[%s852_s6 + $0x40] sm:$0xff] }
 0x132   :  { %443 = vmatpush.xpose.msra.mxu3 %v430_v36 }
 0x133   :  { %v236_v40 = vsel %vm232_vm1, %v219_v39, -4.2949673e+09 }
 0x134   :  { %241 = vmax.xlane.f32.xlu0 %v236_v40 }
 0x136   :  { %444 = vmatpush.xpose.msra.mxu3 %v429_v37 }
 0x138   :  { %v213_v42 = vpop.f32.mrf.mxu1 }
 0x139   :  { %v220_v44 = vmul.f32 0.17677669, %v213_v42  ;;  %v426_v42 = vld [vmem:[%s852_s6 + $0x28] sm:$0xff] }
 0x13b   :  { %v237_v45 = vsel %vm233_vm2, %v220_v44, -4.2949673e+09  ;;  %v424_v44 = vld [vmem:[%s852_s6 + $0x18] sm:$0xff] }
 0x13c   :  { %243 = vmax.xlane.f32.xlu1 %v237_v45 }
 0x140   :  { %v215_v47 = vpop.f32.mrf.mxu1 }
 0x141   :  { %v221_v48 = vmul.f32 0.17677669, %v215_v47  ;;  %v421_v47 = vld [vmem:[%s852_s6] sm:$0xff] }
 0x143   :  { %v238_v49 = vsel %vm234_vm3, %v221_v48, -4.2949673e+09 }
 0x144   :  { %245 = vmax.xlane.f32.xlu1 %v238_v49 }
 0x19f   :  { %v240_v50 = vpop.xlane.xlu0 %239 }
 0x1a0   :  { %v247_v51 = vsub.f32 %v235_v35, %v240_v50 }
 0x1a2   :  { %v251_v52 = vmul.f32 1.442695, %v247_v51 }
 0x1a4   :  { %610 = vpow2.f32 %v251_v52 }
 0x1a7   :  { %v242_v55 = vpop.xlane.xlu0 %241 }
 0x1a8   :  { %v248_v56 = vsub.f32 %v236_v40, %v242_v55  ;;  %v428_v40 = vld [vmem:[%s852_s6 + $0x38] sm:$0xff] }
 0x1a9   :  { %445 = vmatpush.xpose.msra.mxu3 %v428_v40 }
 0x1aa   :  { %v611_v58 = vpop.eup %610  ;;  %v253_v59 = vmul.f32 1.442695, %v248_v56 }
 0x1ab   :  { %259 = vadd.xlane.f32.xlu2 %v611_v58 }
 0x1ac   :  { %612 = vpow2.f32 %v253_v59 }
 0x1ad   :  { %446 = vmatpush.xpose.msra.mxu3 %v427_v41 }
 0x1af   :  { %v244_v60 = vpop.xlane.xlu1 %243 }
 0x1b0   :  { %v249_v61 = vsub.f32 %v237_v45, %v244_v60  ;;  %v423_v45 = vld [vmem:[%s852_s6 + $0x10] sm:$0xff] }
 0x1b1   :  { %447 = vmatpush.xpose.msra.mxu3 %v426_v42 }
 0x1b2   :  { %v613_v62 = vpop.eup %612  ;;  %v255_v63 = vmul.f32 1.442695, %v249_v61 }
 0x1b3   :  { %261 = vadd.xlane.f32.xlu2 %v613_v62 }
 0x1b4   :  { %614 = vpow2.f32 %v255_v63 }
 0x1b5   :  { %448 = vmatpush.xpose.msra.mxu3 %v425_v43 }
 0x1b7   :  { %v246_v0 = vpop.xlane.xlu1 %245 }
 0x1b8   :  { %v250_v1 = vsub.f32 %v238_v49, %v246_v0 }
 0x1b9   :  { %449 = vmatpush.xpose.msra.mxu3 %v424_v44 }
 0x1ba   :  { %v615_v2 = vpop.eup %614  ;;  %v257_v3 = vmul.f32 1.442695, %v250_v1 }
 0x1bb   :  { %263 = vadd.xlane.f32.xlu0 %v615_v2 }
 0x1bc   :  { %616 = vpow2.f32 %v257_v3 }
 0x1bd   :  { %450 = vmatpush.xpose.msra.mxu3 %v423_v45 }
 0x1c1   :  { %451 = vmatpush.xpose.msra.mxu3 %v422_v46 }
 0x1c2   :  { %v617_v4 = vpop.eup %616 }
 0x1c3   :  { %265 = vadd.xlane.f32.xlu1 %v617_v4 }
 0x1c5   :  { %452 = vmatpush.xpose.msra.mxu3 %v421_v47 }
 0x21e   :  { %v260_v10 = vpop.xlane.xlu2 %259 }
 0x21f   :  { %618 = vrcp.f32 %v260_v10 }
 0x225   :  { %v619_v12 = vpop.eup %618 }
 0x226   :  { %v262_v11 = vpop.xlane.xlu2 %261  ;;  %v271_v14 = vmul.f32 %v619_v12, %v611_v58 }
 0x227   :  { %620 = vrcp.f32 %v262_v11 }
 0x22d   :  { %v621_v13 = vpop.eup %620 }
 0x22e   :  { %v272_v15 = vmul.f32 %v621_v13, %v613_v62  ;;  %v264_v17 = vpop.xlane.xlu0 %263 }
 0x22f   :  { %622 = vrcp.f32 %v264_v17 }
 0x230   :  { %v275_v16 = vpack.c.bf16 %v272_v15, %v271_v14 }
 0x232   :  { %349 = vmatmul.bf16.vlgmr.msra.gmra.mxu2 %v275_v16 }
 0x235   :  { %v623_v19 = vpop.eup %622 }
 0x236   :  { %v266_v18 = vpop.xlane.xlu1 %265  ;;  %v273_v21 = vmul.f32 %v623_v19, %v615_v2 }
 0x237   :  { %624 = vrcp.f32 %v266_v18 }
 0x23d   :  { %v625_v20 = vpop.eup %624 }
 0x23e   :  { %v274_v22 = vmul.f32 %v625_v20, %v617_v4 }
 0x240   :  { %v276_v23 = vpack.c.bf16 %v274_v22, %v273_v21 }
 0x242   :  { %354 = vmatmul.bf16.gmra.mxu2 %v276_v23 }
 0x2b5   :  { %v769_v26 = vpop.f32.mrf.mxu2 }
 0x2b6   :  { %v360_v27 = vmul.f32 %v769_v26, %v769_v26 }
 0x2b8   :  { %364 = vadd.xlane.f32.xlu2 %v360_v27 }
 0x2bd   :  { %v779_v30 = vpop.f32.mrf.mxu2 }
 0x2be   :  { %v361_v31 = vmul.f32 %v779_v30, %v779_v30 }
 0x2c0   :  { %366 = vadd.xlane.f32.xlu0 %v361_v31 }
 0x2c5   :  { %v789_v34 = vpop.f32.mrf.mxu2 }
 0x2c6   :  { %v362_v35 = vmul.f32 %v789_v34, %v789_v34 }
 0x2c8   :  { %368 = vadd.xlane.f32.xlu1 %v362_v35 }
 0x2cd   :  { %v799_v38 = vpop.f32.mrf.mxu2 }
 0x2ce   :  { %v363_v39 = vmul.f32 %v799_v38, %v799_v38 }
 0x2d0   :  { %370 = vadd.xlane.f32.xlu2 %v363_v39 }
 0x32b   :  { %v365_v48 = vpop.xlane.xlu2 %364 }
 0x32c   :  { %v372_v49 = vadd.f32 1e-12, %v365_v48 }
 0x32e   :  { %626 = vrsqrt.f32 %v372_v49  ;;  %vm382_vm5 = vweird.f32 %v372_v49 }
 0x333   :  { %v367_v50 = vpop.xlane.xlu0 %366 }
 0x334   :  { %v627_v51 = vpop.eup %626  ;;  %v373_v52 = vadd.f32 1e-12, %v367_v50 }
 0x335   :  { %v377_v53 = vmul.f32 %v627_v51, %v372_v49  ;;  %vm383_vm4 = vweird.f32 %v627_v51 }
 0x336   :  { %628 = vrsqrt.f32 %v373_v52  ;;  %vm384_vm6 = vmor %vm382_vm5, %vm383_vm4  ;;  %vm392_vm8 = vweird.f32 %v373_v52 }
 0x337   :  { %v378_v54 = vmul.f32 %v627_v51, %v377_v53 }
 0x339   :  { %v379_v55 = vmul.f32 0.5, %v378_v54 }
 0x33b   :  { %v380_v56 = vsub.f32 1.5, %v379_v55  ;;  %v369_v57 = vpop.xlane.xlu1 %368 }
 0x33c   :  { %v629_v58 = vpop.eup %628  ;;  %v374_v59 = vadd.f32 1e-12, %v369_v57 }
 0x33d   :  { %v387_v60 = vmul.f32 %v629_v58, %v373_v52  ;;  %v381_v61 = vmul.f32 %v627_v51, %v380_v56  ;;  %vm393_vm7 = vweird.f32 %v629_v58 }
 0x33e   :  { %630 = vrsqrt.f32 %v374_v59  ;;  %vm394_vm9 = vmor %vm392_vm8, %vm393_vm7  ;;  %vm402_vm11 = vweird.f32 %v374_v59 }
 0x33f   :  { %v388_v62 = vmul.f32 %v629_v58, %v387_v60  ;;  %v385_v63 = vsel %vm384_vm6, %v627_v51, %v381_v61 }
 0x340   :  { %v416_v0 = vmul.f32 %v385_v63, %v769_v26 }
 0x341   :  { %v389_v1 = vmul.f32 0.5, %v388_v62 }
 0x342   :  { %453 = vmatmul.f32.vlgmr.msra.gmra.mxu3 %v416_v0 }
 0x343   :  { %v390_v2 = vsub.f32 1.5, %v389_v1  ;;  %v371_v3 = vpop.xlane.xlu2 %370 }
 0x344   :  { %v631_v4 = vpop.eup %630  ;;  %v375_v5 = vadd.f32 1e-12, %v371_v3 }
 0x345   :  { %v397_v6 = vmul.f32 %v631_v4, %v374_v59  ;;  %v391_v7 = vmul.f32 %v629_v58, %v390_v2  ;;  %vm403_vm10 = vweird.f32 %v631_v4 }
 0x346   :  { %632 = vrsqrt.f32 %v375_v5  ;;  %vm404_vm12 = vmor %vm402_vm11, %vm403_vm10  ;;  %vm412_vm14 = vweird.f32 %v375_v5 }
 0x347   :  { %v398_v8 = vmul.f32 %v631_v4, %v397_v6  ;;  %v395_v9 = vsel %vm394_vm9, %v629_v58, %v391_v7 }
 0x348   :  { %v417_v10 = vmul.f32 %v395_v9, %v779_v30 }
 0x349   :  { %v399_v11 = vmul.f32 0.5, %v398_v8 }
 0x34a   :  { %456 = vmatmul.f32.gmra.mxu3 %v417_v10 }
 0x34b   :  { %v400_v12 = vsub.f32 1.5, %v399_v11 }
 0x34c   :  { %v633_v13 = vpop.eup %632 }
 0x34d   :  { %v407_v14 = vmul.f32 %v633_v13, %v375_v5  ;;  %v401_v15 = vmul.f32 %v631_v4, %v400_v12  ;;  %vm413_vm13 = vweird.f32 %v633_v13 }
 0x34e   :  { %vm414_vm15 = vmor %vm412_vm14, %vm413_vm13 }
 0x34f   :  { %v408_v16 = vmul.f32 %v633_v13, %v407_v14  ;;  %v405_v17 = vsel %vm404_vm12, %v631_v4, %v401_v15 }
 0x350   :  { %v418_v18 = vmul.f32 %v405_v17, %v789_v34 }
 0x351   :  { %v409_v19 = vmul.f32 0.5, %v408_v16 }
 0x352   :  { %459 = vmatmul.f32.gmra.mxu3 %v418_v18 }
 0x353   :  { %v410_v20 = vsub.f32 1.5, %v409_v19 }
 0x355   :  { %v411_v21 = vmul.f32 %v633_v13, %v410_v20 }
 0x357   :  { %v415_v22 = vsel %vm414_vm15, %v633_v13, %v411_v21 }
 0x358   :  { %v419_v23 = vmul.f32 %v415_v22, %v799_v38 }
 0x35a   :  { %462 = vmatmul.f32.gmra.mxu3 %v419_v23 }
 0x3c5   :  { %v454_v25 = vpop.f32.mrf.mxu3 }
 0x3c6   :  { %v467_v26 = vmul.f32 %v466_v24, %v454_v25 }
 0x3c8   :  { %471 = vst [vmem:[%s854_s8] sm:$0xff] %v467_v26 }
 0x3cd   :  { %v457_v27 = vpop.f32.mrf.mxu3 }
 0x3ce   :  { %v468_v28 = vmul.f32 %v466_v24, %v457_v27 }
 0x3d0   :  { %472 = vst [vmem:[%s854_s8 + $0x8] sm:$0xff] %v468_v28 }
 0x3d5   :  { %v460_v29 = vpop.f32.mrf.mxu3 }
 0x3d6   :  { %v469_v30 = vmul.f32 %v466_v24, %v460_v29 }
 0x3d8   :  { %473 = vst [vmem:[%s854_s8 + $0x10] sm:$0xff] %v469_v30 }
 0x3dd   :  { %v463_v31 = vpop.f32.mrf.mxu3 }
 0x3de   :  { %v470_v32 = vmul.f32 %v466_v24, %v463_v31 }
 0x3e0   :  { %474 = vst [vmem:[%s854_s8 + $0x18] sm:$0xff] %v470_v32 }

// kernel: threed_align_forward.2
= control target key start
LH: loop header
LB: loop body
LE: loop exit
PB: predicated region body
PF: predicated region fallthrough
CT: control target
= control target key end

     0   :  { %15 = vsyncpa [#allocation3], 0  ;;  %s3517_s0 = inlined_call_operand.vmem [shape: f32[128,128], index: 0, kind: input, shape index: {}]   ;;  %s3518_s1 = inlined_call_operand.vmem [shape: f32[128,128], index: 1, kind: input, shape index: {}]   ;;  %s3519_s2 = inlined_call_operand.vmem [shape: f32[1,128], index: 2, kind: input, shape index: {}]   ;;  %s3520_s3 = inlined_call_operand.vmem [shape: f32[128,128], index: 3, kind: input, shape index: {}]   ;;  %s3521_s4 = inlined_call_operand.hbm [shape: f32[128,1024], index: 4, kind: input, shape index: {}]   ;;  %s3522_s5 = inlined_call_operand.vmem [shape: f32[1,1024], index: 5, kind: input, shape index: {}]   ;;  %s3523_s6 = inlined_call_operand.hbm [shape: f32[1024,128], index: 6, kind: input, shape index: {}]   ;;  %s3524_s7 = inlined_call_operand.vmem [shape: f32[1,128], index: 7, kind: input, shape index: {}]   ;;  %s3525_s8 = inlined_call_operand.vmem [shape: bf16[128,128], index: 8, kind: output, shape index: {0}]   ;;  %s3526_s9 = inlined_call_operand.vmem [shape: f32[128,128], index: 9, kind: output, shape index: {1}]  }
   0x1   :  { %s29_s11 = sshll.u32 %s3521_s4, 4  ;;  %s30_s11 = int_to_ptr.hbm [resolvable:$true] %s29_s11 }
   0x2   :  { %16 = vsyncpa [#allocation5], 0  ;;  %s2367_s12 = smov [#allocation2]   ;;  %s44_s16 = sshll.u32 %s3523_s6, 4  ;;  %s45_s16 = int_to_ptr.hbm [resolvable:$true] %s44_s16 }
   0x3   :  { %s31_s13 = sshll.u32 %s2367_s12, 4  ;;  %s2368_s17 = smov 1024   ;;  %s32_s13 = int_to_ptr.vmem [resolvable:$true] %s31_s13 }
   0x4   :  { %s2369_s18 = smov 64   ;;  %s2370_s19 = smov [#allocation4]  }
   0x5   :  { %37 = dma.hbm_to_vmem [thread:$0]  %s30_s11, 16384, %s32_s13, [#allocation3], %s2368_s17, %s2368_s17, %s2369_s18  }
   0x6   :  { %s46_s20 = sshll.u32 %s2370_s19, 4  ;;  %s2371_s21 = smov 128   ;;  %s47_s20 = int_to_ptr.vmem [resolvable:$true] %s46_s20 }
   0x7   :  { %s2372_s22 = smov 8  }
   0x8   :  { %52 = dma.hbm_to_vmem [thread:$0]  %s45_s16, 16384, %s47_s20, [#allocation5], %s2371_s21, %s2371_s21, %s2372_s22  }
   0x9   :  { %2363 = dma.done.wait [#allocation3], 16384  }
   0xa   :  { %2364 = vsyncadd [#allocation3], 4294950912 }
   0xb   :  { %2365 = dma.done.wait [#allocation5], 16384  }
   0xc   :  { %2366 = vsyncadd [#allocation5], 4294950912  ;;  %v94_v0 = vld [vmem:[%s3518_s1 + $0x78] sm:$0xff]  ;;  %v93_v1 = vld [vmem:[%s3518_s1 + $0x70] sm:$0xff] }
   0xd   :  { %99 = vmatpush.msra.mxu0 %v94_v0  ;;  %2227 = vmatpush.msra.mxu1 %v94_v0  ;;  %v92_v2 = vld [vmem:[%s3518_s1 + $0x68] sm:$0xff]  ;;  %v91_v3 = vld [vmem:[%s3518_s1 + $0x60] sm:$0xff]  ;;  %v90_v4 = vld [vmem:[%s3518_s1 + $0x58] sm:$0xff] }
   0xe   :  { %2228 = vmatpush.msra.mxu2 %v94_v0  ;;  %2229 = vmatpush.msra.mxu3 %v94_v0  ;;  %v89_v5 = vld [vmem:[%s3518_s1 + $0x50] sm:$0xff]  ;;  %v88_v6 = vld [vmem:[%s3518_s1 + $0x48] sm:$0xff]  ;;  %v87_v7 = vld [vmem:[%s3518_s1 + $0x40] sm:$0xff] }
   0xf   :  { %100 = vmatpush.msra.mxu0 %v93_v1  ;;  %2230 = vmatpush.msra.mxu1 %v93_v1  ;;  %v86_v8 = vld [vmem:[%s3518_s1 + $0x38] sm:$0xff]  ;;  %v85_v9 = vld [vmem:[%s3518_s1 + $0x30] sm:$0xff]  ;;  %v84_v10 = vld [vmem:[%s3518_s1 + $0x28] sm:$0xff] }
  0x10   :  { %2231 = vmatpush.msra.mxu2 %v93_v1  ;;  %2232 = vmatpush.msra.mxu3 %v93_v1  ;;  %v83_v11 = vld [vmem:[%s3518_s1 + $0x20] sm:$0xff]  ;;  %v82_v12 = vld [vmem:[%s3518_s1 + $0x18] sm:$0xff]  ;;  %v81_v13 = vld [vmem:[%s3518_s1 + $0x10] sm:$0xff] }
  0x11   :  { %101 = vmatpush.msra.mxu0 %v92_v2  ;;  %2233 = vmatpush.msra.mxu1 %v92_v2  ;;  %v80_v14 = vld [vmem:[%s3518_s1 + $0x8] sm:$0xff]  ;;  %v79_v15 = vld [vmem:[%s3518_s1] sm:$0xff]  ;;  %v334_v22 = vld [vmem:[#allocation2 + $0x3d0] sm:$0xff] }
  0x12   :  { %2234 = vmatpush.msra.mxu2 %v92_v2  ;;  %2235 = vmatpush.msra.mxu3 %v92_v2  ;;  %v63_v16 = vld [vmem:[%s3517_s0] sm:$0xff]  ;;  %v333_v20 = vld [vmem:[#allocation2 + $0x3c8] sm:$0xff]  ;;  %v335_v23 = vld [vmem:[#allocation2 + $0x3d8] sm:$0xff] }
  0x13   :  { %102 = vmatpush.msra.mxu0 %v91_v3  ;;  %2236 = vmatpush.msra.mxu1 %v91_v3  ;;  %v67_v17 = vld [vmem:[%s3517_s0 + $0x20] sm:$0xff]  ;;  %v325_v24 = vld [vmem:[#allocation2 + $0x388] sm:$0xff]  ;;  %v326_v26 = vld [vmem:[#allocation2 + $0x390] sm:$0xff] }
  0x14   :  { %2237 = vmatpush.msra.mxu2 %v91_v3  ;;  %2238 = vmatpush.msra.mxu3 %v91_v3  ;;  %v71_v18 = vld [vmem:[%s3517_s0 + $0x40] sm:$0xff]  ;;  %v327_v27 = vld [vmem:[#allocation2 + $0x398] sm:$0xff]  ;;  %v317_v28 = vld [vmem:[#allocation2 + $0x348] sm:$0xff] }
  0x15   :  { %103 = vmatpush.msra.mxu0 %v90_v4  ;;  %2239 = vmatpush.msra.mxu1 %v90_v4  ;;  %v75_v19 = vld [vmem:[%s3517_s0 + $0x60] sm:$0xff]  ;;  %v318_v30 = vld [vmem:[#allocation2 + $0x350] sm:$0xff]  ;;  %v319_v31 = vld [vmem:[#allocation2 + $0x358] sm:$0xff] }
  0x16   :  { %2240 = vmatpush.msra.mxu2 %v90_v4  ;;  %2241 = vmatpush.msra.mxu3 %v90_v4  ;;  %v332_v21 = vld [vmem:[#allocation2 + $0x3c0] sm:$0xff]  ;;  %v309_v32 = vld [vmem:[#allocation2 + $0x308] sm:$0xff]  ;;  %v310_v34 = vld [vmem:[#allocation2 + $0x310] sm:$0xff] }
  0x17   :  { %104 = vmatpush.msra.mxu0 %v89_v5  ;;  %2242 = vmatpush.msra.mxu1 %v89_v5  ;;  %v324_v25 = vld [vmem:[#allocation2 + $0x380] sm:$0xff]  ;;  %v311_v35 = vld [vmem:[#allocation2 + $0x318] sm:$0xff]  ;;  %v64_v36 = vld [vmem:[%s3517_s0 + $0x8] sm:$0xff] }
  0x18   :  { %2243 = vmatpush.msra.mxu2 %v89_v5  ;;  %2244 = vmatpush.msra.mxu3 %v89_v5  ;;  %v316_v29 = vld [vmem:[#allocation2 + $0x340] sm:$0xff]  ;;  %v68_v37 = vld [vmem:[%s3517_s0 + $0x28] sm:$0xff]  ;;  %v302_v42 = vld [vmem:[#allocation2 + $0x2d0] sm:$0xff] }
  0x19   :  { %105 = vmatpush.msra.mxu0 %v88_v6  ;;  %2245 = vmatpush.msra.mxu1 %v88_v6  ;;  %v308_v33 = vld [vmem:[#allocation2 + $0x300] sm:$0xff]  ;;  %v72_v38 = vld [vmem:[%s3517_s0 + $0x48] sm:$0xff]  ;;  %v303_v43 = vld [vmem:[#allocation2 + $0x2d8] sm:$0xff] }
  0x1a   :  { %2246 = vmatpush.msra.mxu2 %v88_v6  ;;  %2247 = vmatpush.msra.mxu3 %v88_v6  ;;  %v76_v39 = vld [vmem:[%s3517_s0 + $0x68] sm:$0xff]  ;;  %v300_v41 = vld [vmem:[#allocation2 + $0x2c0] sm:$0xff]  ;;  %v294_v46 = vld [vmem:[#allocation2 + $0x290] sm:$0xff] }
  0x1b   :  { %106 = vmatpush.msra.mxu0 %v87_v7  ;;  %2248 = vmatpush.msra.mxu1 %v87_v7  ;;  %v301_v40 = vld [vmem:[#allocation2 + $0x2c8] sm:$0xff]  ;;  %v292_v45 = vld [vmem:[#allocation2 + $0x280] sm:$0xff]  ;;  %v295_v47 = vld [vmem:[#allocation2 + $0x298] sm:$0xff] }
  0x1c   :  { %2249 = vmatpush.msra.mxu2 %v87_v7  ;;  %2250 = vmatpush.msra.mxu3 %v87_v7  ;;  %v293_v44 = vld [vmem:[#allocation2 + $0x288] sm:$0xff]  ;;  %v284_v49 = vld [vmem:[#allocation2 + $0x240] sm:$0xff]  ;;  %v286_v50 = vld [vmem:[#allocation2 + $0x250] sm:$0xff] }
  0x1d   :  { %107 = vmatpush.msra.mxu0 %v86_v8  ;;  %2251 = vmatpush.msra.mxu1 %v86_v8  ;;  %v285_v48 = vld [vmem:[#allocation2 + $0x248] sm:$0xff]  ;;  %v287_v51 = vld [vmem:[#allocation2 + $0x258] sm:$0xff]  ;;  %v276_v53 = vld [vmem:[#allocation2 + $0x200] sm:$0xff] }
  0x1e   :  { %2252 = vmatpush.msra.mxu2 %v86_v8  ;;  %2253 = vmatpush.msra.mxu3 %v86_v8  ;;  %v277_v52 = vld [vmem:[#allocation2 + $0x208] sm:$0xff]  ;;  %v278_v54 = vld [vmem:[#allocation2 + $0x210] sm:$0xff]  ;;  %v279_v55 = vld [vmem:[#allocation2 + $0x218] sm:$0xff] }
  0x1f   :  { %108 = vmatpush.msra.mxu0 %v85_v9  ;;  %2254 = vmatpush.msra.mxu1 %v85_v9  ;;  %v65_v56 = vld [vmem:[%s3517_s0 + $0x10] sm:$0xff]  ;;  %v269_v60 = vld [vmem:[#allocation2 + $0x1c8] sm:$0xff]  ;;  %v268_v61 = vld [vmem:[#allocation2 + $0x1c0] sm:$0xff] }
  0x20   :  { %2255 = vmatpush.msra.mxu2 %v85_v9  ;;  %2256 = vmatpush.msra.mxu3 %v85_v9  ;;  %v69_v57 = vld [vmem:[%s3517_s0 + $0x30] sm:$0xff]  ;;  %v271_v63 = vld [vmem:[#allocation2 + $0x1d8] sm:$0xff]  ;;  %v261_v0 = vld [vmem:[#allocation2 + $0x188] sm:$0xff] }
  0x21   :  { %109 = vmatpush.msra.mxu0 %v84_v10  ;;  %2257 = vmatpush.msra.mxu1 %v84_v10  ;;  %v73_v58 = vld [vmem:[%s3517_s0 + $0x50] sm:$0xff]  ;;  %v260_v1 = vld [vmem:[#allocation2 + $0x180] sm:$0xff]  ;;  %v263_v3 = vld [vmem:[#allocation2 + $0x198] sm:$0xff] }
  0x22   :  { %2258 = vmatpush.msra.mxu2 %v84_v10  ;;  %2259 = vmatpush.msra.mxu3 %v84_v10  ;;  %v77_v59 = vld [vmem:[%s3517_s0 + $0x70] sm:$0xff]  ;;  %v253_v4 = vld [vmem:[#allocation2 + $0x148] sm:$0xff]  ;;  %v252_v5 = vld [vmem:[#allocation2 + $0x140] sm:$0xff] }
  0x23   :  { %110 = vmatpush.msra.mxu0 %v83_v11  ;;  %2260 = vmatpush.msra.mxu1 %v83_v11  ;;  %v270_v62 = vld [vmem:[#allocation2 + $0x1d0] sm:$0xff]  ;;  %v255_v7 = vld [vmem:[#allocation2 + $0x158] sm:$0xff]  ;;  %v245_v8 = vld [vmem:[#allocation2 + $0x108] sm:$0xff] }
  0x24   :  { %2261 = vmatpush.msra.mxu2 %v83_v11  ;;  %2262 = vmatpush.msra.mxu3 %v83_v11  ;;  %v262_v2 = vld [vmem:[#allocation2 + $0x190] sm:$0xff]  ;;  %v244_v9 = vld [vmem:[#allocation2 + $0x100] sm:$0xff]  ;;  %v247_v11 = vld [vmem:[#allocation2 + $0x118] sm:$0xff] }
  0x25   :  { %111 = vmatpush.msra.mxu0 %v82_v12  ;;  %2263 = vmatpush.msra.mxu1 %v82_v12  ;;  %v254_v6 = vld [vmem:[#allocation2 + $0x150] sm:$0xff] }
  0x26   :  { %2264 = vmatpush.msra.mxu2 %v82_v12  ;;  %2265 = vmatpush.msra.mxu3 %v82_v12  ;;  %v246_v10 = vld [vmem:[#allocation2 + $0x110] sm:$0xff]  ;;  %v66_v12 = vld [vmem:[%s3517_s0 + $0x18] sm:$0xff] }
  0x27   :  { %112 = vmatpush.msra.mxu0 %v81_v13  ;;  %2266 = vmatpush.msra.mxu1 %v81_v13 }
  0x28   :  { %2267 = vmatpush.msra.mxu2 %v81_v13  ;;  %2268 = vmatpush.msra.mxu3 %v81_v13  ;;  %v70_v13 = vld [vmem:[%s3517_s0 + $0x38] sm:$0xff] }
  0x29   :  { %113 = vmatpush.msra.mxu0 %v80_v14  ;;  %2269 = vmatpush.msra.mxu1 %v80_v14 }
  0x2a   :  { %2270 = vmatpush.msra.mxu2 %v80_v14  ;;  %2271 = vmatpush.msra.mxu3 %v80_v14  ;;  %v74_v14 = vld [vmem:[%s3517_s0 + $0x58] sm:$0xff] }
  0x2b   :  { %114 = vmatpush.msra.mxu0 %v79_v15  ;;  %2272 = vmatpush.msra.mxu1 %v79_v15 }
  0x2c   :  { %2273 = vmatpush.msra.mxu2 %v79_v15  ;;  %2274 = vmatpush.msra.mxu3 %v79_v15  ;;  %v78_v15 = vld [vmem:[%s3517_s0 + $0x78] sm:$0xff] }
  0x2d   :  { %115 = vmatmul.f32.vlgmr.msra.gmra.mxu0 %v63_v16  ;;  %127 = vmatmul.f32.vlgmr.msra.gmra.mxu1 %v67_v17  ;;  %v237_v16 = vld [vmem:[#allocation2 + $0xc8] sm:$0xff]  ;;  %v236_v17 = vld [vmem:[#allocation2 + $0xc0] sm:$0xff] }
  0x2e   :  { %139 = vmatmul.f32.vlgmr.msra.gmra.mxu2 %v71_v18  ;;  %151 = vmatmul.f32.vlgmr.msra.gmra.mxu3 %v75_v19  ;;  %v238_v18 = vld [vmem:[#allocation2 + $0xd0] sm:$0xff]  ;;  %v239_v19 = vld [vmem:[#allocation2 + $0xd8] sm:$0xff] }
  0x2f   :  { %423 = vmatpush.msrb.mxu2 %v333_v20  ;;  %358 = vmatpush.msrb.mxu1 %v332_v21  ;;  %v229_v20 = vld [vmem:[#allocation2 + $0x88] sm:$0xff]  ;;  %v228_v21 = vld [vmem:[#allocation2 + $0x80] sm:$0xff] }
  0x30   :  { %488 = vmatpush.msrb.mxu3 %v334_v22  ;;  %553 = vmatpush.msrb.mxu0 %v335_v23  ;;  %v230_v22 = vld [vmem:[#allocation2 + $0x90] sm:$0xff]  ;;  %v231_v23 = vld [vmem:[#allocation2 + $0x98] sm:$0xff] }
  0x31   :  { %424 = vmatpush.msrb.mxu2 %v325_v24  ;;  %359 = vmatpush.msrb.mxu1 %v324_v25  ;;  %v221_v24 = vld [vmem:[#allocation2 + $0x48] sm:$0xff]  ;;  %v220_v25 = vld [vmem:[#allocation2 + $0x40] sm:$0xff] }
  0x32   :  { %489 = vmatpush.msrb.mxu3 %v326_v26  ;;  %554 = vmatpush.msrb.mxu0 %v327_v27  ;;  %v222_v26 = vld [vmem:[#allocation2 + $0x50] sm:$0xff]  ;;  %v223_v27 = vld [vmem:[#allocation2 + $0x58] sm:$0xff] }
  0x33   :  { %425 = vmatpush.msrb.mxu2 %v317_v28  ;;  %360 = vmatpush.msrb.mxu1 %v316_v29  ;;  %v213_v28 = vld [vmem:[#allocation2 + $0x8] sm:$0xff]  ;;  %v212_v29 = vld [vmem:[#allocation2] sm:$0xff] }
  0x34   :  { %490 = vmatpush.msrb.mxu3 %v318_v30  ;;  %555 = vmatpush.msrb.mxu0 %v319_v31  ;;  %v214_v30 = vld [vmem:[#allocation2 + $0x10] sm:$0xff]  ;;  %v215_v31 = vld [vmem:[#allocation2 + $0x18] sm:$0xff] }
  0x35   :  { %426 = vmatpush.msrb.mxu2 %v309_v32  ;;  %361 = vmatpush.msrb.mxu1 %v308_v33  ;;  %v2528_v32 = vld [vmem:[%s3520_s3] sm:$0xff]  ;;  %v337_v33 = vld [vmem:[#allocation2 + $0x3e8] sm:$0xff] }
  0x36   :  { %491 = vmatpush.msrb.mxu3 %v310_v34  ;;  %556 = vmatpush.msrb.mxu0 %v311_v35  ;;  %v338_v34 = vld [vmem:[#allocation2 + $0x3f0] sm:$0xff]  ;;  %v336_v35 = vld [vmem:[#allocation2 + $0x3e0] sm:$0xff] }
  0x37   :  { %118 = vmatmul.f32.gmra.mxu0 %v64_v36  ;;  %130 = vmatmul.f32.gmra.mxu1 %v68_v37  ;;  %v339_v36 = vld [vmem:[#allocation2 + $0x3f8] sm:$0xff]  ;;  %v329_v37 = vld [vmem:[#allocation2 + $0x3a8] sm:$0xff] }
  0x38   :  { %142 = vmatmul.f32.gmra.mxu2 %v72_v38  ;;  %154 = vmatmul.f32.gmra.mxu3 %v76_v39  ;;  %v330_v38 = vld [vmem:[#allocation2 + $0x3b0] sm:$0xff]  ;;  %v328_v39 = vld [vmem:[#allocation2 + $0x3a0] sm:$0xff] }
  0x39   :  { %427 = vmatpush.msrb.mxu2 %v301_v40  ;;  %362 = vmatpush.msrb.mxu1 %v300_v41  ;;  %v331_v40 = vld [vmem:[#allocation2 + $0x3b8] sm:$0xff]  ;;  %v321_v41 = vld [vmem:[#allocation2 + $0x368] sm:$0xff] }
  0x3a   :  { %492 = vmatpush.msrb.mxu3 %v302_v42  ;;  %557 = vmatpush.msrb.mxu0 %v303_v43  ;;  %v322_v42 = vld [vmem:[#allocation2 + $0x370] sm:$0xff]  ;;  %v320_v43 = vld [vmem:[#allocation2 + $0x360] sm:$0xff] }
  0x3b   :  { %428 = vmatpush.msrb.mxu2 %v293_v44  ;;  %363 = vmatpush.msrb.mxu1 %v292_v45  ;;  %v323_v44 = vld [vmem:[#allocation2 + $0x378] sm:$0xff]  ;;  %v2537_v45 = vld [vmem:[%s3520_s3 + $0x8] sm:$0xff] }
  0x3c   :  { %493 = vmatpush.msrb.mxu3 %v294_v46  ;;  %558 = vmatpush.msrb.mxu0 %v295_v47  ;;  %v313_v46 = vld [vmem:[#allocation2 + $0x328] sm:$0xff]  ;;  %v314_v47 = vld [vmem:[#allocation2 + $0x330] sm:$0xff] }
  0x3d   :  { %429 = vmatpush.msrb.mxu2 %v285_v48  ;;  %364 = vmatpush.msrb.mxu1 %v284_v49  ;;  %v312_v48 = vld [vmem:[#allocation2 + $0x320] sm:$0xff]  ;;  %v315_v49 = vld [vmem:[#allocation2 + $0x338] sm:$0xff] }
  0x3e   :  { %494 = vmatpush.msrb.mxu3 %v286_v50  ;;  %559 = vmatpush.msrb.mxu0 %v287_v51  ;;  %v305_v50 = vld [vmem:[#allocation2 + $0x2e8] sm:$0xff]  ;;  %v306_v51 = vld [vmem:[#allocation2 + $0x2f0] sm:$0xff] }
  0x3f   :  { %430 = vmatpush.msrb.mxu2 %v277_v52  ;;  %365 = vmatpush.msrb.mxu1 %v276_v53  ;;  %v304_v52 = vld [vmem:[#allocation2 + $0x2e0] sm:$0xff]  ;;  %v307_v53 = vld [vmem:[#allocation2 + $0x2f8] sm:$0xff] }
  0x40   :  { %495 = vmatpush.msrb.mxu3 %v278_v54  ;;  %560 = vmatpush.msrb.mxu0 %v279_v55  ;;  %v297_v54 = vld [vmem:[#allocation2 + $0x2a8] sm:$0xff]  ;;  %v298_v55 = vld [vmem:[#allocation2 + $0x2b0] sm:$0xff] }
  0x41   :  { %121 = vmatmul.f32.gmra.mxu0 %v65_v56  ;;  %133 = vmatmul.f32.gmra.mxu1 %v69_v57  ;;  %v296_v56 = vld [vmem:[#allocation2 + $0x2a0] sm:$0xff]  ;;  %v2546_v57 = vld [vmem:[%s3520_s3 + $0x10] sm:$0xff] }
  0x42   :  { %145 = vmatmul.f32.gmra.mxu2 %v73_v58  ;;  %157 = vmatmul.f32.gmra.mxu3 %v77_v59  ;;  %v289_v58 = vld [vmem:[#allocation2 + $0x268] sm:$0xff]  ;;  %v290_v59 = vld [vmem:[#allocation2 + $0x270] sm:$0xff] }
  0x43   :  { %431 = vmatpush.msrb.mxu2 %v269_v60  ;;  %366 = vmatpush.msrb.mxu1 %v268_v61  ;;  %v299_v60 = vld [vmem:[#allocation2 + $0x2b8] sm:$0xff]  ;;  %v288_v61 = vld [vmem:[#allocation2 + $0x260] sm:$0xff] }
  0x44   :  { %496 = vmatpush.msrb.mxu3 %v270_v62  ;;  %561 = vmatpush.msrb.mxu0 %v271_v63  ;;  %v2555_v62 = vld [vmem:[%s3520_s3 + $0x18] sm:$0xff]  ;;  %v281_v63 = vld [vmem:[#allocation2 + $0x228] sm:$0xff] }
  0x45   :  { %432 = vmatpush.msrb.mxu2 %v261_v0  ;;  %367 = vmatpush.msrb.mxu1 %v260_v1  ;;  %v282_v0 = vld [vmem:[#allocation2 + $0x230] sm:$0xff]  ;;  %v291_v1 = vld [vmem:[#allocation2 + $0x278] sm:$0xff] }
  0x46   :  { %497 = vmatpush.msrb.mxu3 %v262_v2  ;;  %562 = vmatpush.msrb.mxu0 %v263_v3  ;;  %v280_v2 = vld [vmem:[#allocation2 + $0x220] sm:$0xff] }
  0x47   :  { %433 = vmatpush.msrb.mxu2 %v253_v4  ;;  %368 = vmatpush.msrb.mxu1 %v252_v5  ;;  %v2564_v3 = vld [vmem:[%s3520_s3 + $0x20] sm:$0xff]  ;;  %v273_v4 = vld [vmem:[#allocation2 + $0x1e8] sm:$0xff]  ;;  %v274_v5 = vld [vmem:[#allocation2 + $0x1f0] sm:$0xff] }
  0x48   :  { %498 = vmatpush.msrb.mxu3 %v254_v6  ;;  %563 = vmatpush.msrb.mxu0 %v255_v7  ;;  %v283_v6 = vld [vmem:[#allocation2 + $0x238] sm:$0xff]  ;;  %v272_v7 = vld [vmem:[#allocation2 + $0x1e0] sm:$0xff] }
  0x49   :  { %434 = vmatpush.msrb.mxu2 %v245_v8  ;;  %369 = vmatpush.msrb.mxu1 %v244_v9  ;;  %v2573_v8 = vld [vmem:[%s3520_s3 + $0x28] sm:$0xff] }
  0x4a   :  { %499 = vmatpush.msrb.mxu3 %v246_v10  ;;  %564 = vmatpush.msrb.mxu0 %v247_v11  ;;  %v265_v9 = vld [vmem:[#allocation2 + $0x1a8] sm:$0xff]  ;;  %v266_v10 = vld [vmem:[#allocation2 + $0x1b0] sm:$0xff]  ;;  %v275_v11 = vld [vmem:[#allocation2 + $0x1f8] sm:$0xff] }
  0x4b   :  { %124 = vmatmul.f32.gmra.mxu0 %v66_v12  ;;  %136 = vmatmul.f32.gmra.mxu1 %v70_v13  ;;  %v264_v12 = vld [vmem:[#allocation2 + $0x1a0] sm:$0xff]  ;;  %v2582_v13 = vld [vmem:[%s3520_s3 + $0x30] sm:$0xff] }
  0x4c   :  { %148 = vmatmul.f32.gmra.mxu2 %v74_v14  ;;  %160 = vmatmul.f32.gmra.mxu3 %v78_v15  ;;  %v257_v14 = vld [vmem:[#allocation2 + $0x168] sm:$0xff]  ;;  %v258_v15 = vld [vmem:[#allocation2 + $0x170] sm:$0xff] }
  0x4d   :  { %435 = vmatpush.msrb.mxu2 %v237_v16  ;;  %370 = vmatpush.msrb.mxu1 %v236_v17  ;;  %v267_v16 = vld [vmem:[#allocation2 + $0x1b8] sm:$0xff]  ;;  %v256_v17 = vld [vmem:[#allocation2 + $0x160] sm:$0xff] }
  0x4e   :  { %500 = vmatpush.msrb.mxu3 %v238_v18  ;;  %565 = vmatpush.msrb.mxu0 %v239_v19  ;;  %v2591_v18 = vld [vmem:[%s3520_s3 + $0x38] sm:$0xff]  ;;  %v249_v19 = vld [vmem:[#allocation2 + $0x128] sm:$0xff] }
  0x4f   :  { %436 = vmatpush.msrb.mxu2 %v229_v20  ;;  %371 = vmatpush.msrb.mxu1 %v228_v21  ;;  %v250_v20 = vld [vmem:[#allocation2 + $0x130] sm:$0xff]  ;;  %v259_v21 = vld [vmem:[#allocation2 + $0x178] sm:$0xff] }
  0x50   :  { %501 = vmatpush.msrb.mxu3 %v230_v22  ;;  %566 = vmatpush.msrb.mxu0 %v231_v23  ;;  %v248_v22 = vld [vmem:[#allocation2 + $0x120] sm:$0xff] }
  0x51   :  { %437 = vmatpush.msrb.mxu2 %v221_v24  ;;  %372 = vmatpush.msrb.mxu1 %v220_v25  ;;  %v2600_v23 = vld [vmem:[%s3520_s3 + $0x40] sm:$0xff]  ;;  %v241_v24 = vld [vmem:[#allocation2 + $0xe8] sm:$0xff]  ;;  %v242_v25 = vld [vmem:[#allocation2 + $0xf0] sm:$0xff] }
  0x52   :  { %502 = vmatpush.msrb.mxu3 %v222_v26  ;;  %567 = vmatpush.msrb.mxu0 %v223_v27  ;;  %v251_v26 = vld [vmem:[#allocation2 + $0x138] sm:$0xff]  ;;  %v240_v27 = vld [vmem:[#allocation2 + $0xe0] sm:$0xff] }
  0x53   :  { %438 = vmatpush.msrb.mxu2 %v213_v28  ;;  %373 = vmatpush.msrb.mxu1 %v212_v29  ;;  %v2609_v28 = vld [vmem:[%s3520_s3 + $0x48] sm:$0xff] }
  0x54   :  { %503 = vmatpush.msrb.mxu3 %v214_v30  ;;  %568 = vmatpush.msrb.mxu0 %v215_v31  ;;  %v233_v29 = vld [vmem:[#allocation2 + $0xa8] sm:$0xff]  ;;  %v234_v30 = vld [vmem:[#allocation2 + $0xb0] sm:$0xff]  ;;  %v243_v31 = vld [vmem:[#allocation2 + $0xf8] sm:$0xff] }
  0x55   :  { %374 = vmatmul.f32.vlgmr.msrb.gmra.mxu1 %v2528_v32  ;;  %439 = vmatmul.f32.vlgmr.msrb.gmra.mxu2 %v2528_v32 }
  0x56   :  { %504 = vmatmul.f32.vlgmr.msrb.gmra.mxu3 %v2528_v32  ;;  %569 = vmatmul.f32.vlgmr.msrb.gmra.mxu0 %v2528_v32 }
  0x57   :  { %683 = vmatpush.msra.mxu2 %v337_v33  ;;  %748 = vmatpush.msra.mxu3 %v338_v34  ;;  %v232_v33 = vld [vmem:[#allocation2 + $0xa0] sm:$0xff]  ;;  %v2618_v34 = vld [vmem:[%s3520_s3 + $0x50] sm:$0xff] }
  0x58   :  { %618 = vmatpush.msra.mxu1 %v336_v35  ;;  %813 = vmatpush.msra.mxu0 %v339_v36  ;;  %v225_v35 = vld [vmem:[#allocation2 + $0x68] sm:$0xff]  ;;  %v226_v36 = vld [vmem:[#allocation2 + $0x70] sm:$0xff] }
  0x59   :  { %684 = vmatpush.msra.mxu2 %v329_v37  ;;  %749 = vmatpush.msra.mxu3 %v330_v38  ;;  %v235_v37 = vld [vmem:[#allocation2 + $0xb8] sm:$0xff]  ;;  %v224_v38 = vld [vmem:[#allocation2 + $0x60] sm:$0xff] }
  0x5a   :  { %619 = vmatpush.msra.mxu1 %v328_v39  ;;  %814 = vmatpush.msra.mxu0 %v331_v40  ;;  %v2627_v39 = vld [vmem:[%s3520_s3 + $0x58] sm:$0xff] }
  0x5b   :  { %685 = vmatpush.msra.mxu2 %v321_v41  ;;  %750 = vmatpush.msra.mxu3 %v322_v42  ;;  %v217_v42 = vld [vmem:[#allocation2 + $0x28] sm:$0xff] }
  0x5c   :  { %620 = vmatpush.msra.mxu1 %v320_v43  ;;  %815 = vmatpush.msra.mxu0 %v323_v44  ;;  %v218_v43 = vld [vmem:[#allocation2 + $0x30] sm:$0xff]  ;;  %v227_v44 = vld [vmem:[#allocation2 + $0x78] sm:$0xff] }
  0x5d   :  { %377 = vmatmul.f32.gmra.mxu1 %v2537_v45  ;;  %442 = vmatmul.f32.gmra.mxu2 %v2537_v45 }
  0x5e   :  { %507 = vmatmul.f32.gmra.mxu3 %v2537_v45  ;;  %572 = vmatmul.f32.gmra.mxu0 %v2537_v45 }
  0x5f   :  { %686 = vmatpush.msra.mxu2 %v313_v46  ;;  %751 = vmatpush.msra.mxu3 %v314_v47  ;;  %v2636_v46 = vld [vmem:[%s3519_s2] ss:$0 sm:$0xff] }
  0x60   :  { %621 = vmatpush.msra.mxu1 %v312_v48  ;;  %816 = vmatpush.msra.mxu0 %v315_v49  ;;  %v2641_v49 = vld [vmem:[%s3520_s3 + $0x60] sm:$0xff] }
  0x61   :  { %687 = vmatpush.msra.mxu2 %v305_v50  ;;  %752 = vmatpush.msra.mxu3 %v306_v51 }
  0x62   :  { %622 = vmatpush.msra.mxu1 %v304_v52  ;;  %817 = vmatpush.msra.mxu0 %v307_v53  ;;  %v216_v53 = vld [vmem:[#allocation2 + $0x20] sm:$0xff] }
  0x63   :  { %688 = vmatpush.msra.mxu2 %v297_v54  ;;  %753 = vmatpush.msra.mxu3 %v298_v55  ;;  %v219_v54 = vld [vmem:[#allocation2 + $0x38] sm:$0xff] }
  0x64   :  { %623 = vmatpush.msra.mxu1 %v296_v56  ;;  %818 = vmatpush.msra.mxu0 %v299_v60  ;;  %v1309_v60 = vld [vmem:[#allocation4 + $0x178] sm:$0xff] }
  0x65   :  { %380 = vmatmul.f32.gmra.mxu1 %v2546_v57  ;;  %445 = vmatmul.f32.gmra.mxu2 %v2546_v57 }
  0x66   :  { %510 = vmatmul.f32.gmra.mxu3 %v2546_v57  ;;  %575 = vmatmul.f32.gmra.mxu0 %v2546_v57 }
  0x67   :  { %689 = vmatpush.msra.mxu2 %v289_v58  ;;  %754 = vmatpush.msra.mxu3 %v290_v59  ;;  %v1293_v59 = vld [vmem:[#allocation4 + $0xf8] sm:$0xff] }
  0x68   :  { %624 = vmatpush.msra.mxu1 %v288_v61  ;;  %819 = vmatpush.msra.mxu0 %v291_v1 }
  0x69   :  { %690 = vmatpush.msra.mxu2 %v281_v63  ;;  %755 = vmatpush.msra.mxu3 %v282_v0  ;;  %v2660_v0 = vld [vmem:[%s3520_s3 + $0x68] sm:$0xff] }
  0x6a   :  { %625 = vmatpush.msra.mxu1 %v280_v2  ;;  %820 = vmatpush.msra.mxu0 %v283_v6 }
  0x6b   :  { %691 = vmatpush.msra.mxu2 %v273_v4  ;;  %756 = vmatpush.msra.mxu3 %v274_v5 }
  0x6c   :  { %626 = vmatpush.msra.mxu1 %v272_v7  ;;  %821 = vmatpush.msra.mxu0 %v275_v11 }
  0x6d   :  { %383 = vmatmul.f32.gmra.mxu1 %v2555_v62  ;;  %448 = vmatmul.f32.gmra.mxu2 %v2555_v62 }
  0x6e   :  { %513 = vmatmul.f32.gmra.mxu3 %v2555_v62  ;;  %578 = vmatmul.f32.gmra.mxu0 %v2555_v62 }
  0x6f   :  { %692 = vmatpush.msra.mxu2 %v265_v9  ;;  %757 = vmatpush.msra.mxu3 %v266_v10  ;;  %v1277_v9 = vld [vmem:[#allocation4 + $0x78] sm:$0xff] }
  0x70   :  { %627 = vmatpush.msra.mxu1 %v264_v12  ;;  %822 = vmatpush.msra.mxu0 %v267_v16  ;;  %v1308_v16 = vld [vmem:[#allocation4 + $0x170] sm:$0xff] }
  0x71   :  { %693 = vmatpush.msra.mxu2 %v257_v14  ;;  %758 = vmatpush.msra.mxu3 %v258_v15  ;;  %v1292_v15 = vld [vmem:[#allocation4 + $0xf0] sm:$0xff] }
  0x72   :  { %628 = vmatpush.msra.mxu1 %v256_v17  ;;  %823 = vmatpush.msra.mxu0 %v259_v21  ;;  %v1325_v17 = vld [vmem:[#allocation4 + $0x1f8] sm:$0xff] }
  0x73   :  { %694 = vmatpush.msra.mxu2 %v249_v19  ;;  %759 = vmatpush.msra.mxu3 %v250_v20  ;;  %v2679_v19 = vld [vmem:[%s3520_s3 + $0x70] sm:$0xff] }
  0x74   :  { %629 = vmatpush.msra.mxu1 %v248_v22  ;;  %824 = vmatpush.msra.mxu0 %v251_v26  ;;  %v1276_v20 = vld [vmem:[#allocation4 + $0x70] sm:$0xff] }
  0x75   :  { %386 = vmatmul.f32.gmra.mxu1 %v2564_v3  ;;  %451 = vmatmul.f32.gmra.mxu2 %v2564_v3  ;;  %v1324_v26 = vld [vmem:[#allocation4 + $0x1f0] sm:$0xff] }
  0x76   :  { %516 = vmatmul.f32.gmra.mxu3 %v2564_v3  ;;  %581 = vmatmul.f32.gmra.mxu0 %v2564_v3 }
  0x77   :  { %695 = vmatpush.msra.mxu2 %v241_v24  ;;  %760 = vmatpush.msra.mxu3 %v242_v25  ;;  %v1291_v24 = vld [vmem:[#allocation4 + $0xe8] sm:$0xff] }
  0x78   :  { %630 = vmatpush.msra.mxu1 %v240_v27  ;;  %825 = vmatpush.msra.mxu0 %v243_v31  ;;  %v1307_v25 = vld [vmem:[#allocation4 + $0x168] sm:$0xff] }
  0x79   :  { %696 = vmatpush.msra.mxu2 %v233_v29  ;;  %761 = vmatpush.msra.mxu3 %v234_v30 }
  0x7a   :  { %631 = vmatpush.msra.mxu1 %v232_v33  ;;  %826 = vmatpush.msra.mxu0 %v235_v37  ;;  %v1275_v37 = vld [vmem:[#allocation4 + $0x68] sm:$0xff] }
  0x7b   :  { %697 = vmatpush.msra.mxu2 %v225_v35  ;;  %762 = vmatpush.msra.mxu3 %v226_v36  ;;  %v2692_v36 = vld [vmem:[%s3520_s3 + $0x78] sm:$0xff] }
  0x7c   :  { %632 = vmatpush.msra.mxu1 %v224_v38  ;;  %827 = vmatpush.msra.mxu0 %v227_v44 }
  0x7d   :  { %389 = vmatmul.f32.gmra.mxu1 %v2573_v8  ;;  %454 = vmatmul.f32.gmra.mxu2 %v2573_v8 }
  0x7e   :  { %519 = vmatmul.f32.gmra.mxu3 %v2573_v8  ;;  %584 = vmatmul.f32.gmra.mxu0 %v2573_v8 }
  0x7f   :  { %698 = vmatpush.msra.mxu2 %v217_v42  ;;  %763 = vmatpush.msra.mxu3 %v218_v43  ;;  %v1306_v42 = vld [vmem:[#allocation4 + $0x160] sm:$0xff]  ;;  %v1323_v43 = vld [vmem:[#allocation4 + $0x1e8] sm:$0xff] }
  0x80   :  { %633 = vmatpush.msra.mxu1 %v216_v53  ;;  %828 = vmatpush.msra.mxu0 %v219_v54 }
  0x81   :  { %1459 = vmatpush.msrb.mxu2 %v1293_v59  ;;  %1524 = vmatpush.msrb.mxu3 %v1309_v60  ;;  %v1305_v59 = vld [vmem:[#allocation4 + $0x158] sm:$0xff]  ;;  %v1322_v60 = vld [vmem:[#allocation4 + $0x1e0] sm:$0xff] }
  0x82   :  { %1394 = vmatpush.msrb.mxu1 %v1277_v9  ;;  %1589 = vmatpush.msrb.mxu0 %v1325_v17 }
  0x83   :  { %1460 = vmatpush.msrb.mxu2 %v1292_v15  ;;  %1525 = vmatpush.msrb.mxu3 %v1308_v16  ;;  %v1320_v15 = vld [vmem:[#allocation4 + $0x1d0] sm:$0xff] }
  0x84   :  { %1395 = vmatpush.msrb.mxu1 %v1276_v20  ;;  %1590 = vmatpush.msrb.mxu0 %v1324_v26 }
  0x85   :  { %392 = vmatmul.f32.gmra.mxu1 %v2582_v13  ;;  %457 = vmatmul.f32.gmra.mxu2 %v2582_v13 }
  0x86   :  { %522 = vmatmul.f32.gmra.mxu3 %v2582_v13  ;;  %587 = vmatmul.f32.gmra.mxu0 %v2582_v13 }
  0x87   :  { %1461 = vmatpush.msrb.mxu2 %v1291_v24  ;;  %1526 = vmatpush.msrb.mxu3 %v1307_v25  ;;  %v1302_v24 = vld [vmem:[#allocation4 + $0x140] sm:$0xff]  ;;  %v1319_v25 = vld [vmem:[#allocation4 + $0x1c8] sm:$0xff] }
  0x88   :  { %1396 = vmatpush.msrb.mxu1 %v1275_v37  ;;  %1591 = vmatpush.msrb.mxu0 %v1323_v43  ;;  %v1300_v43 = vld [vmem:[#allocation4 + $0x130] sm:$0xff] }
  0x89   :  { %1527 = vmatpush.msrb.mxu3 %v1306_v42 }
  0x8a   :  { %1592 = vmatpush.msrb.mxu0 %v1322_v60  ;;  %v1267_v60 = vld [vmem:[#allocation4 + $0x28] sm:$0xff] }
  0x8b   :  { %1528 = vmatpush.msrb.mxu3 %v1305_v59 }
  0x8d   :  { %395 = vmatmul.f32.gmra.mxu1 %v2591_v18  ;;  %460 = vmatmul.f32.gmra.mxu2 %v2591_v18 }
  0x8e   :  { %525 = vmatmul.f32.gmra.mxu3 %v2591_v18  ;;  %590 = vmatmul.f32.gmra.mxu0 %v2591_v18 }
  0x95   :  { %398 = vmatmul.f32.gmra.mxu1 %v2600_v23  ;;  %463 = vmatmul.f32.gmra.mxu2 %v2600_v23 }
  0x96   :  { %528 = vmatmul.f32.gmra.mxu3 %v2600_v23  ;;  %593 = vmatmul.f32.gmra.mxu0 %v2600_v23 }
  0x9d   :  { %401 = vmatmul.f32.gmra.mxu1 %v2609_v28  ;;  %466 = vmatmul.f32.gmra.mxu2 %v2609_v28 }
  0x9e   :  { %531 = vmatmul.f32.gmra.mxu3 %v2609_v28  ;;  %596 = vmatmul.f32.gmra.mxu0 %v2609_v28 }
  0xa5   :  { %404 = vmatmul.f32.gmra.mxu1 %v2618_v34  ;;  %469 = vmatmul.f32.gmra.mxu2 %v2618_v34 }
  0xa6   :  { %534 = vmatmul.f32.gmra.mxu3 %v2618_v34  ;;  %599 = vmatmul.f32.gmra.mxu0 %v2618_v34 }
  0xaa   :  { %v116_v40 = vpop.f32.mrf.mxu0  ;;  %v128_v41 = vpop.f32.mrf.mxu1 }
  0xab   :  { %v117_v50 = vadd.f32 %v2636_v46, %v116_v40  ;;  %v129_v55 = vadd.f32 %v2636_v46, %v128_v41  ;;  %v1290_v41 = vld [vmem:[#allocation4 + $0xe0] sm:$0xff] }
  0xac   :  { %1462 = vmatpush.msrb.mxu2 %v1290_v41  ;;  %v1269_v41 = vld [vmem:[#allocation4 + $0x38] sm:$0xff] }
  0xad   :  { %407 = vmatmul.f32.gmra.mxu1 %v2627_v39  ;;  %472 = vmatmul.f32.gmra.mxu2 %v2627_v39 }
  0xae   :  { %537 = vmatmul.f32.gmra.mxu3 %v2627_v39  ;;  %602 = vmatmul.f32.gmra.mxu0 %v2627_v39 }
  0xb1   :  { %v140_v47 = vpop.f32.mrf.mxu2  ;;  %v152_v48 = vpop.f32.mrf.mxu3 }
  0xb2   :  { %v141_v4 = vadd.f32 %v2636_v46, %v140_v47  ;;  %v153_v5 = vadd.f32 %v2636_v46, %v152_v48 }
  0xb4   :  { %v119_v51 = vpop.f32.mrf.mxu0  ;;  %v131_v52 = vpop.f32.mrf.mxu1 }
  0xb5   :  { %410 = vmatmul.f32.gmra.mxu1 %v2641_v49  ;;  %475 = vmatmul.f32.gmra.mxu2 %v2641_v49  ;;  %v120_v56 = vadd.f32 %v2636_v46, %v119_v51  ;;  %v132_v58 = vadd.f32 %v2636_v46, %v131_v52 }
  0xb6   :  { %540 = vmatmul.f32.gmra.mxu3 %v2641_v49  ;;  %605 = vmatmul.f32.gmra.mxu0 %v2641_v49 }
  0xb7   :  { %v2183_v61 = vpack.c.bf16 %v120_v56, %v117_v50  ;;  %v2193_v63 = vpack.c.bf16 %v132_v58, %v129_v55  ;;  %v1274_v56 = vld [vmem:[#allocation4 + $0x60] sm:$0xff] }
  0xb8   :  { %1397 = vmatpush.msrb.mxu1 %v1274_v56 }
  0xb9   :  { %2184 = vst [vmem:[%s3525_s8] sm:$0xff] %v2183_v61  }
  0xba   :  { %2221 = vst [vmem:[%s3525_s8 + $0x10] sm:$0xff] %v2193_v63  }
  0xbb   :  { %v143_v1 = vpop.f32.mrf.mxu2  ;;  %v155_v2 = vpop.f32.mrf.mxu3 }
  0xbc   :  { %v144_v6 = vadd.f32 %v2636_v46, %v143_v1  ;;  %v156_v7 = vadd.f32 %v2636_v46, %v155_v2  ;;  %v1273_v2 = vld [vmem:[#allocation4 + $0x58] sm:$0xff] }
  0xbd   :  { %413 = vmatmul.f32.gmra.mxu1 %v2660_v0  ;;  %478 = vmatmul.f32.gmra.mxu2 %v2660_v0 }
  0xbe   :  { %543 = vmatmul.f32.gmra.mxu3 %v2660_v0  ;;  %608 = vmatmul.f32.gmra.mxu0 %v2660_v0  ;;  %v2203_v10 = vpack.c.bf16 %v144_v6, %v141_v4  ;;  %v2213_v11 = vpack.c.bf16 %v156_v7, %v153_v5  ;;  %v122_v12 = vpop.f32.mrf.mxu0  ;;  %v134_v14 = vpop.f32.mrf.mxu1  ;;  %v1304_v5 = vld [vmem:[#allocation4 + $0x150] sm:$0xff]  ;;  %v1321_v6 = vld [vmem:[#allocation4 + $0x1d8] sm:$0xff] }
  0xbf   :  { %v123_v27 = vadd.f32 %v2636_v46, %v122_v12  ;;  %v135_v31 = vadd.f32 %v2636_v46, %v134_v14  ;;  %1398 = vmatpush.msrb.mxu1 %v1273_v2  ;;  %1529 = vmatpush.msrb.mxu3 %v1304_v5  ;;  %v1303_v14 = vld [vmem:[#allocation4 + $0x148] sm:$0xff] }
  0xc0   :  { %2223 = vst [vmem:[%s3525_s8 + $0x20] sm:$0xff] %v2203_v10   ;;  %1593 = vmatpush.msrb.mxu0 %v1321_v6  ;;  %v1315_v5 = vld [vmem:[#allocation4 + $0x1a8] sm:$0xff] }
  0xc1   :  { %2225 = vst [vmem:[%s3525_s8 + $0x30] sm:$0xff] %v2213_v11   ;;  %v1272_v11 = vld [vmem:[#allocation4 + $0x50] sm:$0xff]  ;;  %1530 = vmatpush.msrb.mxu3 %v1303_v14  ;;  %v1266_v14 = vld [vmem:[#allocation4 + $0x20] sm:$0xff] }
  0xc2   :  { %1399 = vmatpush.msrb.mxu1 %v1272_v11  ;;  %1594 = vmatpush.msrb.mxu0 %v1320_v15 }
  0xc3   :  { %1531 = vmatpush.msrb.mxu3 %v1302_v24 }
  0xc4   :  { %1595 = vmatpush.msrb.mxu0 %v1319_v25 }
  0xc5   :  { %416 = vmatmul.f32.gmra.mxu1 %v2679_v19  ;;  %481 = vmatmul.f32.gmra.mxu2 %v2679_v19  ;;  %v146_v21 = vpop.f32.mrf.mxu2  ;;  %v158_v22 = vpop.f32.mrf.mxu3 }
  0xc6   :  { %546 = vmatmul.f32.gmra.mxu3 %v2679_v19  ;;  %611 = vmatmul.f32.gmra.mxu0 %v2679_v19  ;;  %v147_v48 = vadd.f32 %v2636_v46, %v146_v21  ;;  %v159_v50 = vadd.f32 %v2636_v46, %v158_v22  ;;  %v1271_v21 = vld [vmem:[#allocation4 + $0x48] sm:$0xff] }
  0xc7   :  { %1400 = vmatpush.msrb.mxu1 %v1271_v21  ;;  %v1297_v21 = vld [vmem:[#allocation4 + $0x118] sm:$0xff] }
  0xc8   :  { %v125_v29 = vpop.f32.mrf.mxu0  ;;  %v137_v30 = vpop.f32.mrf.mxu1 }
  0xc9   :  { %v126_v33 = vadd.f32 %v2636_v46, %v125_v29  ;;  %v138_v35 = vadd.f32 %v2636_v46, %v137_v30  ;;  %v1270_v30 = vld [vmem:[#allocation4 + $0x40] sm:$0xff] }
  0xca   :  { %1401 = vmatpush.msrb.mxu1 %v1270_v30 }
  0xcb   :  { %v2188_v38 = vpack.c.bf16 %v126_v33, %v123_v27  ;;  %v2198_v40 = vpack.c.bf16 %v138_v35, %v135_v31  ;;  %v1301_v33 = vld [vmem:[#allocation4 + $0x138] sm:$0xff]  ;;  %v1318_v35 = vld [vmem:[#allocation4 + $0x1c0] sm:$0xff] }
  0xcc   :  { %1532 = vmatpush.msrb.mxu3 %v1301_v33  ;;  %1596 = vmatpush.msrb.mxu0 %v1318_v35  ;;  %v1296_v35 = vld [vmem:[#allocation4 + $0x110] sm:$0xff] }
  0xcd   :  { %2220 = vst [vmem:[%s3525_s8 + $0x8] sm:$0xff] %v2188_v38   ;;  %419 = vmatmul.f32.gmra.mxu1 %v2692_v36  ;;  %484 = vmatmul.f32.gmra.mxu2 %v2692_v36 }
  0xce   :  { %2222 = vst [vmem:[%s3525_s8 + $0x18] sm:$0xff] %v2198_v40   ;;  %549 = vmatmul.f32.gmra.mxu3 %v2692_v36  ;;  %614 = vmatmul.f32.gmra.mxu0 %v2692_v36 }
  0xcf   :  { %v149_v44 = vpop.f32.mrf.mxu2  ;;  %v161_v47 = vpop.f32.mrf.mxu3  ;;  %1402 = vmatpush.msrb.mxu1 %v1269_v41  ;;  %1533 = vmatpush.msrb.mxu3 %v1300_v43  ;;  %v1313_v41 = vld [vmem:[#allocation4 + $0x198] sm:$0xff] }
  0xd0   :  { %v150_v51 = vadd.f32 %v2636_v46, %v149_v44  ;;  %v162_v52 = vadd.f32 %v2636_v46, %v161_v47  ;;  %v1289_v46 = vld [vmem:[#allocation4 + $0xd8] sm:$0xff] }
  0xd1   :  { %1463 = vmatpush.msrb.mxu2 %v1289_v46  ;;  %v1317_v44 = vld [vmem:[#allocation4 + $0x1b8] sm:$0xff] }
  0xd2   :  { %v2208_v53 = vpack.c.bf16 %v150_v51, %v147_v48  ;;  %v2218_v54 = vpack.c.bf16 %v162_v52, %v159_v50  ;;  %v2708_v55 = vpop.f32.mrf.mxu1  ;;  %1597 = vmatpush.msrb.mxu0 %v1317_v44  ;;  %v1268_v51 = vld [vmem:[#allocation4 + $0x30] sm:$0xff] }
  0xd3   :  { %v2710_v58 = vpop.f32.mrf.mxu0  ;;  %1403 = vmatpush.msrb.mxu1 %v1268_v51  ;;  %v1264_v51 = vld [vmem:[#allocation4 + $0x10] sm:$0xff] }
  0xd4   :  { %2224 = vst [vmem:[%s3525_s8 + $0x28] sm:$0xff] %v2208_v53   ;;  %v1299_v53 = vld [vmem:[#allocation4 + $0x128] sm:$0xff] }
  0xd5   :  { %2226 = vst [vmem:[%s3525_s8 + $0x38] sm:$0xff] %v2218_v54   ;;  %634 = vmatmul.f32.vlgmr.msra.gmra.mxu1 %v2528_v32  ;;  %699 = vmatmul.f32.vlgmr.msra.gmra.mxu2 %v2528_v32  ;;  %v1316_v54 = vld [vmem:[#allocation4 + $0x1b0] sm:$0xff] }
  0xd6   :  { %764 = vmatmul.f32.vlgmr.msra.gmra.mxu3 %v2528_v32  ;;  %829 = vmatmul.f32.vlgmr.msra.gmra.mxu0 %v2528_v32  ;;  %v1288_v32 = vld [vmem:[#allocation4 + $0xd0] sm:$0xff] }
  0xd7   :  { %1464 = vmatpush.msrb.mxu2 %v1288_v32  ;;  %1534 = vmatpush.msrb.mxu3 %v1299_v53  ;;  %v1298_v32 = vld [vmem:[#allocation4 + $0x120] sm:$0xff]  ;;  %v1295_v53 = vld [vmem:[#allocation4 + $0x108] sm:$0xff] }
  0xd8   :  { %v2722_v61 = vpop.f32.mrf.mxu2  ;;  %1598 = vmatpush.msrb.mxu0 %v1316_v54  ;;  %1404 = vmatpush.msrb.mxu1 %v1267_v60  ;;  %v1312_v54 = vld [vmem:[#allocation4 + $0x190] sm:$0xff] }
  0xd9   :  { %v2724_v63 = vpop.f32.mrf.mxu3  ;;  %1535 = vmatpush.msrb.mxu3 %v1298_v32 }
  0xda   :  { %v2726_v1 = vpop.f32.mrf.mxu1  ;;  %1599 = vmatpush.msrb.mxu0 %v1315_v5  ;;  %1405 = vmatpush.msrb.mxu1 %v1266_v14  ;;  %v1263_v5 = vld [vmem:[#allocation4 + $0x8] sm:$0xff] }
  0xdb   :  { %v2728_v4 = vpop.f32.mrf.mxu0  ;;  %1536 = vmatpush.msrb.mxu3 %v1297_v21  ;;  %v1311_v21 = vld [vmem:[#allocation4 + $0x188] sm:$0xff] }
  0xdd   :  { %637 = vmatmul.f32.gmra.mxu1 %v2537_v45  ;;  %702 = vmatmul.f32.gmra.mxu2 %v2537_v45 }
  0xde   :  { %767 = vmatmul.f32.gmra.mxu3 %v2537_v45  ;;  %832 = vmatmul.f32.gmra.mxu0 %v2537_v45  ;;  %v1287_v45 = vld [vmem:[#allocation4 + $0xc8] sm:$0xff] }
  0xdf   :  { %1465 = vmatpush.msrb.mxu2 %v1287_v45  ;;  %1537 = vmatpush.msrb.mxu3 %v1296_v35  ;;  %v1262_v35 = vld [vmem:[#allocation4] sm:$0xff] }
  0xe0   :  { %v2734_v7 = vpop.f32.mrf.mxu2 }
  0xe1   :  { %v2736_v9 = vpop.f32.mrf.mxu3  ;;  %1538 = vmatpush.msrb.mxu3 %v1295_v53 }
  0xe2   :  { %v2738_v10 = vpop.f32.mrf.mxu1 }
  0xe3   :  { %v2740_v12 = vpop.f32.mrf.mxu0 }
  0xe5   :  { %640 = vmatmul.f32.gmra.mxu1 %v2546_v57  ;;  %705 = vmatmul.f32.gmra.mxu2 %v2546_v57 }
  0xe6   :  { %770 = vmatmul.f32.gmra.mxu3 %v2546_v57  ;;  %835 = vmatmul.f32.gmra.mxu0 %v2546_v57  ;;  %v1286_v57 = vld [vmem:[#allocation4 + $0xc0] sm:$0xff] }
  0xe7   :  { %1466 = vmatpush.msrb.mxu2 %v1286_v57  ;;  %v1314_v57 = vld [vmem:[#allocation4 + $0x1a0] sm:$0xff] }
  0xe8   :  { %v2746_v16 = vpop.f32.mrf.mxu2  ;;  %1600 = vmatpush.msrb.mxu0 %v1314_v57 }
  0xe9   :  { %v2748_v17 = vpop.f32.mrf.mxu3 }
  0xea   :  { %v2750_v20 = vpop.f32.mrf.mxu1  ;;  %1601 = vmatpush.msrb.mxu0 %v1313_v41 }
  0xeb   :  { %v2752_v22 = vpop.f32.mrf.mxu0 }
  0xec   :  { %1602 = vmatpush.msrb.mxu0 %v1312_v54 }
  0xed   :  { %643 = vmatmul.f32.gmra.mxu1 %v2555_v62  ;;  %708 = vmatmul.f32.gmra.mxu2 %v2555_v62 }
  0xee   :  { %773 = vmatmul.f32.gmra.mxu3 %v2555_v62  ;;  %838 = vmatmul.f32.gmra.mxu0 %v2555_v62  ;;  %v1285_v62 = vld [vmem:[#allocation4 + $0xb8] sm:$0xff] }
  0xef   :  { %1467 = vmatpush.msrb.mxu2 %v1285_v62  ;;  %v1265_v62 = vld [vmem:[#allocation4 + $0x18] sm:$0xff]  ;;  %1603 = vmatpush.msrb.mxu0 %v1311_v21  ;;  %v1372_v21 = vld [vmem:[#allocation4 + $0x370] sm:$0xff] }
  0xf0   :  { %v2758_v26 = vpop.f32.mrf.mxu2  ;;  %1406 = vmatpush.msrb.mxu1 %v1265_v62 }
  0xf1   :  { %v2760_v27 = vpop.f32.mrf.mxu3 }
  0xf2   :  { %v2762_v29 = vpop.f32.mrf.mxu1  ;;  %1407 = vmatpush.msrb.mxu1 %v1264_v51  ;;  %v1310_v51 = vld [vmem:[#allocation4 + $0x180] sm:$0xff] }
  0xf3   :  { %v2764_v31 = vpop.f32.mrf.mxu0  ;;  %1604 = vmatpush.msrb.mxu0 %v1310_v51 }
  0xf4   :  { %1408 = vmatpush.msrb.mxu1 %v1263_v5 }
  0xf5   :  { %646 = vmatmul.f32.gmra.mxu1 %v2564_v3  ;;  %711 = vmatmul.f32.gmra.mxu2 %v2564_v3 }
  0xf6   :  { %776 = vmatmul.f32.gmra.mxu3 %v2564_v3  ;;  %841 = vmatmul.f32.gmra.mxu0 %v2564_v3  ;;  %v1284_v3 = vld [vmem:[#allocation4 + $0xb0] sm:$0xff] }
  0xf7   :  { %1468 = vmatpush.msrb.mxu2 %v1284_v3  ;;  %1409 = vmatpush.msrb.mxu1 %v1262_v35  ;;  %v1389_v35 = vld [vmem:[#allocation4 + $0x3f8] sm:$0xff] }
  0xf8   :  { %v2770_v37 = vpop.f32.mrf.mxu2  ;;  %1849 = vmatpush.msra.mxu0 %v1389_v35 }
  0xf9   :  { %v2772_v38 = vpop.f32.mrf.mxu3 }
  0xfa   :  { %v2774_v40 = vpop.f32.mrf.mxu1 }
  0xfb   :  { %v2776_v42 = vpop.f32.mrf.mxu0 }
  0xfd   :  { %649 = vmatmul.f32.gmra.mxu1 %v2573_v8  ;;  %714 = vmatmul.f32.gmra.mxu2 %v2573_v8 }
  0xfe   :  { %779 = vmatmul.f32.gmra.mxu3 %v2573_v8  ;;  %844 = vmatmul.f32.gmra.mxu0 %v2573_v8  ;;  %v1283_v8 = vld [vmem:[#allocation4 + $0xa8] sm:$0xff] }
  0xff   :  { %1469 = vmatpush.msrb.mxu2 %v1283_v8 }
 0x100   :  { %v2782_v47 = vpop.f32.mrf.mxu2 }
 0x101   :  { %v2784_v48 = vpop.f32.mrf.mxu3 }
 0x102   :  { %v2786_v50 = vpop.f32.mrf.mxu1 }
 0x103   :  { %v2788_v52 = vpop.f32.mrf.mxu0 }
 0x105   :  { %652 = vmatmul.f32.gmra.mxu1 %v2582_v13  ;;  %717 = vmatmul.f32.gmra.mxu2 %v2582_v13 }
 0x106   :  { %782 = vmatmul.f32.gmra.mxu3 %v2582_v13  ;;  %847 = vmatmul.f32.gmra.mxu0 %v2582_v13  ;;  %v1282_v13 = vld [vmem:[#allocation4 + $0xa0] sm:$0xff] }
 0x107   :  { %1470 = vmatpush.msrb.mxu2 %v1282_v13 }
 0x108   :  { %v2794_v56 = vpop.f32.mrf.mxu2 }
 0x109   :  { %v2796_v46 = vpop.f32.mrf.mxu3 }
 0x10a   :  { %v2798_v59 = vpop.f32.mrf.mxu1 }
 0x10b   :  { %v2800_v2 = vpop.f32.mrf.mxu0 }
 0x10d   :  { %655 = vmatmul.f32.gmra.mxu1 %v2591_v18  ;;  %720 = vmatmul.f32.gmra.mxu2 %v2591_v18 }
 0x10e   :  { %785 = vmatmul.f32.gmra.mxu3 %v2591_v18  ;;  %850 = vmatmul.f32.gmra.mxu0 %v2591_v18  ;;  %v1281_v18 = vld [vmem:[#allocation4 + $0x98] sm:$0xff] }
 0x10f   :  { %1471 = vmatpush.msrb.mxu2 %v1281_v18  ;;  %v1294_v18 = vld [vmem:[#allocation4 + $0x100] sm:$0xff] }
 0x110   :  { %v2806_v6 = vpop.f32.mrf.mxu2  ;;  %1539 = vmatpush.msrb.mxu3 %v1294_v18  ;;  %v1341_v18 = vld [vmem:[#allocation4 + $0x278] sm:$0xff] }
 0x111   :  { %v2808_v11 = vpop.f32.mrf.mxu3  ;;  %1654 = vmatpush.msra.mxu1 %v1341_v18  ;;  %v1355_v18 = vld [vmem:[#allocation4 + $0x2e8] sm:$0xff] }
 0x112   :  { %v2810_v45 = vpop.f32.mrf.mxu1 }
 0x113   :  { %v2812_v15 = vpop.f32.mrf.mxu0 }
 0x115   :  { %658 = vmatmul.f32.gmra.mxu1 %v2600_v23  ;;  %723 = vmatmul.f32.gmra.mxu2 %v2600_v23 }
 0x116   :  { %788 = vmatmul.f32.gmra.mxu3 %v2600_v23  ;;  %853 = vmatmul.f32.gmra.mxu0 %v2600_v23  ;;  %v1280_v23 = vld [vmem:[#allocation4 + $0x90] sm:$0xff] }
 0x117   :  { %1472 = vmatpush.msrb.mxu2 %v1280_v23 }
 0x118   :  { %v2818_v24 = vpop.f32.mrf.mxu2 }
 0x119   :  { %v2820_v25 = vpop.f32.mrf.mxu3 }
 0x11a   :  { %v2822_v30 = vpop.f32.mrf.mxu1 }
 0x11b   :  { %v2824_v33 = vpop.f32.mrf.mxu0 }
 0x11d   :  { %661 = vmatmul.f32.gmra.mxu1 %v2609_v28  ;;  %726 = vmatmul.f32.gmra.mxu2 %v2609_v28 }
 0x11e   :  { %791 = vmatmul.f32.gmra.mxu3 %v2609_v28  ;;  %856 = vmatmul.f32.gmra.mxu0 %v2609_v28  ;;  %v1279_v28 = vld [vmem:[#allocation4 + $0x88] sm:$0xff] }
 0x11f   :  { %1473 = vmatpush.msrb.mxu2 %v1279_v28  ;;  %v1373_v28 = vld [vmem:[#allocation4 + $0x378] sm:$0xff] }
 0x120   :  { %v2830_v3 = vpop.f32.mrf.mxu2  ;;  %1784 = vmatpush.msra.mxu3 %v1373_v28 }
 0x121   :  { %v2832_v43 = vpop.f32.mrf.mxu3 }
 0x122   :  { %v2834_v44 = vpop.f32.mrf.mxu1  ;;  %1785 = vmatpush.msra.mxu3 %v1372_v21  ;;  %v1388_v21 = vld [vmem:[#allocation4 + $0x3f0] sm:$0xff] }
 0x123   :  { %v2836_v8 = vpop.f32.mrf.mxu0  ;;  %1850 = vmatpush.msra.mxu0 %v1388_v21 }
 0x125   :  { %664 = vmatmul.f32.gmra.mxu1 %v2618_v34  ;;  %729 = vmatmul.f32.gmra.mxu2 %v2618_v34 }
 0x126   :  { %794 = vmatmul.f32.gmra.mxu3 %v2618_v34  ;;  %859 = vmatmul.f32.gmra.mxu0 %v2618_v34  ;;  %v1278_v34 = vld [vmem:[#allocation4 + $0x80] sm:$0xff] }
 0x127   :  { %1474 = vmatpush.msrb.mxu2 %v1278_v34 }
 0x128   :  { %v2842_v60 = vpop.f32.mrf.mxu2 }
 0x129   :  { %v2844_v13 = vpop.f32.mrf.mxu3 }
 0x12a   :  { %v2846_v32 = vpop.f32.mrf.mxu1 }
 0x12b   :  { %v2848_v14 = vpop.f32.mrf.mxu0 }
 0x12c   :  { %3529 = vst [vmem:[#allocation8_spill] sm:$0xff] %v2848_v14 }
 0x12d   :  { %667 = vmatmul.f32.gmra.mxu1 %v2627_v39  ;;  %732 = vmatmul.f32.gmra.mxu2 %v2627_v39 }
 0x12e   :  { %797 = vmatmul.f32.gmra.mxu3 %v2627_v39  ;;  %862 = vmatmul.f32.gmra.mxu0 %v2627_v39  ;;  %v1357_v39 = vld [vmem:[#allocation4 + $0x2f8] sm:$0xff] }
 0x12f   :  { %1719 = vmatpush.msra.mxu2 %v1357_v39 }
 0x130   :  { %v2854_v57 = vpop.f32.mrf.mxu2 }
 0x131   :  { %3530 = vst [vmem:[#allocation9_spill] sm:$0xff] %v2854_v57  ;;  %v2856_v62 = vpop.f32.mrf.mxu3 }
 0x132   :  { %3531 = vst [vmem:[#allocation10_spill] sm:$0xff] %v2856_v62  ;;  %v2858_v23 = vpop.f32.mrf.mxu1 }
 0x133   :  { %3532 = vst [vmem:[#allocation11_spill] sm:$0xff] %v2858_v23  ;;  %v2860_v41 = vpop.f32.mrf.mxu0 }
 0x134   :  { %3533 = vst [vmem:[#allocation12_spill] sm:$0xff] %v2860_v41 }
 0x135   :  { %670 = vmatmul.f32.gmra.mxu1 %v2641_v49  ;;  %735 = vmatmul.f32.gmra.mxu2 %v2641_v49 }
 0x136   :  { %800 = vmatmul.f32.gmra.mxu3 %v2641_v49  ;;  %865 = vmatmul.f32.gmra.mxu0 %v2641_v49  ;;  %v1356_v49 = vld [vmem:[#allocation4 + $0x2f0] sm:$0xff] }
 0x137   :  { %1720 = vmatpush.msra.mxu2 %v1356_v49  ;;  %v1371_v49 = vld [vmem:[#allocation4 + $0x368] sm:$0xff] }
 0x138   :  { %v2866_v53 = vpop.f32.mrf.mxu2  ;;  %1786 = vmatpush.msra.mxu3 %v1371_v49 }
 0x139   :  { %3534 = vst [vmem:[#allocation13_spill] sm:$0xff] %v2866_v53  ;;  %v2868_v54 = vpop.f32.mrf.mxu3  ;;  %1721 = vmatpush.msra.mxu2 %v1355_v18  ;;  %v1339_v18 = vld [vmem:[#allocation4 + $0x268] sm:$0xff] }
 0x13a   :  { %3535 = vst [vmem:[#allocation14_spill] sm:$0xff] %v2868_v54  ;;  %v2870_v5 = vpop.f32.mrf.mxu1 }
 0x13b   :  { %3536 = vst [vmem:[#allocation15_spill] sm:$0xff] %v2870_v5  ;;  %v2872_v34 = vpop.f32.mrf.mxu0 }
 0x13c   :  { %3537 = vst [vmem:[#allocation16_spill] sm:$0xff] %v2872_v34  ;;  %v1340_v34 = vld [vmem:[#allocation4 + $0x270] sm:$0xff] }
 0x13d   :  { %673 = vmatmul.f32.gmra.mxu1 %v2660_v0  ;;  %738 = vmatmul.f32.gmra.mxu2 %v2660_v0 }
 0x13e   :  { %803 = vmatmul.f32.gmra.mxu3 %v2660_v0  ;;  %868 = vmatmul.f32.gmra.mxu0 %v2660_v0  ;;  %v2889_v0 = vld [vmem:[%s3522_s5] sm:$0xff] }
 0x13f   :  { %1655 = vmatpush.msra.mxu1 %v1340_v34  ;;  %3542 = vst [vmem:[#allocation21_spill] sm:$0xff] %v2889_v0  ;;  %v2896_v34 = vperm.slane %v2889_v0, 0  ;;  %v2899_v35 = vperm.slane %v2889_v0, 1 }
 0x140   :  { %v2878_v51 = vpop.f32.mrf.mxu2 }
 0x141   :  { %3538 = vst [vmem:[#allocation17_spill] sm:$0xff] %v2878_v51  ;;  %v2880_v39 = vpop.f32.mrf.mxu3  ;;  %1656 = vmatpush.msra.mxu1 %v1339_v18  ;;  %v376_v54 = vadd.f32 %v2708_v55, %v2896_v34  ;;  %v441_v21 = vadd.f32 %v2722_v61, %v2899_v35  ;;  %v1354_v18 = vld [vmem:[#allocation4 + $0x2e0] sm:$0xff]  ;;  %v1387_v55 = vld [vmem:[#allocation4 + $0x3e8] sm:$0xff] }
 0x142   :  { %3539 = vst [vmem:[#allocation18_spill] sm:$0xff] %v2880_v39  ;;  %v2882_v28 = vpop.f32.mrf.mxu1  ;;  %v2907_v39 = vperm.slane %v2889_v0, 2  ;;  %1722 = vmatpush.msra.mxu2 %v1354_v18  ;;  %1851 = vmatpush.msra.mxu0 %v1387_v55  ;;  %v379_v18 = vadd.f32 %v2726_v1, %v2896_v34  ;;  %v1353_v1 = vld [vmem:[#allocation4 + $0x2d8] sm:$0xff] }
 0x143   :  { %3540 = vst [vmem:[#allocation19_spill] sm:$0xff] %v2882_v28  ;;  %v2884_v5 = vpop.f32.mrf.mxu0  ;;  %v2904_v28 = vperm.slane %v2889_v0, 3  ;;  %v1006_v61 = vmul.f32 0.01, %v376_v54  ;;  %vm878_vm0 = vcmp.gt.f32.partialorder %v376_v54, 0.0  ;;  %vm879_vm1 = vcmp.gt.f32.partialorder %v441_v21, 0.0 }
 0x144   :  { %3541 = vst [vmem:[#allocation20_spill] sm:$0xff] %v2884_v5  ;;  %v506_v0 = vadd.f32 %v2724_v63, %v2907_v39  ;;  %v1014_v14 = vmul.f32 0.01, %v379_v18  ;;  %1723 = vmatpush.msra.mxu2 %v1353_v1  ;;  %vm886_vm4 = vcmp.gt.f32.partialorder %v379_v18, 0.0  ;;  %v1385_v1 = vld [vmem:[#allocation4 + $0x3d8] sm:$0xff] }
 0x145   :  { %676 = vmatmul.f32.gmra.mxu1 %v2679_v19  ;;  %741 = vmatmul.f32.gmra.mxu2 %v2679_v19  ;;  %v574_v55 = vadd.f32 %v2728_v4, %v2904_v28  ;;  %v1134_v23 = vsel %vm878_vm0, %v376_v54, %v1006_v61 }
 0x146   :  { %806 = vmatmul.f32.gmra.mxu3 %v2679_v19  ;;  %871 = vmatmul.f32.gmra.mxu0 %v2679_v19  ;;  %v1008_v63 = vmul.f32 0.01, %v506_v0  ;;  %vm880_vm3 = vcmp.gt.f32.partialorder %v506_v0, 0.0 }
 0x147   :  { %v1017_v54 = vmul.f32 0.01, %v574_v55  ;;  %vm889_vm6 = vcmp.gt.f32.partialorder %v574_v55, 0.0 }
 0x148   :  { %v2901_v5 = vpop.f32.mrf.mxu2 }
 0x149   :  { %3543 = vst [vmem:[#allocation22_spill] sm:$0xff] %v2901_v5  ;;  %v2909_v19 = vpop.f32.mrf.mxu3  ;;  %v571_v5 = vadd.f32 %v2710_v58, %v2904_v28  ;;  %v1145_v61 = vsel %vm889_vm6, %v574_v55, %v1017_v54 }
 0x14a   :  { %3544 = vst [vmem:[#allocation23_spill] sm:$0xff] %v2909_v19  ;;  %v2911_v51 = vpop.f32.mrf.mxu1 }
 0x14b   :  { %3545 = vst [vmem:[#allocation24_spill] sm:$0xff] %v2911_v51  ;;  %v2913_v49 = vpop.f32.mrf.mxu0  ;;  %v1007_v51 = vmul.f32 0.01, %v441_v21  ;;  %v1009_v58 = vmul.f32 0.01, %v571_v5  ;;  %vm881_vm2 = vcmp.gt.f32.partialorder %v571_v5, 0.0 }
 0x14c   :  { %3546 = vst [vmem:[#allocation25_spill] sm:$0xff] %v2913_v49  ;;  %v1370_v49 = vld [vmem:[#allocation4 + $0x360] sm:$0xff] }
 0x14d   :  { %679 = vmatmul.f32.gmra.mxu1 %v2692_v36  ;;  %744 = vmatmul.f32.gmra.mxu2 %v2692_v36  ;;  %v1135_v62 = vsel %vm879_vm1, %v441_v21, %v1007_v51  ;;  %v1137_v57 = vsel %vm881_vm2, %v571_v5, %v1009_v58  ;;  %v382_v5 = vadd.f32 %v2738_v10, %v2896_v34 }
 0x14e   :  { %809 = vmatmul.f32.gmra.mxu3 %v2692_v36  ;;  %874 = vmatmul.f32.gmra.mxu0 %v2692_v36  ;;  %v1338_v36 = vld [vmem:[#allocation4 + $0x260] sm:$0xff]  ;;  %v577_v58 = vadd.f32 %v2740_v12, %v2904_v28 }
 0x14f   :  { %1787 = vmatpush.msra.mxu3 %v1370_v49  ;;  %1657 = vmatpush.msra.mxu1 %v1338_v36  ;;  %v1386_v36 = vld [vmem:[#allocation4 + $0x3e0] sm:$0xff]  ;;  %vm894_vm8 = vcmp.gt.f32.partialorder %v382_v5, 0.0 }
 0x150   :  { %v2927_v19 = vpop.f32.mrf.mxu2  ;;  %1852 = vmatpush.msra.mxu0 %v1386_v36  ;;  %vm897_vm11 = vcmp.gt.f32.partialorder %v577_v58, 0.0 }
 0x151   :  { %3547 = vst [vmem:[#allocation26_spill] sm:$0xff] %v2927_v19  ;;  %v2929_v41 = vpop.f32.mrf.mxu3  ;;  %v444_v19 = vadd.f32 %v2734_v7, %v2899_v35 }
 0x152   :  { %3548 = vst [vmem:[#allocation27_spill] sm:$0xff] %v2929_v41  ;;  %v2931_v53 = vpop.f32.mrf.mxu1  ;;  %v509_v41 = vadd.f32 %v2736_v9, %v2907_v39  ;;  %1853 = vmatpush.msra.mxu0 %v1385_v1  ;;  %v1384_v1 = vld [vmem:[#allocation4 + $0x3d0] sm:$0xff] }
 0x153   :  { %3549 = vst [vmem:[#allocation28_spill] sm:$0xff] %v2931_v53  ;;  %v2935_v49 = vpop.f32.mrf.mxu0  ;;  %v1136_v53 = vsel %vm880_vm3, %v506_v0, %v1008_v63  ;;  %v1015_v7 = vmul.f32 0.01, %v444_v19  ;;  %vm887_vm5 = vcmp.gt.f32.partialorder %v444_v19, 0.0  ;;  %v447_v0 = vadd.f32 %v2746_v16, %v2899_v35 }
 0x154   :  { %3550 = vst [vmem:[#allocation29_spill] sm:$0xff] %v2935_v49  ;;  %v1369_v49 = vld [vmem:[#allocation4 + $0x358] sm:$0xff]  ;;  %v1016_v9 = vmul.f32 0.01, %v509_v41  ;;  %vm888_vm7 = vcmp.gt.f32.partialorder %v509_v41, 0.0  ;;  %v512_v63 = vadd.f32 %v2748_v17, %v2907_v39  ;;  %1854 = vmatpush.msra.mxu0 %v1384_v1  ;;  %v1383_v1 = vld [vmem:[#allocation4 + $0x3c8] sm:$0xff] }
 0x155   :  { %1410 = vmatmul.f32.vlgmr.msrb.gmra.mxu1 %v1134_v23  ;;  %1475 = vmatmul.f32.vlgmr.msrb.gmra.mxu2 %v1135_v62  ;;  %v1143_v21 = vsel %vm887_vm5, %v444_v19, %v1015_v7  ;;  %v1022_v16 = vmul.f32 0.01, %v382_v5  ;;  %v1023_v19 = vmul.f32 0.01, %v447_v0  ;;  %vm895_vm9 = vcmp.gt.f32.partialorder %v447_v0, 0.0 }
 0x156   :  { %1540 = vmatmul.f32.vlgmr.msrb.gmra.mxu3 %v1136_v53  ;;  %1605 = vmatmul.f32.vlgmr.msrb.gmra.mxu0 %v1137_v57  ;;  %v1337_v57 = vld [vmem:[#allocation4 + $0x258] sm:$0xff]  ;;  %v1142_v53 = vsel %vm886_vm4, %v379_v18, %v1014_v14  ;;  %v1352_v14 = vld [vmem:[#allocation4 + $0x2d0] sm:$0xff]  ;;  %v1024_v12 = vmul.f32 0.01, %v512_v63  ;;  %v1025_v17 = vmul.f32 0.01, %v577_v58  ;;  %v385_v7 = vadd.f32 %v2750_v20, %v2896_v34 }
 0x157   :  { %1788 = vmatpush.msra.mxu3 %v1369_v49  ;;  %1658 = vmatpush.msra.mxu1 %v1337_v57  ;;  %v1144_v49 = vsel %vm888_vm7, %v509_v41, %v1016_v9  ;;  %v1368_v18 = vld [vmem:[#allocation4 + $0x350] sm:$0xff]  ;;  %vm896_vm10 = vcmp.gt.f32.partialorder %v512_v63, 0.0  ;;  %v580_v9 = vadd.f32 %v2752_v22, %v2904_v28  ;;  %v450_v57 = vadd.f32 %v2758_v26, %v2899_v35  ;;  %v1351_v20 = vld [vmem:[#allocation4 + $0x2c8] sm:$0xff] }
 0x158   :  { %v2943_v4 = vpop.f32.mrf.mxu2  ;;  %1724 = vmatpush.msra.mxu2 %v1352_v14  ;;  %v1336_v41 = vld [vmem:[#allocation4 + $0x250] sm:$0xff]  ;;  %v1153_v14 = vsel %vm897_vm11, %v577_v58, %v1025_v17  ;;  %vm902_vm12 = vcmp.gt.f32.partialorder %v385_v7, 0.0  ;;  %v453_v17 = vadd.f32 %v2770_v37, %v2899_v35  ;;  %1855 = vmatpush.msra.mxu0 %v1383_v1  ;;  %v1382_v1 = vld [vmem:[#allocation4 + $0x3c0] sm:$0xff] }
 0x159   :  { %v2945_v51 = vpop.f32.mrf.mxu3  ;;  %1789 = vmatpush.msra.mxu3 %v1368_v18  ;;  %1659 = vmatpush.msra.mxu1 %v1336_v41  ;;  %v1367_v18 = vld [vmem:[#allocation4 + $0x348] sm:$0xff]  ;;  %v1030_v41 = vmul.f32 0.01, %v385_v7  ;;  %v1031_v26 = vmul.f32 0.01, %v450_v57  ;;  %vm903_vm13 = vcmp.gt.f32.partialorder %v450_v57, 0.0 }
 0x15a   :  { %v2947_v62 = vpop.f32.mrf.mxu1  ;;  %1725 = vmatpush.msra.mxu2 %v1351_v20  ;;  %vm905_vm14 = vcmp.gt.f32.partialorder %v580_v9, 0.0  ;;  %vm911_vm1 = vcmp.gt.f32.partialorder %v453_v17, 0.0  ;;  %1856 = vmatpush.msra.mxu0 %v1382_v1  ;;  %v1381_v1 = vld [vmem:[#allocation4 + $0x3b8] sm:$0xff] }
 0x15b   :  { %v2949_v23 = vpop.f32.mrf.mxu0  ;;  %1790 = vmatpush.msra.mxu3 %v1367_v18  ;;  %v1366_v18 = vld [vmem:[#allocation4 + $0x340] sm:$0xff] }
 0x15c   :  { %1857 = vmatpush.msra.mxu0 %v1381_v1  ;;  %v1380_v1 = vld [vmem:[#allocation4 + $0x3b0] sm:$0xff] }
 0x15d   :  { %1413 = vmatmul.f32.gmra.mxu1 %v1142_v53  ;;  %1478 = vmatmul.f32.gmra.mxu2 %v1143_v21  ;;  %v1150_v53 = vsel %vm894_vm8, %v382_v5, %v1022_v16  ;;  %v1151_v21 = vsel %vm895_vm9, %v447_v0, %v1023_v19  ;;  %v1033_v5 = vmul.f32 0.01, %v580_v9  ;;  %v1158_v19 = vsel %vm902_vm12, %v385_v7, %v1030_v41  ;;  %v1350_v7 = vld [vmem:[#allocation4 + $0x2c0] sm:$0xff] }
 0x15e   :  { %1543 = vmatmul.f32.gmra.mxu3 %v1144_v49  ;;  %1608 = vmatmul.f32.gmra.mxu0 %v1145_v61  ;;  %v515_v61 = vadd.f32 %v2760_v27, %v2907_v39  ;;  %v1152_v49 = vsel %vm896_vm10, %v512_v63, %v1024_v12  ;;  %v1335_v63 = vld [vmem:[#allocation4 + $0x248] sm:$0xff]  ;;  %v388_v12 = vadd.f32 %v2762_v29, %v2896_v34 }
 0x15f   :  { %1660 = vmatpush.msra.mxu1 %v1335_v63  ;;  %1726 = vmatpush.msra.mxu2 %v1350_v7  ;;  %v456_v63 = vadd.f32 %v2782_v47, %v2899_v35 }
 0x160   :  { %v2959_v10 = vpop.f32.mrf.mxu2  ;;  %v1032_v27 = vmul.f32 0.01, %v515_v61  ;;  %vm904_vm15 = vcmp.gt.f32.partialorder %v515_v61, 0.0  ;;  %1791 = vmatpush.msra.mxu3 %v1366_v18  ;;  %v1038_v37 = vmul.f32 0.01, %v388_v12  ;;  %vm910_vm0 = vcmp.gt.f32.partialorder %v388_v12, 0.0  ;;  %1858 = vmatpush.msra.mxu0 %v1380_v1 }
 0x161   :  { %v2961_v55 = vpop.f32.mrf.mxu3  ;;  %v1365_v18 = vld [vmem:[#allocation4 + $0x338] sm:$0xff]  ;;  %v1047_v47 = vmul.f32 0.01, %v456_v63  ;;  %vm919_vm5 = vcmp.gt.f32.partialorder %v456_v63, 0.0  ;;  %v1379_v1 = vld [vmem:[#allocation4 + $0x3a8] sm:$0xff] }
 0x162   :  { %v2963_v36 = vpop.f32.mrf.mxu1  ;;  %v1160_v20 = vsel %vm904_vm15, %v515_v61, %v1032_v27  ;;  %v1334_v61 = vld [vmem:[#allocation4 + $0x240] sm:$0xff]  ;;  %v586_v27 = vadd.f32 %v2776_v42, %v2904_v28  ;;  %1792 = vmatpush.msra.mxu3 %v1365_v18  ;;  %v1364_v18 = vld [vmem:[#allocation4 + $0x330] sm:$0xff]  ;;  %1859 = vmatpush.msra.mxu0 %v1379_v1 }
 0x163   :  { %v2967_v54 = vpop.f32.mrf.mxu0  ;;  %1661 = vmatpush.msra.mxu1 %v1334_v61  ;;  %v1378_v1 = vld [vmem:[#allocation4 + $0x3a0] sm:$0xff] }
 0x164   :  { %vm921_vm6 = vcmp.gt.f32.partialorder %v586_v27, 0.0  ;;  %1793 = vmatpush.msra.mxu3 %v1364_v18  ;;  %v1363_v18 = vld [vmem:[#allocation4 + $0x328] sm:$0xff]  ;;  %1860 = vmatpush.msra.mxu0 %v1378_v1  ;;  %v1377_v1 = vld [vmem:[#allocation4 + $0x398] sm:$0xff] }
 0x165   :  { %1416 = vmatmul.f32.gmra.mxu1 %v1150_v53  ;;  %1481 = vmatmul.f32.gmra.mxu2 %v1151_v21  ;;  %v1159_v53 = vsel %vm903_vm13, %v450_v57, %v1031_v26  ;;  %v1161_v21 = vsel %vm905_vm14, %v580_v9, %v1033_v5  ;;  %v1039_v9 = vmul.f32 0.01, %v453_v17  ;;  %v391_v26 = vadd.f32 %v2774_v40, %v2896_v34  ;;  %v1349_v40 = vld [vmem:[#allocation4 + $0x2b8] sm:$0xff] }
 0x166   :  { %1546 = vmatmul.f32.gmra.mxu3 %v1152_v49  ;;  %1611 = vmatmul.f32.gmra.mxu0 %v1153_v14  ;;  %v583_v49 = vadd.f32 %v2764_v31, %v2904_v28  ;;  %v518_v14 = vadd.f32 %v2772_v38, %v2907_v39 }
 0x167   :  { %v1046_v61 = vmul.f32 0.01, %v391_v26  ;;  %1727 = vmatpush.msra.mxu2 %v1349_v40  ;;  %vm918_vm4 = vcmp.gt.f32.partialorder %v391_v26, 0.0  ;;  %1794 = vmatpush.msra.mxu3 %v1363_v18  ;;  %v1362_v18 = vld [vmem:[#allocation4 + $0x320] sm:$0xff] }
 0x168   :  { %v2975_v22 = vpop.f32.mrf.mxu2  ;;  %v1040_v31 = vmul.f32 0.01, %v518_v14  ;;  %v1041_v38 = vmul.f32 0.01, %v583_v49  ;;  %vm912_vm2 = vcmp.gt.f32.partialorder %v518_v14, 0.0  ;;  %vm913_vm3 = vcmp.gt.f32.partialorder %v583_v49, 0.0  ;;  %1861 = vmatpush.msra.mxu0 %v1377_v1 }
 0x169   :  { %v2977_v0 = vpop.f32.mrf.mxu3  ;;  %1795 = vmatpush.msra.mxu3 %v1362_v18  ;;  %v1361_v18 = vld [vmem:[#allocation4 + $0x318] sm:$0xff] }
 0x16a   :  { %v2979_v58 = vpop.f32.mrf.mxu1  ;;  %v1169_v7 = vsel %vm913_vm3, %v583_v49, %v1041_v38  ;;  %v459_v38 = vadd.f32 %v2794_v56, %v2899_v35 }
 0x16b   :  { %v2981_v16 = vpop.f32.mrf.mxu0  ;;  %1796 = vmatpush.msra.mxu3 %v1361_v18  ;;  %v1360_v18 = vld [vmem:[#allocation4 + $0x310] sm:$0xff] }
 0x16c   :  { %vm927_vm9 = vcmp.gt.f32.partialorder %v459_v38, 0.0 }
 0x16d   :  { %1419 = vmatmul.f32.gmra.mxu1 %v1158_v19  ;;  %1484 = vmatmul.f32.gmra.mxu2 %v1159_v53  ;;  %v1166_v19 = vsel %vm910_vm0, %v388_v12, %v1038_v37  ;;  %v1167_v53 = vsel %vm911_vm1, %v453_v17, %v1039_v9  ;;  %v1049_v12 = vmul.f32 0.01, %v586_v27  ;;  %v1174_v9 = vsel %vm918_vm4, %v391_v26, %v1046_v61  ;;  %v1348_v26 = vld [vmem:[#allocation4 + $0x2b0] sm:$0xff] }
 0x16e   :  { %1549 = vmatmul.f32.gmra.mxu3 %v1160_v20  ;;  %1614 = vmatmul.f32.gmra.mxu0 %v1161_v21  ;;  %v521_v21 = vadd.f32 %v2784_v48, %v2907_v39  ;;  %v1168_v20 = vsel %vm912_vm2, %v518_v14, %v1040_v31  ;;  %v1333_v14 = vld [vmem:[#allocation4 + $0x238] sm:$0xff]  ;;  %v394_v31 = vadd.f32 %v2786_v50, %v2896_v34 }
 0x16f   :  { %1662 = vmatpush.msra.mxu1 %v1333_v14  ;;  %1728 = vmatpush.msra.mxu2 %v1348_v26  ;;  %v462_v14 = vadd.f32 %v2806_v6, %v2899_v35 }
 0x170   :  { %v2991_v29 = vpop.f32.mrf.mxu2  ;;  %v1048_v48 = vmul.f32 0.01, %v521_v21  ;;  %vm920_vm7 = vcmp.gt.f32.partialorder %v521_v21, 0.0  ;;  %v1054_v56 = vmul.f32 0.01, %v394_v31  ;;  %vm926_vm8 = vcmp.gt.f32.partialorder %v394_v31, 0.0  ;;  %1797 = vmatpush.msra.mxu3 %v1360_v18 }
 0x171   :  { %v2993_v57 = vpop.f32.mrf.mxu3  ;;  %v1063_v6 = vmul.f32 0.01, %v462_v14  ;;  %vm935_vm13 = vcmp.gt.f32.partialorder %v462_v14, 0.0 }
 0x172   :  { %v2995_v41 = vpop.f32.mrf.mxu1  ;;  %v1176_v40 = vsel %vm920_vm7, %v521_v21, %v1048_v48  ;;  %v1332_v21 = vld [vmem:[#allocation4 + $0x230] sm:$0xff]  ;;  %v592_v48 = vadd.f32 %v2800_v2, %v2904_v28 }
 0x173   :  { %v2999_v5 = vpop.f32.mrf.mxu0  ;;  %1663 = vmatpush.msra.mxu1 %v1332_v21 }
 0x174   :  { %vm937_vm14 = vcmp.gt.f32.partialorder %v592_v48, 0.0 }
 0x175   :  { %1422 = vmatmul.f32.gmra.mxu1 %v1166_v19  ;;  %1487 = vmatmul.f32.gmra.mxu2 %v1167_v53  ;;  %v1175_v19 = vsel %vm919_vm5, %v456_v63, %v1047_v47  ;;  %v1177_v53 = vsel %vm921_vm6, %v586_v27, %v1049_v12  ;;  %v1055_v27 = vmul.f32 0.01, %v459_v38  ;;  %v397_v47 = vadd.f32 %v2798_v59, %v2896_v34  ;;  %v1347_v59 = vld [vmem:[#allocation4 + $0x2a8] sm:$0xff] }
 0x176   :  { %1552 = vmatmul.f32.gmra.mxu3 %v1168_v20  ;;  %1617 = vmatmul.f32.gmra.mxu0 %v1169_v7  ;;  %v589_v20 = vadd.f32 %v2788_v52, %v2904_v28  ;;  %v524_v7 = vadd.f32 %v2796_v46, %v2907_v39 }
 0x177   :  { %v1062_v21 = vmul.f32 0.01, %v397_v47  ;;  %1729 = vmatpush.msra.mxu2 %v1347_v59  ;;  %vm934_vm12 = vcmp.gt.f32.partialorder %v397_v47, 0.0 }
 0x178   :  { %v3007_v42 = vpop.f32.mrf.mxu2  ;;  %v1056_v52 = vmul.f32 0.01, %v524_v7  ;;  %v1057_v46 = vmul.f32 0.01, %v589_v20  ;;  %vm928_vm10 = vcmp.gt.f32.partialorder %v524_v7, 0.0  ;;  %vm929_vm11 = vcmp.gt.f32.partialorder %v589_v20, 0.0 }
 0x179   :  { %v3009_v17 = vpop.f32.mrf.mxu3 }
 0x17a   :  { %v3011_v49 = vpop.f32.mrf.mxu1  ;;  %v1185_v26 = vsel %vm929_vm11, %v589_v20, %v1057_v46  ;;  %v465_v46 = vadd.f32 %v2818_v24, %v2899_v35 }
 0x17b   :  { %v3013_v37 = vpop.f32.mrf.mxu0 }
 0x17c   :  { %vm943_vm1 = vcmp.gt.f32.partialorder %v465_v46, 0.0 }
 0x17d   :  { %1425 = vmatmul.f32.gmra.mxu1 %v1174_v9  ;;  %1490 = vmatmul.f32.gmra.mxu2 %v1175_v19  ;;  %v1182_v9 = vsel %vm926_vm8, %v394_v31, %v1054_v56  ;;  %v1183_v19 = vsel %vm927_vm9, %v459_v38, %v1055_v27  ;;  %v1065_v31 = vmul.f32 0.01, %v592_v48  ;;  %v1190_v27 = vsel %vm934_vm12, %v397_v47, %v1062_v21  ;;  %v1346_v47 = vld [vmem:[#allocation4 + $0x2a0] sm:$0xff] }
 0x17e   :  { %1555 = vmatmul.f32.gmra.mxu3 %v1176_v40  ;;  %1620 = vmatmul.f32.gmra.mxu0 %v1177_v53  ;;  %v527_v53 = vadd.f32 %v2808_v11, %v2907_v39  ;;  %v1184_v40 = vsel %vm928_vm10, %v524_v7, %v1056_v52  ;;  %v1331_v7 = vld [vmem:[#allocation4 + $0x228] sm:$0xff]  ;;  %v400_v52 = vadd.f32 %v2810_v45, %v2896_v34 }
 0x17f   :  { %1664 = vmatpush.msra.mxu1 %v1331_v7  ;;  %1730 = vmatpush.msra.mxu2 %v1346_v47  ;;  %v468_v7 = vadd.f32 %v2830_v3, %v2899_v35 }
 0x180   :  { %v3023_v50 = vpop.f32.mrf.mxu2  ;;  %v1064_v11 = vmul.f32 0.01, %v527_v53  ;;  %vm936_vm15 = vcmp.gt.f32.partialorder %v527_v53, 0.0  ;;  %v1070_v24 = vmul.f32 0.01, %v400_v52  ;;  %vm942_vm0 = vcmp.gt.f32.partialorder %v400_v52, 0.0 }
 0x181   :  { %v3025_v63 = vpop.f32.mrf.mxu3  ;;  %v1079_v3 = vmul.f32 0.01, %v468_v7  ;;  %vm951_vm5 = vcmp.gt.f32.partialorder %v468_v7, 0.0 }
 0x182   :  { %v3027_v61 = vpop.f32.mrf.mxu1  ;;  %v1192_v59 = vsel %vm936_vm15, %v527_v53, %v1064_v11  ;;  %v1330_v53 = vld [vmem:[#allocation4 + $0x220] sm:$0xff]  ;;  %v598_v11 = vadd.f32 %v2824_v33, %v2904_v28 }
 0x183   :  { %v3031_v12 = vpop.f32.mrf.mxu0  ;;  %1665 = vmatpush.msra.mxu1 %v1330_v53 }
 0x184   :  { %vm953_vm6 = vcmp.gt.f32.partialorder %v598_v11, 0.0 }
 0x185   :  { %1428 = vmatmul.f32.gmra.mxu1 %v1182_v9  ;;  %1493 = vmatmul.f32.gmra.mxu2 %v1183_v19  ;;  %v1191_v9 = vsel %vm935_vm13, %v462_v14, %v1063_v6  ;;  %v1193_v19 = vsel %vm937_vm14, %v592_v48, %v1065_v31  ;;  %v1071_v48 = vmul.f32 0.01, %v465_v46  ;;  %v403_v6 = vadd.f32 %v2822_v30, %v2896_v34  ;;  %v1345_v30 = vld [vmem:[#allocation4 + $0x298] sm:$0xff] }
 0x186   :  { %1558 = vmatmul.f32.gmra.mxu3 %v1184_v40  ;;  %1623 = vmatmul.f32.gmra.mxu0 %v1185_v26  ;;  %v595_v40 = vadd.f32 %v2812_v15, %v2904_v28  ;;  %v530_v26 = vadd.f32 %v2820_v25, %v2907_v39 }
 0x187   :  { %v1078_v53 = vmul.f32 0.01, %v403_v6  ;;  %1731 = vmatpush.msra.mxu2 %v1345_v30  ;;  %vm950_vm4 = vcmp.gt.f32.partialorder %v403_v6, 0.0 }
 0x188   :  { %v3039_v2 = vpop.f32.mrf.mxu2  ;;  %v1072_v15 = vmul.f32 0.01, %v530_v26  ;;  %v1073_v25 = vmul.f32 0.01, %v595_v40  ;;  %vm944_vm2 = vcmp.gt.f32.partialorder %v530_v26, 0.0  ;;  %vm945_vm3 = vcmp.gt.f32.partialorder %v595_v40, 0.0 }
 0x189   :  { %v3041_v38 = vpop.f32.mrf.mxu3 }
 0x18a   :  { %v3043_v20 = vpop.f32.mrf.mxu1  ;;  %v1201_v47 = vsel %vm945_vm3, %v595_v40, %v1073_v25  ;;  %v471_v25 = vadd.f32 %v2842_v60, %v2899_v35 }
 0x18b   :  { %v3045_v56 = vpop.f32.mrf.mxu0 }
 0x18c   :  { %vm959_vm9 = vcmp.gt.f32.partialorder %v471_v25, 0.0 }
 0x18d   :  { %1431 = vmatmul.f32.gmra.mxu1 %v1190_v27  ;;  %1496 = vmatmul.f32.gmra.mxu2 %v1191_v9  ;;  %v1198_v27 = vsel %vm942_vm0, %v400_v52, %v1070_v24  ;;  %v1199_v9 = vsel %vm943_vm1, %v465_v46, %v1071_v48  ;;  %v1081_v52 = vmul.f32 0.01, %v598_v11  ;;  %v1206_v48 = vsel %vm950_vm4, %v403_v6, %v1078_v53  ;;  %v1344_v6 = vld [vmem:[#allocation4 + $0x290] sm:$0xff] }
 0x18e   :  { %1561 = vmatmul.f32.gmra.mxu3 %v1192_v59  ;;  %1626 = vmatmul.f32.gmra.mxu0 %v1193_v19  ;;  %v533_v19 = vadd.f32 %v2832_v43, %v2907_v39  ;;  %v1200_v59 = vsel %vm944_vm2, %v530_v26, %v1072_v15  ;;  %v1329_v26 = vld [vmem:[#allocation4 + $0x218] sm:$0xff]  ;;  %v406_v15 = vadd.f32 %v2834_v44, %v2896_v34 }
 0x18f   :  { %1666 = vmatpush.msra.mxu1 %v1329_v26  ;;  %1732 = vmatpush.msra.mxu2 %v1344_v6  ;;  %v3557_v6 = vld [vmem:[#allocation10_spill] sm:$0xff] }
 0x190   :  { %v3055_v45 = vpop.f32.mrf.mxu2  ;;  %v1080_v43 = vmul.f32 0.01, %v533_v19  ;;  %vm952_vm7 = vcmp.gt.f32.partialorder %v533_v19, 0.0  ;;  %v1086_v60 = vmul.f32 0.01, %v406_v15  ;;  %vm958_vm8 = vcmp.gt.f32.partialorder %v406_v15, 0.0 }
 0x191   :  { %v3057_v14 = vpop.f32.mrf.mxu3  ;;  %v539_v18 = vadd.f32 %v3557_v6, %v2907_v39 }
 0x192   :  { %v3059_v21 = vpop.f32.mrf.mxu1  ;;  %v1208_v30 = vsel %vm952_vm7, %v533_v19, %v1080_v43  ;;  %v1328_v19 = vld [vmem:[#allocation4 + $0x210] sm:$0xff]  ;;  %v3555_v43 = vld [vmem:[#allocation8_spill] sm:$0xff] }
 0x193   :  { %v3063_v31 = vpop.f32.mrf.mxu0  ;;  %1667 = vmatpush.msra.mxu1 %v1328_v19  ;;  %v604_v26 = vadd.f32 %v3555_v43, %v2904_v28  ;;  %v1376_v19 = vld [vmem:[#allocation4 + $0x390] sm:$0xff]  ;;  %vm968_vm15 = vcmp.gt.f32.partialorder %v539_v18, 0.0 }
 0x194   :  { %1862 = vmatpush.msra.mxu0 %v1376_v19  ;;  %v3565_v19 = vld [vmem:[#allocation14_spill] sm:$0xff] }
 0x195   :  { %1434 = vmatmul.f32.gmra.mxu1 %v1198_v27  ;;  %1499 = vmatmul.f32.gmra.mxu2 %v1199_v9  ;;  %v1207_v27 = vsel %vm951_vm5, %v468_v7, %v1079_v3  ;;  %v1209_v9 = vsel %vm953_vm6, %v598_v11, %v1081_v52  ;;  %v1087_v11 = vmul.f32 0.01, %v471_v25  ;;  %v409_v3 = vadd.f32 %v2846_v32, %v2896_v34  ;;  %v1343_v32 = vld [vmem:[#allocation4 + $0x288] sm:$0xff] }
 0x196   :  { %1564 = vmatmul.f32.gmra.mxu3 %v1200_v59  ;;  %1629 = vmatmul.f32.gmra.mxu0 %v1201_v47  ;;  %v601_v59 = vadd.f32 %v2836_v8, %v2904_v28  ;;  %v536_v47 = vadd.f32 %v2844_v13, %v2907_v39  ;;  %vm969_vm14 = vcmp.gt.f32.partialorder %v604_v26, 0.0 }
 0x197   :  { %1733 = vmatpush.msra.mxu2 %v1343_v32  ;;  %vm966_vm12 = vcmp.gt.f32.partialorder %v409_v3, 0.0 }
 0x198   :  { %v3071_v33 = vpop.f32.mrf.mxu2  ;;  %v1088_v8 = vmul.f32 0.01, %v536_v47  ;;  %v1089_v13 = vmul.f32 0.01, %v601_v59  ;;  %vm960_vm10 = vcmp.gt.f32.partialorder %v536_v47, 0.0  ;;  %vm961_vm11 = vcmp.gt.f32.partialorder %v601_v59, 0.0 }
 0x199   :  { %v3073_v46 = vpop.f32.mrf.mxu3 }
 0x19a   :  { %v3075_v40 = vpop.f32.mrf.mxu1  ;;  %v1216_v1 = vsel %vm960_vm10, %v536_v47, %v1088_v8  ;;  %v1327_v47 = vld [vmem:[#allocation4 + $0x208] sm:$0xff] }
 0x19b   :  { %v3077_v24 = vpop.f32.mrf.mxu0  ;;  %1668 = vmatpush.msra.mxu1 %v1327_v47  ;;  %v1375_v47 = vld [vmem:[#allocation4 + $0x388] sm:$0xff] }
 0x19c   :  { %1863 = vmatpush.msra.mxu0 %v1375_v47 }
 0x19d   :  { %1437 = vmatmul.f32.gmra.mxu1 %v1206_v48  ;;  %1502 = vmatmul.f32.gmra.mxu2 %v1207_v27  ;;  %v3556_v48 = vld [vmem:[#allocation9_spill] sm:$0xff] }
 0x19e   :  { %1567 = vmatmul.f32.gmra.mxu3 %v1208_v30  ;;  %1632 = vmatmul.f32.gmra.mxu0 %v1209_v9  ;;  %v474_v27 = vadd.f32 %v3556_v48, %v2899_v35  ;;  %v1214_v9 = vsel %vm958_vm8, %v406_v15, %v1086_v60  ;;  %v1215_v30 = vsel %vm959_vm9, %v471_v25, %v1087_v11  ;;  %v1097_v25 = vmul.f32 0.01, %v604_v26  ;;  %v3563_v48 = vld [vmem:[#allocation13_spill] sm:$0xff] }
 0x19f   :  { %v1096_v11 = vmul.f32 0.01, %v539_v18 }
 0x1a0   :  { %v3087_v44 = vpop.f32.mrf.mxu2  ;;  %v1095_v15 = vmul.f32 0.01, %v474_v27  ;;  %vm967_vm13 = vcmp.gt.f32.partialorder %v474_v27, 0.0  ;;  %v1225_v6 = vsel %vm969_vm14, %v604_v26, %v1097_v25 }
 0x1a1   :  { %3551 = vst [vmem:[#allocation30_spill] sm:$0xff] %v3087_v44  ;;  %v3089_v7 = vpop.f32.mrf.mxu3 }
 0x1a2   :  { %3552 = vst [vmem:[#allocation31_spill] sm:$0xff] %v3089_v7  ;;  %v3091_v53 = vpop.f32.mrf.mxu1  ;;  %v1094_v7 = vmul.f32 0.01, %v409_v3 }
 0x1a3   :  { %3553 = vst [vmem:[#allocation32_spill] sm:$0xff] %v3091_v53  ;;  %v3095_v52 = vpop.f32.mrf.mxu0  ;;  %v1217_v53 = vsel %vm961_vm11, %v601_v59, %v1089_v13 }
 0x1a4   :  { %3554 = vst [vmem:[#allocation33_spill] sm:$0xff] %v3095_v52  ;;  %v1359_v52 = vld [vmem:[#allocation4 + $0x308] sm:$0xff]  ;;  %v1222_v13 = vsel %vm966_vm12, %v409_v3, %v1094_v7  ;;  %v1342_v7 = vld [vmem:[#allocation4 + $0x280] sm:$0xff] }
 0x1a5   :  { %1440 = vmatmul.f32.gmra.mxu1 %v1214_v9  ;;  %1505 = vmatmul.f32.gmra.mxu2 %v1215_v30  ;;  %v477_v9 = vadd.f32 %v3563_v48, %v2899_v35  ;;  %v1223_v30 = vsel %vm967_vm13, %v474_v27, %v1095_v15  ;;  %v1358_v3 = vld [vmem:[#allocation4 + $0x300] sm:$0xff] }
 0x1a6   :  { %1570 = vmatmul.f32.gmra.mxu3 %v1216_v1  ;;  %1635 = vmatmul.f32.gmra.mxu0 %v1217_v53  ;;  %v3562_v53 = vld [vmem:[#allocation11_spill] sm:$0xff]  ;;  %v3564_v1 = vld [vmem:[#allocation12_spill] sm:$0xff] }
 0x1a7   :  { %1798 = vmatpush.msra.mxu3 %v1359_v52  ;;  %v412_v52 = vadd.f32 %v3562_v53, %v2896_v34  ;;  %v607_v32 = vadd.f32 %v3564_v1, %v2904_v28  ;;  %1734 = vmatpush.msra.mxu2 %v1342_v7  ;;  %v1103_v26 = vmul.f32 0.01, %v477_v9  ;;  %vm975_vm1 = vcmp.gt.f32.partialorder %v477_v9, 0.0  ;;  %v3571_v1 = vld [vmem:[#allocation16_spill] sm:$0xff]  ;;  %v3572_v7 = vld [vmem:[#allocation17_spill] sm:$0xff] }
 0x1a8   :  { %v3103_v43 = vpop.f32.mrf.mxu2 }
 0x1a9   :  { %3558 = vst [vmem:[#allocation8_spill] sm:$0xff] %v3103_v43  ;;  %v3105_v60 = vpop.f32.mrf.mxu3  ;;  %1799 = vmatpush.msra.mxu3 %v1358_v3  ;;  %v1102_v27 = vmul.f32 0.01, %v412_v52  ;;  %vm974_vm0 = vcmp.gt.f32.partialorder %v412_v52, 0.0  ;;  %vm977_vm3 = vcmp.gt.f32.partialorder %v607_v32, 0.0  ;;  %v480_v3 = vadd.f32 %v3572_v7, %v2899_v35  ;;  %v3578_v7 = vld [vmem:[#allocation23_spill] sm:$0xff] }
 0x1aa   :  { %3559 = vst [vmem:[#allocation9_spill] sm:$0xff] %v3105_v60  ;;  %v3107_v59 = vpop.f32.mrf.mxu1  ;;  %v1224_v60 = vsel %vm968_vm15, %v539_v18, %v1096_v11  ;;  %v1326_v18 = vld [vmem:[#allocation4 + $0x200] sm:$0xff] }
 0x1ab   :  { %3560 = vst [vmem:[#allocation10_spill] sm:$0xff] %v3107_v59  ;;  %v3109_v8 = vpop.f32.mrf.mxu0  ;;  %v542_v59 = vadd.f32 %v3565_v19, %v2907_v39  ;;  %1669 = vmatpush.msra.mxu1 %v1326_v18  ;;  %v610_v19 = vadd.f32 %v3571_v1, %v2904_v28  ;;  %v1230_v47 = vsel %vm974_vm0, %v412_v52, %v1102_v27  ;;  %v1111_v1 = vmul.f32 0.01, %v480_v3 }
 0x1ac   :  { %3561 = vst [vmem:[#allocation34_spill] sm:$0xff] %v3109_v8  ;;  %vm983_vm5 = vcmp.gt.f32.partialorder %v480_v3, 0.0 }
 0x1ad   :  { %1443 = vmatmul.f32.gmra.mxu1 %v1222_v13  ;;  %1508 = vmatmul.f32.gmra.mxu2 %v1223_v30  ;;  %v1104_v25 = vmul.f32 0.01, %v542_v59  ;;  %v1105_v13 = vmul.f32 0.01, %v607_v32  ;;  %vm976_vm2 = vcmp.gt.f32.partialorder %v542_v59, 0.0  ;;  %vm985_vm6 = vcmp.gt.f32.partialorder %v610_v19, 0.0 }
 0x1ae   :  { %1573 = vmatmul.f32.gmra.mxu3 %v1224_v60  ;;  %1638 = vmatmul.f32.gmra.mxu0 %v1225_v6  ;;  %v3569_v60 = vld [vmem:[#allocation15_spill] sm:$0xff]  ;;  %v1374_v6 = vld [vmem:[#allocation4 + $0x380] sm:$0xff]  ;;  %v1113_v43 = vmul.f32 0.01, %v610_v19 }
 0x1af   :  { %v415_v11 = vadd.f32 %v3569_v60, %v2896_v34  ;;  %1864 = vmatpush.msra.mxu0 %v1374_v6  ;;  %v1232_v8 = vsel %vm976_vm2, %v542_v59, %v1104_v25  ;;  %v1233_v60 = vsel %vm977_vm3, %v607_v32, %v1105_v13  ;;  %v1239_v25 = vsel %vm983_vm5, %v480_v3, %v1111_v1  ;;  %v3582_v1 = vld [vmem:[#allocation24_spill] sm:$0xff] }
 0x1b0   :  { %v3119_v53 = vpop.f32.mrf.mxu2  ;;  %v1241_v13 = vsel %vm985_vm6, %v610_v19, %v1113_v43 }
 0x1b1   :  { %3566 = vst [vmem:[#allocation11_spill] sm:$0xff] %v3119_v53  ;;  %v3121_v15 = vpop.f32.mrf.mxu3  ;;  %v1110_v18 = vmul.f32 0.01, %v415_v11  ;;  %vm982_vm4 = vcmp.gt.f32.partialorder %v415_v11, 0.0 }
 0x1b2   :  { %3567 = vst [vmem:[#allocation13_spill] sm:$0xff] %v3121_v15  ;;  %v3123_v48 = vpop.f32.mrf.mxu1  ;;  %v1231_v15 = vsel %vm975_vm1, %v477_v9, %v1103_v26  ;;  %v3576_v26 = vld [vmem:[#allocation22_spill] sm:$0xff] }
 0x1b3   :  { %3568 = vst [vmem:[#allocation12_spill] sm:$0xff] %v3123_v48  ;;  %v3127_v30 = vpop.f32.mrf.mxu0  ;;  %v3573_v48 = vld [vmem:[#allocation18_spill] sm:$0xff]  ;;  %v1238_v59 = vsel %vm982_vm4, %v415_v11, %v1110_v18 }
 0x1b4   :  { %3570 = vst [vmem:[#allocation14_spill] sm:$0xff] %v3127_v30  ;;  %v545_v53 = vadd.f32 %v3573_v48, %v2907_v39  ;;  %v3577_v48 = vld [vmem:[#allocation20_spill] sm:$0xff] }
 0x1b5   :  { %1446 = vmatmul.f32.gmra.mxu1 %v1230_v47  ;;  %1511 = vmatmul.f32.gmra.mxu2 %v1231_v15  ;;  %v483_v15 = vadd.f32 %v3576_v26, %v2899_v35  ;;  %v613_v6 = vadd.f32 %v3577_v48, %v2904_v28  ;;  %v548_v47 = vadd.f32 %v3578_v7, %v2907_v39 }
 0x1b6   :  { %1576 = vmatmul.f32.gmra.mxu3 %v1232_v8  ;;  %1641 = vmatmul.f32.gmra.mxu0 %v1233_v60  ;;  %v1112_v52 = vmul.f32 0.01, %v545_v53  ;;  %vm984_vm7 = vcmp.gt.f32.partialorder %v545_v53, 0.0  ;;  %v3575_v8 = vld [vmem:[#allocation19_spill] sm:$0xff] }
 0x1b7   :  { %v418_v32 = vadd.f32 %v3575_v8, %v2896_v34  ;;  %v1119_v8 = vmul.f32 0.01, %v483_v15  ;;  %vm991_vm9 = vcmp.gt.f32.partialorder %v483_v15, 0.0  ;;  %v1120_v43 = vmul.f32 0.01, %v548_v47 }
 0x1b8   :  { %v3135_v30 = vpop.f32.mrf.mxu2  ;;  %v1240_v60 = vsel %vm984_vm7, %v545_v53, %v1112_v52  ;;  %v1121_v19 = vmul.f32 0.01, %v613_v6  ;;  %vm992_vm10 = vcmp.gt.f32.partialorder %v548_v47, 0.0  ;;  %vm993_vm11 = vcmp.gt.f32.partialorder %v613_v6, 0.0  ;;  %v3584_v52 = vld [vmem:[#allocation25_spill] sm:$0xff] }
 0x1b9   :  { %v3137_v44 = vpop.f32.mrf.mxu3  ;;  %v1118_v18 = vmul.f32 0.01, %v418_v32  ;;  %vm990_vm8 = vcmp.gt.f32.partialorder %v418_v32, 0.0  ;;  %v616_v26 = vadd.f32 %v3584_v52, %v2904_v28  ;;  %v1247_v7 = vsel %vm991_vm9, %v483_v15, %v1119_v8 }
 0x1ba   :  { %v3139_v9 = vpop.f32.mrf.mxu1 }
 0x1bb   :  { %v3141_v27 = vpop.f32.mrf.mxu0  ;;  %v1246_v48 = vsel %vm990_vm8, %v418_v32, %v1118_v18  ;;  %v1129_v15 = vmul.f32 0.01, %v616_v26  ;;  %vm1001_vm14 = vcmp.gt.f32.partialorder %v616_v26, 0.0 }
 0x1bc   :  { %3574 = vst [vmem:[#allocation15_spill] sm:$0xff] %v3141_v27 }
 0x1bd   :  { %1449 = vmatmul.f32.gmra.mxu1 %v1238_v59  ;;  %1514 = vmatmul.f32.gmra.mxu2 %v1239_v25  ;;  %v421_v59 = vadd.f32 %v3582_v1, %v2896_v34  ;;  %v3585_v25 = vld [vmem:[#allocation26_spill] sm:$0xff]  ;;  %v3587_v34 = vld [vmem:[#allocation21_spill] sm:$0xff] }
 0x1be   :  { %1579 = vmatmul.f32.gmra.mxu3 %v1240_v60  ;;  %1644 = vmatmul.f32.gmra.mxu0 %v1241_v13  ;;  %v486_v13 = vadd.f32 %v3585_v25, %v2899_v35  ;;  %v3586_v60 = vld [vmem:[#allocation27_spill] sm:$0xff]  ;;  %v3168_v1 = vperm.slane %v3587_v34, 4  ;;  %v3174_v35 = vperm.slane %v3587_v34, 5 }
 0x1bf   :  { %v1126_v28 = vmul.f32 0.01, %v421_v59  ;;  %vm998_vm12 = vcmp.gt.f32.partialorder %v421_v59, 0.0 }
 0x1c0   :  { %v3151_v11 = vpop.f32.mrf.mxu2  ;;  %vm999_vm13 = vcmp.gt.f32.partialorder %v486_v13, 0.0  ;;  %v701_v52 = vadd.f32 %v2943_v4, %v3174_v35 }
 0x1c1   :  { %3579 = vst [vmem:[#allocation16_spill] sm:$0xff] %v3151_v11  ;;  %v3153_v27 = vpop.f32.mrf.mxu3  ;;  %v1249_v11 = vsel %vm993_vm11, %v613_v6, %v1121_v19  ;;  %v3592_v19 = vld [vmem:[#allocation28_spill] sm:$0xff] }
 0x1c2   :  { %3580 = vst [vmem:[#allocation17_spill] sm:$0xff] %v3153_v27  ;;  %v3155_v3 = vpop.f32.mrf.mxu1  ;;  %v551_v27 = vadd.f32 %v3586_v60, %v2907_v39  ;;  %v1127_v39 = vmul.f32 0.01, %v486_v13  ;;  %vm883_vm1 = vcmp.gt.f32.partialorder %v701_v52, 0.0 }
 0x1c3   :  { %3581 = vst [vmem:[#allocation18_spill] sm:$0xff] %v3155_v3  ;;  %v3159_v53 = vpop.f32.mrf.mxu0  ;;  %v1248_v3 = vsel %vm992_vm10, %v548_v47, %v1120_v43  ;;  %v3179_v47 = vperm.slane %v3587_v34, 6  ;;  %v1254_v43 = vsel %vm998_vm12, %v421_v59, %v1126_v28  ;;  %v1011_v28 = vmul.f32 0.01, %v701_v52 }
 0x1c4   :  { %3583 = vst [vmem:[#allocation19_spill] sm:$0xff] %v3159_v53  ;;  %v3171_v53 = vperm.slane %v3587_v34, 7  ;;  %vm1000_vm15 = vcmp.gt.f32.partialorder %v551_v27, 0.0  ;;  %v1255_v25 = vsel %vm999_vm13, %v486_v13, %v1127_v39 }
 0x1c5   :  { %1452 = vmatmul.f32.gmra.mxu1 %v1246_v48  ;;  %1517 = vmatmul.f32.gmra.mxu2 %v1247_v7  ;;  %v1257_v48 = vsel %vm1001_vm14, %v616_v26, %v1129_v15  ;;  %v3593_v7 = vld [vmem:[#allocation29_spill] sm:$0xff]  ;;  %v766_v34 = vadd.f32 %v2945_v51, %v3179_v47  ;;  %v639_v51 = vadd.f32 %v2947_v62, %v3168_v1 }
 0x1c6   :  { %1582 = vmatmul.f32.gmra.mxu3 %v1248_v3  ;;  %1647 = vmatmul.f32.gmra.mxu0 %v1249_v11  ;;  %v1128_v11 = vmul.f32 0.01, %v551_v27  ;;  %v636_v3 = vadd.f32 %v3592_v19, %v3168_v1  ;;  %v831_v60 = vadd.f32 %v3593_v7, %v3171_v53  ;;  %v834_v15 = vadd.f32 %v2949_v23, %v3171_v53 }
 0x1c7   :  { %v1012_v4 = vmul.f32 0.01, %v766_v34  ;;  %vm884_vm3 = vcmp.gt.f32.partialorder %v766_v34, 0.0  ;;  %vm890_vm4 = vcmp.gt.f32.partialorder %v639_v51, 0.0 }
 0x1c8   :  { %v3176_v32 = vpop.f32.mrf.mxu2  ;;  %v1010_v59 = vmul.f32 0.01, %v636_v3  ;;  %vm882_vm0 = vcmp.gt.f32.partialorder %v636_v3, 0.0  ;;  %v1013_v19 = vmul.f32 0.01, %v831_v60  ;;  %vm885_vm2 = vcmp.gt.f32.partialorder %v831_v60, 0.0 }
 0x1c9   :  { %3588 = vst [vmem:[#allocation22_spill] sm:$0xff] %v3176_v32  ;;  %v3181_v6 = vpop.f32.mrf.mxu3  ;;  %v1140_v62 = vsel %vm884_vm3, %v766_v34, %v1012_v4  ;;  %vm893_vm6 = vcmp.gt.f32.partialorder %v834_v15, 0.0 }
 0x1ca   :  { %3589 = vst [vmem:[#allocation20_spill] sm:$0xff] %v3181_v6  ;;  %v3183_v18 = vpop.f32.mrf.mxu1  ;;  %v1021_v6 = vmul.f32 0.01, %v834_v15 }
 0x1cb   :  { %3590 = vst [vmem:[#allocation23_spill] sm:$0xff] %v3183_v18  ;;  %v3185_v8 = vpop.f32.mrf.mxu0  ;;  %v1256_v18 = vsel %vm1000_vm15, %v551_v27, %v1128_v11  ;;  %v3204_v27 = vld [vmem:[%s3524_s7] ss:$0 sm:$0xff]  ;;  %v704_v11 = vadd.f32 %v2959_v10, %v3174_v35 }
 0x1cc   :  { %3591 = vst [vmem:[#allocation24_spill] sm:$0xff] %v3185_v8 }
 0x1cd   :  { %1455 = vmatmul.f32.gmra.mxu1 %v1254_v43  ;;  %1520 = vmatmul.f32.gmra.mxu2 %v1255_v25  ;;  %v1139_v43 = vsel %vm883_vm1, %v701_v52, %v1011_v28  ;;  %v769_v25 = vadd.f32 %v2961_v55, %v3179_v47  ;;  %v1019_v23 = vmul.f32 0.01, %v704_v11  ;;  %vm891_vm5 = vcmp.gt.f32.partialorder %v704_v11, 0.0 }
 0x1ce   :  { %1585 = vmatmul.f32.gmra.mxu3 %v1256_v18  ;;  %1650 = vmatmul.f32.gmra.mxu0 %v1257_v48  ;;  %v1138_v18 = vsel %vm882_vm0, %v636_v3, %v1010_v59  ;;  %v1141_v48 = vsel %vm885_vm2, %v831_v60, %v1013_v19  ;;  %v642_v55 = vadd.f32 %v2963_v36, %v3168_v1 }
 0x1cf   :  { %v1020_v3 = vmul.f32 0.01, %v769_v25  ;;  %vm892_vm7 = vcmp.gt.f32.partialorder %v769_v25, 0.0  ;;  %v837_v28 = vadd.f32 %v2967_v54, %v3171_v53  ;;  %v707_v19 = vadd.f32 %v2975_v22, %v3174_v35 }
 0x1d0   :  { %v3195_v8 = vpop.f32.mrf.mxu2  ;;  %v1147_v4 = vsel %vm891_vm5, %v704_v11, %v1019_v23  ;;  %vm898_vm8 = vcmp.gt.f32.partialorder %v642_v55, 0.0 }
 0x1d1   :  { %3594 = vst [vmem:[#allocation25_spill] sm:$0xff] %v3195_v8  ;;  %v3197_v26 = vpop.f32.mrf.mxu3  ;;  %v1027_v54 = vmul.f32 0.01, %v707_v19  ;;  %vm899_vm9 = vcmp.gt.f32.partialorder %v707_v19, 0.0  ;;  %vm901_vm10 = vcmp.gt.f32.partialorder %v837_v28, 0.0 }
 0x1d2   :  { %3595 = vst [vmem:[#allocation26_spill] sm:$0xff] %v3197_v26  ;;  %v1411_v13 = vpop.f32.mrf.mxu1  ;;  %v1018_v26 = vmul.f32 0.01, %v639_v51 }
 0x1d3   :  { %v1606_v39 = vpop.f32.mrf.mxu0  ;;  %v1412_v7 = vadd.f32 %v3204_v27, %v1411_v13  ;;  %v772_v13 = vadd.f32 %v2977_v0, %v3179_v47  ;;  %v1155_v23 = vsel %vm899_vm9, %v707_v19, %v1027_v54 }
 0x1d4   :  { %v1146_v59 = vsel %vm890_vm4, %v639_v51, %v1018_v26  ;;  %v1029_v51 = vmul.f32 0.01, %v837_v28 }
 0x1d5   :  { %1670 = vmatmul.f32.vlgmr.msra.gmra.mxu1 %v1138_v18  ;;  %1735 = vmatmul.f32.vlgmr.msra.gmra.mxu2 %v1139_v43  ;;  %v1148_v18 = vsel %vm892_vm7, %v769_v25, %v1020_v3  ;;  %vm900_vm11 = vcmp.gt.f32.partialorder %v772_v13, 0.0  ;;  %v775_v3 = vadd.f32 %v2993_v57, %v3179_v47 }
 0x1d6   :  { %1800 = vmatmul.f32.vlgmr.msra.gmra.mxu3 %v1140_v62  ;;  %1865 = vmatmul.f32.vlgmr.msra.gmra.mxu0 %v1141_v48  ;;  %v840_v48 = vadd.f32 %v2981_v16, %v3171_v53 }
 0x1d7   :  { %vm908_vm15 = vcmp.gt.f32.partialorder %v775_v3, 0.0 }
 0x1d8   :  { %v1476_v8 = vpop.f32.mrf.mxu2  ;;  %vm909_vm14 = vcmp.gt.f32.partialorder %v840_v48, 0.0 }
 0x1d9   :  { %v1477_v32 = vadd.f32 %v1476_v8, %v1412_v7  ;;  %v1541_v10 = vpop.f32.mrf.mxu3  ;;  %v1149_v8 = vsel %vm893_vm6, %v834_v15, %v1021_v6  ;;  %v1028_v6 = vmul.f32 0.01, %v772_v13  ;;  %v710_v7 = vadd.f32 %v2991_v29, %v3174_v35 }
 0x1da   :  { %v1414_v52 = vpop.f32.mrf.mxu1 }
 0x1db   :  { %v1542_v60 = vadd.f32 %v1541_v10, %v1477_v32  ;;  %v1609_v34 = vpop.f32.mrf.mxu0  ;;  %v1415_v36 = vadd.f32 %v3204_v27, %v1414_v52  ;;  %v1026_v32 = vmul.f32 0.01, %v642_v55  ;;  %v1157_v10 = vsel %vm901_vm10, %v837_v28, %v1029_v51 }
 0x1dc   :  { %v1156_v52 = vsel %vm900_vm11, %v772_v13, %v1028_v6  ;;  %v1035_v16 = vmul.f32 0.01, %v710_v7  ;;  %vm907_vm13 = vcmp.gt.f32.partialorder %v710_v7, 0.0  ;;  %v1036_v28 = vmul.f32 0.01, %v775_v3 }
 0x1dd   :  { %1673 = vmatmul.f32.gmra.mxu1 %v1146_v59  ;;  %1738 = vmatmul.f32.gmra.mxu2 %v1147_v4  ;;  %v3221_v43 = vadd.f32 %v1606_v39, %v1542_v60  ;;  %v645_v39 = vadd.f32 %v2979_v58, %v3168_v1  ;;  %v1154_v62 = vsel %vm898_vm8, %v642_v55, %v1026_v32  ;;  %v1037_v4 = vmul.f32 0.01, %v840_v48 }
 0x1de   :  { %1803 = vmatmul.f32.gmra.mxu3 %v1148_v18  ;;  %1868 = vmatmul.f32.gmra.mxu0 %v1149_v8  ;;  %v713_v32 = vadd.f32 %v3007_v42, %v3174_v35  ;;  %v778_v51 = vadd.f32 %v3009_v17, %v3179_v47 }
 0x1df   :  { %v1034_v55 = vmul.f32 0.01, %v645_v39  ;;  %vm906_vm12 = vcmp.gt.f32.partialorder %v645_v39, 0.0  ;;  %v1165_v54 = vsel %vm909_vm14, %v840_v48, %v1037_v4 }
 0x1e0   :  { %v1479_v26 = vpop.f32.mrf.mxu2  ;;  %vm915_vm1 = vcmp.gt.f32.partialorder %v713_v32, 0.0  ;;  %vm916_vm3 = vcmp.gt.f32.partialorder %v778_v51, 0.0 }
 0x1e1   :  { %v1480_v22 = vadd.f32 %v1479_v26, %v1415_v36  ;;  %v1544_v11 = vpop.f32.mrf.mxu3  ;;  %v1162_v18 = vsel %vm906_vm12, %v645_v39, %v1034_v55  ;;  %v843_v36 = vadd.f32 %v2999_v5, %v3171_v53  ;;  %v1163_v26 = vsel %vm907_vm13, %v710_v7, %v1035_v16 }
 0x1e2   :  { %v1417_v0 = vpop.f32.mrf.mxu1  ;;  %v1043_v5 = vmul.f32 0.01, %v713_v32  ;;  %v781_v55 = vadd.f32 %v3025_v63, %v3179_v47 }
 0x1e3   :  { %v1545_v15 = vadd.f32 %v1544_v11, %v1480_v22  ;;  %v1612_v25 = vpop.f32.mrf.mxu0  ;;  %v1418_v58 = vadd.f32 %v3204_v27, %v1417_v0  ;;  %v1164_v22 = vsel %vm908_vm15, %v775_v3, %v1036_v28  ;;  %v1045_v39 = vmul.f32 0.01, %v843_v36 }
 0x1e4   :  { %vm917_vm2 = vcmp.gt.f32.partialorder %v843_v36, 0.0  ;;  %v716_v3 = vadd.f32 %v3023_v50, %v3174_v35  ;;  %vm924_vm7 = vcmp.gt.f32.partialorder %v781_v55, 0.0 }
 0x1e5   :  { %1676 = vmatmul.f32.gmra.mxu1 %v1154_v62  ;;  %1741 = vmatmul.f32.gmra.mxu2 %v1155_v23  ;;  %v3232_v60 = vadd.f32 %v1609_v34, %v1545_v15  ;;  %v648_v34 = vadd.f32 %v2995_v41, %v3168_v1  ;;  %v1044_v62 = vmul.f32 0.01, %v778_v51 }
 0x1e6   :  { %1806 = vmatmul.f32.gmra.mxu3 %v1156_v52  ;;  %1871 = vmatmul.f32.gmra.mxu0 %v1157_v10  ;;  %v846_v10 = vadd.f32 %v3013_v37, %v3171_v53  ;;  %v1171_v52 = vsel %vm915_vm1, %v713_v32, %v1043_v5  ;;  %v1051_v37 = vmul.f32 0.01, %v716_v3  ;;  %vm923_vm5 = vcmp.gt.f32.partialorder %v716_v3, 0.0 }
 0x1e7   :  { %v1042_v6 = vmul.f32 0.01, %v648_v34  ;;  %vm914_vm0 = vcmp.gt.f32.partialorder %v648_v34, 0.0  ;;  %v719_v32 = vadd.f32 %v3039_v2, %v3174_v35 }
 0x1e8   :  { %v1482_v59 = vpop.f32.mrf.mxu2  ;;  %vm925_vm6 = vcmp.gt.f32.partialorder %v846_v10, 0.0 }
 0x1e9   :  { %v1483_v29 = vadd.f32 %v1482_v59, %v1418_v58  ;;  %v1547_v19 = vpop.f32.mrf.mxu3  ;;  %v1170_v23 = vsel %vm914_vm0, %v648_v34, %v1042_v6  ;;  %v1173_v58 = vsel %vm917_vm2, %v843_v36, %v1045_v39  ;;  %v1172_v59 = vsel %vm916_vm3, %v778_v51, %v1044_v62 }
 0x1ea   :  { %v1420_v57 = vpop.f32.mrf.mxu1  ;;  %v654_v34 = vadd.f32 %v3027_v61, %v3168_v1  ;;  %v849_v36 = vadd.f32 %v3031_v12, %v3171_v53  ;;  %v784_v51 = vadd.f32 %v3041_v38, %v3179_v47  ;;  %v1059_v12 = vmul.f32 0.01, %v719_v32 }
 0x1eb   :  { %v1548_v8 = vadd.f32 %v1547_v19, %v1483_v29  ;;  %v1615_v13 = vpop.f32.mrf.mxu0  ;;  %v1421_v41 = vadd.f32 %v3204_v27, %v1420_v57  ;;  %v1053_v19 = vmul.f32 0.01, %v846_v10  ;;  %v1052_v57 = vmul.f32 0.01, %v781_v55 }
 0x1ec   :  { %v1058_v6 = vmul.f32 0.01, %v654_v34  ;;  %vm930_vm8 = vcmp.gt.f32.partialorder %v654_v34, 0.0  ;;  %v1061_v5 = vmul.f32 0.01, %v849_v36  ;;  %vm931_vm9 = vcmp.gt.f32.partialorder %v719_v32, 0.0 }
 0x1ed   :  { %1679 = vmatmul.f32.gmra.mxu1 %v1162_v18  ;;  %1744 = vmatmul.f32.gmra.mxu2 %v1163_v26  ;;  %v3243_v11 = vadd.f32 %v1612_v25, %v1548_v8  ;;  %v651_v25 = vadd.f32 %v3011_v49, %v3168_v1  ;;  %v1179_v26 = vsel %vm923_vm5, %v716_v3, %v1051_v37  ;;  %vm933_vm10 = vcmp.gt.f32.partialorder %v849_v36, 0.0 }
 0x1ee   :  { %1809 = vmatmul.f32.gmra.mxu3 %v1164_v22  ;;  %1874 = vmatmul.f32.gmra.mxu0 %v1165_v54  ;;  %v1181_v54 = vsel %vm925_vm6, %v846_v10, %v1053_v19  ;;  %v1180_v22 = vsel %vm924_vm7, %v781_v55, %v1052_v57  ;;  %vm932_vm11 = vcmp.gt.f32.partialorder %v784_v51, 0.0  ;;  %v1189_v10 = vsel %vm933_vm10, %v849_v36, %v1061_v5 }
 0x1ef   :  { %v1050_v4 = vmul.f32 0.01, %v651_v25  ;;  %vm922_vm4 = vcmp.gt.f32.partialorder %v651_v25, 0.0  ;;  %v787_v3 = vadd.f32 %v3057_v14, %v3179_v47  ;;  %v660_v37 = vadd.f32 %v3059_v21, %v3168_v1 }
 0x1f0   :  { %v1485_v0 = vpop.f32.mrf.mxu2  ;;  %v855_v57 = vadd.f32 %v3063_v31, %v3171_v53  ;;  %v858_v5 = vadd.f32 %v3077_v24, %v3171_v53 }
 0x1f1   :  { %v1486_v42 = vadd.f32 %v1485_v0, %v1421_v41  ;;  %v1550_v15 = vpop.f32.mrf.mxu3  ;;  %v1178_v18 = vsel %vm922_vm4, %v651_v25, %v1050_v4  ;;  %v1186_v25 = vsel %vm930_vm8, %v654_v34, %v1058_v6  ;;  %vm940_vm15 = vcmp.gt.f32.partialorder %v787_v3, 0.0 }
 0x1f2   :  { %v1423_v17 = vpop.f32.mrf.mxu1  ;;  %vm946_vm0 = vcmp.gt.f32.partialorder %v660_v37, 0.0  ;;  %vm949_vm2 = vcmp.gt.f32.partialorder %v855_v57, 0.0  ;;  %vm957_vm6 = vcmp.gt.f32.partialorder %v858_v5, 0.0 }
 0x1f3   :  { %v1551_v48 = vadd.f32 %v1550_v15, %v1486_v42  ;;  %v1618_v7 = vpop.f32.mrf.mxu0  ;;  %v1424_v49 = vadd.f32 %v3204_v27, %v1423_v17  ;;  %v1060_v42 = vmul.f32 0.01, %v784_v51  ;;  %v657_v15 = vadd.f32 %v3043_v20, %v3168_v1 }
 0x1f5   :  { %1682 = vmatmul.f32.gmra.mxu1 %v1170_v23  ;;  %1747 = vmatmul.f32.gmra.mxu2 %v1171_v52  ;;  %v3254_v16 = vadd.f32 %v1615_v13, %v1551_v48  ;;  %v852_v48 = vadd.f32 %v3045_v56, %v3171_v53  ;;  %v1187_v23 = vsel %vm931_vm9, %v719_v32, %v1059_v12  ;;  %v1066_v55 = vmul.f32 0.01, %v657_v15 }
 0x1f6   :  { %1812 = vmatmul.f32.gmra.mxu3 %v1172_v59  ;;  %1877 = vmatmul.f32.gmra.mxu0 %v1173_v58  ;;  %v1188_v52 = vsel %vm932_vm11, %v784_v51, %v1060_v42  ;;  %vm938_vm12 = vcmp.gt.f32.partialorder %v657_v15, 0.0  ;;  %v1074_v32 = vmul.f32 0.01, %v660_v37 }
 0x1f7   :  { %vm941_vm14 = vcmp.gt.f32.partialorder %v852_v48, 0.0 }
 0x1f8   :  { %v1488_v29 = vpop.f32.mrf.mxu2  ;;  %v1202_v12 = vsel %vm946_vm0, %v660_v37, %v1074_v32 }
 0x1f9   :  { %v1489_v50 = vadd.f32 %v1488_v29, %v1424_v49  ;;  %v1553_v28 = vpop.f32.mrf.mxu3  ;;  %v1069_v49 = vmul.f32 0.01, %v852_v48  ;;  %v1068_v29 = vmul.f32 0.01, %v787_v3 }
 0x1fa   :  { %v1426_v63 = vpop.f32.mrf.mxu1 }
 0x1fb   :  { %v1554_v8 = vadd.f32 %v1553_v28, %v1489_v50  ;;  %v1621_v13 = vpop.f32.mrf.mxu0  ;;  %v1427_v61 = vadd.f32 %v3204_v27, %v1426_v63  ;;  %v1194_v28 = vsel %vm938_vm12, %v657_v15, %v1066_v55  ;;  %v725_v63 = vadd.f32 %v3071_v33, %v3174_v35  ;;  %v3597_v15 = vld [vmem:[#allocation31_spill] sm:$0xff]  ;;  %v3598_v55 = vld [vmem:[#allocation32_spill] sm:$0xff] }
 0x1fd   :  { %1685 = vmatmul.f32.gmra.mxu1 %v1178_v18  ;;  %1750 = vmatmul.f32.gmra.mxu2 %v1179_v26  ;;  %v3265_v41 = vadd.f32 %v1618_v7, %v1554_v8  ;;  %v722_v7 = vadd.f32 %v3055_v45, %v3174_v35  ;;  %v1197_v8 = vsel %vm941_vm14, %v852_v48, %v1069_v49  ;;  %v1075_v31 = vmul.f32 0.01, %v725_v63 }
 0x1fe   :  { %1815 = vmatmul.f32.gmra.mxu3 %v1180_v22  ;;  %1880 = vmatmul.f32.gmra.mxu0 %v1181_v54  ;;  %v1196_v18 = vsel %vm940_vm15, %v787_v3, %v1068_v29  ;;  %v1077_v54 = vmul.f32 0.01, %v855_v57  ;;  %vm947_vm1 = vcmp.gt.f32.partialorder %v725_v63, 0.0 }
 0x1ff   :  { %v1067_v56 = vmul.f32 0.01, %v722_v7  ;;  %vm939_vm13 = vcmp.gt.f32.partialorder %v722_v7, 0.0  ;;  %v1203_v42 = vsel %vm947_vm1, %v725_v63, %v1075_v31 }
 0x200   :  { %v1491_v0 = vpop.f32.mrf.mxu2 }
 0x201   :  { %v1492_v2 = vadd.f32 %v1491_v0, %v1427_v61  ;;  %v1556_v39 = vpop.f32.mrf.mxu3  ;;  %v1195_v34 = vsel %vm939_vm13, %v722_v7, %v1067_v56  ;;  %v663_v61 = vadd.f32 %v3075_v40, %v3168_v1 }
 0x202   :  { %v1429_v38 = vpop.f32.mrf.mxu1 }
 0x203   :  { %v1557_v62 = vadd.f32 %v1556_v39, %v1492_v2  ;;  %v1624_v17 = vpop.f32.mrf.mxu0  ;;  %v1430_v20 = vadd.f32 %v3204_v27, %v1429_v38  ;;  %v3596_v2 = vld [vmem:[#allocation30_spill] sm:$0xff]  ;;  %v1205_v38 = vsel %vm949_vm2, %v855_v57, %v1077_v54  ;;  %v1082_v48 = vmul.f32 0.01, %v663_v61 }
 0x204   :  { %v728_v39 = vadd.f32 %v3596_v2, %v3174_v35  ;;  %vm954_vm4 = vcmp.gt.f32.partialorder %v663_v61, 0.0 }
 0x205   :  { %1688 = vmatmul.f32.gmra.mxu1 %v1186_v25  ;;  %1753 = vmatmul.f32.gmra.mxu2 %v1187_v23  ;;  %v3276_v58 = vadd.f32 %v1621_v13, %v1557_v62  ;;  %v790_v13 = vadd.f32 %v3073_v46, %v3179_v47  ;;  %v793_v62 = vadd.f32 %v3597_v15, %v3179_v47  ;;  %v1085_v23 = vmul.f32 0.01, %v858_v5 }
 0x206   :  { %1818 = vmatmul.f32.gmra.mxu3 %v1188_v52  ;;  %1883 = vmatmul.f32.gmra.mxu0 %v1189_v10  ;;  %v1083_v24 = vmul.f32 0.01, %v728_v39  ;;  %vm955_vm5 = vcmp.gt.f32.partialorder %v728_v39, 0.0 }
 0x207   :  { %v1076_v22 = vmul.f32 0.01, %v790_v13  ;;  %vm948_vm3 = vcmp.gt.f32.partialorder %v790_v13, 0.0  ;;  %v1084_v52 = vmul.f32 0.01, %v793_v62  ;;  %vm956_vm7 = vcmp.gt.f32.partialorder %v793_v62, 0.0 }
 0x208   :  { %v1494_v59 = vpop.f32.mrf.mxu2 }
 0x209   :  { %v1495_v45 = vadd.f32 %v1494_v59, %v1430_v20  ;;  %v1559_v4 = vpop.f32.mrf.mxu3  ;;  %v666_v59 = vadd.f32 %v3598_v55, %v3168_v1  ;;  %v1212_v63 = vsel %vm956_vm7, %v793_v62, %v1084_v52  ;;  %v3606_v55 = vld [vmem:[#allocation12_spill] sm:$0xff] }
 0x20a   :  { %v1432_v14 = vpop.f32.mrf.mxu1 }
 0x20b   :  { %v1560_v19 = vadd.f32 %v1559_v4, %v1495_v45  ;;  %v1627_v50 = vpop.f32.mrf.mxu0  ;;  %v1433_v21 = vadd.f32 %v3204_v27, %v1432_v14  ;;  %v1210_v45 = vsel %vm954_vm4, %v663_v61, %v1082_v48  ;;  %v3599_v4 = vld [vmem:[#allocation33_spill] sm:$0xff]  ;;  %v3600_v14 = vld [vmem:[#allocation8_spill] sm:$0xff]  ;;  %vm962_vm8 = vcmp.gt.f32.partialorder %v666_v59, 0.0 }
 0x20c   :  { %v861_v29 = vadd.f32 %v3599_v4, %v3171_v53  ;;  %v731_v37 = vadd.f32 %v3600_v14, %v3174_v35  ;;  %v3607_v4 = vld [vmem:[#allocation14_spill] sm:$0xff]  ;;  %v737_v14 = vadd.f32 %v3135_v30, %v3174_v35 }
 0x20d   :  { %1691 = vmatmul.f32.gmra.mxu1 %v1194_v28  ;;  %1756 = vmatmul.f32.gmra.mxu2 %v1195_v34  ;;  %v3287_v36 = vadd.f32 %v1624_v17, %v1560_v19  ;;  %v1204_v17 = vsel %vm948_vm3, %v790_v13, %v1076_v22  ;;  %v1211_v19 = vsel %vm955_vm5, %v728_v39, %v1083_v24  ;;  %v3601_v28 = vld [vmem:[#allocation9_spill] sm:$0xff]  ;;  %v1090_v13 = vmul.f32 0.01, %v666_v59 }
 0x20e   :  { %1821 = vmatmul.f32.gmra.mxu3 %v1196_v18  ;;  %1886 = vmatmul.f32.gmra.mxu0 %v1197_v8  ;;  %v796_v57 = vadd.f32 %v3601_v28, %v3179_v47  ;;  %v1093_v32 = vmul.f32 0.01, %v861_v29  ;;  %vm963_vm9 = vcmp.gt.f32.partialorder %v731_v37, 0.0  ;;  %vm965_vm10 = vcmp.gt.f32.partialorder %v861_v29, 0.0 }
 0x20f   :  { %vm979_vm1 = vcmp.gt.f32.partialorder %v737_v14, 0.0 }
 0x210   :  { %v1497_v26 = vpop.f32.mrf.mxu2  ;;  %v1092_v54 = vmul.f32 0.01, %v796_v57  ;;  %vm964_vm11 = vcmp.gt.f32.partialorder %v796_v57, 0.0 }
 0x211   :  { %v1498_v33 = vadd.f32 %v1497_v26, %v1433_v21  ;;  %v1562_v51 = vpop.f32.mrf.mxu3  ;;  %v1091_v21 = vmul.f32 0.01, %v731_v37 }
 0x212   :  { %v1435_v46 = vpop.f32.mrf.mxu1  ;;  %v1220_v62 = vsel %vm964_vm11, %v796_v57, %v1092_v54 }
 0x213   :  { %v1563_v6 = vadd.f32 %v1562_v51, %v1498_v33  ;;  %v1630_v0 = vpop.f32.mrf.mxu0  ;;  %v1436_v40 = vadd.f32 %v3204_v27, %v1435_v46  ;;  %v3602_v51 = vld [vmem:[#allocation10_spill] sm:$0xff]  ;;  %v1219_v39 = vsel %vm963_vm9, %v731_v37, %v1091_v21 }
 0x214   :  { %v669_v22 = vadd.f32 %v3602_v51, %v3168_v1 }
 0x215   :  { %1694 = vmatmul.f32.gmra.mxu1 %v1202_v12  ;;  %1759 = vmatmul.f32.gmra.mxu2 %v1203_v42  ;;  %v3298_v25 = vadd.f32 %v1627_v50, %v1563_v6  ;;  %v1213_v50 = vsel %vm957_vm6, %v858_v5, %v1085_v23  ;;  %v1218_v6 = vsel %vm962_vm8, %v666_v59, %v1090_v13  ;;  %v3604_v5 = vld [vmem:[#allocation11_spill] sm:$0xff] }
 0x216   :  { %1824 = vmatmul.f32.gmra.mxu3 %v1204_v17  ;;  %1889 = vmatmul.f32.gmra.mxu0 %v1205_v38  ;;  %v734_v2 = vadd.f32 %v3604_v5, %v3174_v35  ;;  %v1221_v42 = vsel %vm965_vm10, %v861_v29, %v1093_v32  ;;  %v3605_v38 = vld [vmem:[#allocation13_spill] sm:$0xff]  ;;  %v1098_v48 = vmul.f32 0.01, %v669_v22  ;;  %vm970_vm12 = vcmp.gt.f32.partialorder %v669_v22, 0.0 }
 0x217   :  { %v799_v15 = vadd.f32 %v3605_v38, %v3179_v47  ;;  %v672_v59 = vadd.f32 %v3606_v55, %v3168_v1  ;;  %v867_v29 = vadd.f32 %v3607_v4, %v3171_v53  ;;  %v3610_v5 = vld [vmem:[#allocation17_spill] sm:$0xff] }
 0x218   :  { %v1500_v7 = vpop.f32.mrf.mxu2  ;;  %v1099_v24 = vmul.f32 0.01, %v734_v2  ;;  %vm971_vm13 = vcmp.gt.f32.partialorder %v734_v2, 0.0 }
 0x219   :  { %v1501_v10 = vadd.f32 %v1500_v7, %v1436_v40  ;;  %v1565_v3 = vpop.f32.mrf.mxu3  ;;  %v1100_v52 = vmul.f32 0.01, %v799_v15  ;;  %vm972_vm15 = vcmp.gt.f32.partialorder %v799_v15, 0.0  ;;  %vm978_vm0 = vcmp.gt.f32.partialorder %v672_v59, 0.0 }
 0x21a   :  { %v1438_v20 = vpop.f32.mrf.mxu1  ;;  %v1227_v37 = vsel %vm971_vm13, %v734_v2, %v1099_v24  ;;  %v1109_v21 = vmul.f32 0.01, %v867_v29  ;;  %vm981_vm2 = vcmp.gt.f32.partialorder %v867_v29, 0.0  ;;  %v805_v2 = vadd.f32 %v3610_v5, %v3179_v47  ;;  %v3618_v5 = vld [vmem:[#allocation26_spill] sm:$0xff] }
 0x21b   :  { %v1566_v56 = vadd.f32 %v1565_v3, %v1501_v10  ;;  %v1633_v49 = vpop.f32.mrf.mxu0  ;;  %v1439_v8 = vadd.f32 %v3204_v27, %v1438_v20  ;;  %v1228_v28 = vsel %vm972_vm15, %v799_v15, %v1100_v52  ;;  %v3612_v52 = vld [vmem:[#allocation19_spill] sm:$0xff] }
 0x21c   :  { %v1116_v24 = vmul.f32 0.01, %v805_v2  ;;  %vm988_vm7 = vcmp.gt.f32.partialorder %v805_v2, 0.0 }
 0x21d   :  { %1697 = vmatmul.f32.gmra.mxu1 %v1210_v45  ;;  %1762 = vmatmul.f32.gmra.mxu2 %v1211_v19  ;;  %v3309_v34 = vadd.f32 %v1630_v0, %v1566_v56  ;;  %v3603_v0 = vld [vmem:[#allocation34_spill] sm:$0xff]  ;;  %v1226_v45 = vsel %vm970_vm12, %v669_v22, %v1098_v48  ;;  %v3608_v22 = vld [vmem:[#allocation15_spill] sm:$0xff] }
 0x21e   :  { %1827 = vmatmul.f32.gmra.mxu3 %v1212_v63  ;;  %1892 = vmatmul.f32.gmra.mxu0 %v1213_v50  ;;  %v864_v12 = vadd.f32 %v3603_v0, %v3171_v53  ;;  %v802_v50 = vadd.f32 %v3137_v44, %v3179_v47 }
 0x220   :  { %v1503_v18 = vpop.f32.mrf.mxu2  ;;  %v1101_v23 = vmul.f32 0.01, %v864_v12  ;;  %vm973_vm14 = vcmp.gt.f32.partialorder %v864_v12, 0.0  ;;  %vm980_vm3 = vcmp.gt.f32.partialorder %v802_v50, 0.0 }
 0x221   :  { %v1504_v26 = vadd.f32 %v1503_v18, %v1439_v8  ;;  %v1568_v31 = vpop.f32.mrf.mxu3  ;;  %v1106_v8 = vmul.f32 0.01, %v672_v59  ;;  %v1107_v18 = vmul.f32 0.01, %v737_v14 }
 0x222   :  { %v1441_v33 = vpop.f32.mrf.mxu1  ;;  %v1229_v19 = vsel %vm973_vm14, %v864_v12, %v1101_v23  ;;  %v1237_v12 = vsel %vm981_vm2, %v867_v29, %v1109_v21 }
 0x223   :  { %v1569_v46 = vadd.f32 %v1568_v31, %v1504_v26  ;;  %v1636_v61 = vpop.f32.mrf.mxu0  ;;  %v1442_v40 = vadd.f32 %v3204_v27, %v1441_v33  ;;  %v1108_v26 = vmul.f32 0.01, %v802_v50  ;;  %v675_v31 = vadd.f32 %v3139_v9, %v3168_v1 }
 0x224   :  { %v1234_v51 = vsel %vm978_vm0, %v672_v59, %v1106_v8  ;;  %v1235_v0 = vsel %vm979_vm1, %v737_v14, %v1107_v18  ;;  %v3614_v14 = vld [vmem:[#allocation20_spill] sm:$0xff] }
 0x225   :  { %1700 = vmatmul.f32.gmra.mxu1 %v1218_v6  ;;  %1765 = vmatmul.f32.gmra.mxu2 %v1219_v39  ;;  %v3320_v17 = vadd.f32 %v1633_v49, %v1569_v46  ;;  %v870_v46 = vadd.f32 %v3608_v22, %v3171_v53  ;;  %v1236_v39 = vsel %vm980_vm3, %v802_v50, %v1108_v26  ;;  %vm986_vm4 = vcmp.gt.f32.partialorder %v675_v31, 0.0 }
 0x226   :  { %1830 = vmatmul.f32.gmra.mxu3 %v1220_v62  ;;  %1895 = vmatmul.f32.gmra.mxu0 %v1221_v42  ;;  %v1114_v15 = vmul.f32 0.01, %v675_v31 }
 0x227   :  { %vm989_vm6 = vcmp.gt.f32.partialorder %v870_v46, 0.0 }
 0x228   :  { %v1506_v7 = vpop.f32.mrf.mxu2 }
 0x229   :  { %v1507_v10 = vadd.f32 %v1506_v7, %v1442_v40  ;;  %v1571_v3 = vpop.f32.mrf.mxu3  ;;  %v1117_v40 = vmul.f32 0.01, %v870_v46 }
 0x22a   :  { %v1444_v20 = vpop.f32.mrf.mxu1 }
 0x22b   :  { %v1572_v56 = vadd.f32 %v1571_v3, %v1507_v10  ;;  %v1639_v49 = vpop.f32.mrf.mxu0  ;;  %v1445_v63 = vadd.f32 %v3204_v27, %v1444_v20  ;;  %v3611_v10 = vld [vmem:[#allocation18_spill] sm:$0xff]  ;;  %v873_v20 = vadd.f32 %v3612_v52, %v3171_v53  ;;  %v1245_v29 = vsel %vm989_vm6, %v870_v46, %v1117_v40  ;;  %v3616_v46 = vld [vmem:[#allocation24_spill] sm:$0xff] }
 0x22c   :  { %v678_v3 = vadd.f32 %v3611_v10, %v3168_v1 }
 0x22d   :  { %1703 = vmatmul.f32.gmra.mxu1 %v1226_v45  ;;  %1768 = vmatmul.f32.gmra.mxu2 %v1227_v37  ;;  %v3331_v57 = vadd.f32 %v1636_v61, %v1572_v56  ;;  %v3609_v61 = vld [vmem:[#allocation16_spill] sm:$0xff]  ;;  %v3613_v56 = vld [vmem:[#allocation22_spill] sm:$0xff]  ;;  %v1242_v45 = vsel %vm986_vm4, %v675_v31, %v1114_v15  ;;  %v808_v37 = vadd.f32 %v3614_v14, %v3179_v47  ;;  %v1125_v8 = vmul.f32 0.01, %v873_v20 }
 0x22e   :  { %1833 = vmatmul.f32.gmra.mxu3 %v1228_v28  ;;  %1898 = vmatmul.f32.gmra.mxu0 %v1229_v19  ;;  %v740_v6 = vadd.f32 %v3609_v61, %v3174_v35  ;;  %v1244_v19 = vsel %vm988_vm7, %v805_v2, %v1116_v24  ;;  %vm994_vm8 = vcmp.gt.f32.partialorder %v678_v3, 0.0  ;;  %vm997_vm9 = vcmp.gt.f32.partialorder %v873_v20, 0.0 }
 0x22f   :  { %vm996_vm11 = vcmp.gt.f32.partialorder %v808_v37, 0.0  ;;  %v876_v61 = vadd.f32 %v3616_v46, %v3171_v53  ;;  %v811_v2 = vadd.f32 %v3618_v5, %v3179_v47 }
 0x230   :  { %v1509_v13 = vpop.f32.mrf.mxu2  ;;  %v1115_v62 = vmul.f32 0.01, %v740_v6  ;;  %vm987_vm5 = vcmp.gt.f32.partialorder %v740_v6, 0.0 }
 0x231   :  { %v1510_v30 = vadd.f32 %v1509_v13, %v1445_v63  ;;  %v1574_v32 = vpop.f32.mrf.mxu3  ;;  %v1122_v63 = vmul.f32 0.01, %v678_v3  ;;  %vm1004_vm14 = vcmp.gt.f32.partialorder %v811_v2, 0.0  ;;  %vm1005_vm15 = vcmp.gt.f32.partialorder %v876_v61, 0.0 }
 0x232   :  { %v1447_v44 = vpop.f32.mrf.mxu1  ;;  %v1243_v4 = vsel %vm987_vm5, %v740_v6, %v1115_v62  ;;  %v3617_v6 = vld [vmem:[#allocation25_spill] sm:$0xff] }
 0x233   :  { %v1575_v54 = vadd.f32 %v1574_v32, %v1510_v30  ;;  %v1642_v33 = vpop.f32.mrf.mxu0  ;;  %v1448_v9 = vadd.f32 %v3204_v27, %v1447_v44  ;;  %v1124_v32 = vmul.f32 0.01, %v808_v37 }
 0x235   :  { %1706 = vmatmul.f32.gmra.mxu1 %v1234_v51  ;;  %1771 = vmatmul.f32.gmra.mxu2 %v1235_v0  ;;  %v3342_v42 = vadd.f32 %v1639_v49, %v1575_v54  ;;  %v743_v49 = vadd.f32 %v3613_v56, %v3174_v35  ;;  %v1250_v54 = vsel %vm994_vm8, %v678_v3, %v1122_v63  ;;  %v3615_v51 = vld [vmem:[#allocation23_spill] sm:$0xff] }
 0x236   :  { %1836 = vmatmul.f32.gmra.mxu3 %v1236_v39  ;;  %1901 = vmatmul.f32.gmra.mxu0 %v1237_v12  ;;  %v681_v22 = vadd.f32 %v3615_v51, %v3168_v1  ;;  %v746_v0 = vadd.f32 %v3617_v6, %v3174_v35  ;;  %v1252_v39 = vsel %vm996_vm11, %v808_v37, %v1124_v32  ;;  %v1132_v35 = vmul.f32 0.01, %v811_v2 }
 0x237   :  { %v1123_v18 = vmul.f32 0.01, %v743_v49  ;;  %vm995_vm10 = vcmp.gt.f32.partialorder %v743_v49, 0.0 }
 0x238   :  { %v1512_v38 = vpop.f32.mrf.mxu2  ;;  %vm1002_vm12 = vcmp.gt.f32.partialorder %v681_v22, 0.0  ;;  %v1130_v15 = vmul.f32 0.01, %v681_v22  ;;  %v1131_v53 = vmul.f32 0.01, %v746_v0  ;;  %vm1003_vm13 = vcmp.gt.f32.partialorder %v746_v0, 0.0 }
 0x239   :  { %v1513_v48 = vadd.f32 %v1512_v38, %v1448_v9  ;;  %v1577_v7 = vpop.f32.mrf.mxu3  ;;  %v1251_v12 = vsel %vm995_vm10, %v743_v49, %v1123_v18  ;;  %v1260_v3 = vsel %vm1004_vm14, %v811_v2, %v1132_v35 }
 0x23a   :  { %v1450_v23 = vpop.f32.mrf.mxu1  ;;  %v1259_v10 = vsel %vm1003_vm13, %v746_v0, %v1131_v53 }
 0x23b   :  { %v1578_v55 = vadd.f32 %v1577_v7, %v1513_v48  ;;  %v1645_v59 = vpop.f32.mrf.mxu0  ;;  %v1451_v28 = vadd.f32 %v3204_v27, %v1450_v23  ;;  %v1133_v48 = vmul.f32 0.01, %v876_v61  ;;  %v1258_v23 = vsel %vm1002_vm12, %v681_v22, %v1130_v15 }
 0x23d   :  { %1709 = vmatmul.f32.gmra.mxu1 %v1242_v45  ;;  %1774 = vmatmul.f32.gmra.mxu2 %v1243_v4  ;;  %v3354_v50 = vadd.f32 %v1642_v33, %v1578_v55  ;;  %v1253_v33 = vsel %vm997_vm9, %v873_v20, %v1125_v8  ;;  %v1261_v52 = vsel %vm1005_vm15, %v876_v61, %v1133_v48 }
 0x23e   :  { %1839 = vmatmul.f32.gmra.mxu3 %v1244_v19  ;;  %1904 = vmatmul.f32.gmra.mxu0 %v1245_v29 }
 0x240   :  { %v1515_v13 = vpop.f32.mrf.mxu2 }
 0x241   :  { %v1516_v21 = vadd.f32 %v1515_v13, %v1451_v28  ;;  %v1580_v30 = vpop.f32.mrf.mxu3 }
 0x242   :  { %v1453_v26 = vpop.f32.mrf.mxu1 }
 0x243   :  { %v1581_v44 = vadd.f32 %v1580_v30, %v1516_v21  ;;  %v1648_v31 = vpop.f32.mrf.mxu0  ;;  %v1454_v38 = vadd.f32 %v3204_v27, %v1453_v26 }
 0x245   :  { %1712 = vmatmul.f32.gmra.mxu1 %v1250_v54  ;;  %1777 = vmatmul.f32.gmra.mxu2 %v1251_v12  ;;  %v3365_v9 = vadd.f32 %v1645_v59, %v1581_v44 }
 0x246   :  { %1842 = vmatmul.f32.gmra.mxu3 %v1252_v39  ;;  %1907 = vmatmul.f32.gmra.mxu0 %v1253_v33 }
 0x248   :  { %v1518_v1 = vpop.f32.mrf.mxu2 }
 0x249   :  { %v1519_v62 = vadd.f32 %v1518_v1, %v1454_v38  ;;  %v1583_v40 = vpop.f32.mrf.mxu3 }
 0x24a   :  { %v1456_v7 = vpop.f32.mrf.mxu1 }
 0x24b   :  { %v1584_v47 = vadd.f32 %v1583_v40, %v1519_v62  ;;  %v1651_v24 = vpop.f32.mrf.mxu0  ;;  %v1457_v55 = vadd.f32 %v3204_v27, %v1456_v7 }
 0x24d   :  { %1715 = vmatmul.f32.gmra.mxu1 %v1258_v23  ;;  %1780 = vmatmul.f32.gmra.mxu2 %v1259_v10  ;;  %v3368_v20 = vadd.f32 %v1648_v31, %v1584_v47 }
 0x24e   :  { %1845 = vmatmul.f32.gmra.mxu3 %v1260_v3  ;;  %1910 = vmatmul.f32.gmra.mxu0 %v1261_v52 }
 0x250   :  { %v1521_v59 = vpop.f32.mrf.mxu2 }
 0x251   :  { %v1522_v56 = vadd.f32 %v1521_v59, %v1457_v55  ;;  %v1586_v49 = vpop.f32.mrf.mxu3 }
 0x252   :  { %v1671_v45 = vpop.f32.mrf.mxu1 }
 0x253   :  { %v1587_v4 = vadd.f32 %v1586_v49, %v1522_v56  ;;  %v1866_v29 = vpop.f32.mrf.mxu0  ;;  %v1672_v37 = vadd.f32 %v1671_v45, %v3221_v43 }
 0x255   :  { %v3371_v14 = vadd.f32 %v1651_v24, %v1587_v4 }
 0x258   :  { %v1736_v19 = vpop.f32.mrf.mxu2 }
 0x259   :  { %v1737_v28 = vadd.f32 %v1736_v19, %v1672_v37  ;;  %v1801_v63 = vpop.f32.mrf.mxu3 }
 0x25a   :  { %v1674_v8 = vpop.f32.mrf.mxu1 }
 0x25b   :  { %v1802_v13 = vadd.f32 %v1801_v63, %v1737_v28  ;;  %v1869_v18 = vpop.f32.mrf.mxu0  ;;  %v1675_v27 = vadd.f32 %v1674_v8, %v3232_v60 }
 0x25d   :  { %v3374_v21 = vadd.f32 %v1866_v29, %v1802_v13 }
 0x25f   :  { %v1914_v30 = vmul.f32 %v3374_v21, %v3374_v21 }
 0x260   :  { %v1739_v32 = vpop.f32.mrf.mxu2 }
 0x261   :  { %v1740_v26 = vadd.f32 %v1739_v32, %v1675_v27  ;;  %v1804_v44 = vpop.f32.mrf.mxu3  ;;  %1930 = vadd.xlane.f32.xlu0 %v1914_v30 }
 0x262   :  { %v1677_v31 = vpop.f32.mrf.mxu1 }
 0x263   :  { %v1805_v54 = vadd.f32 %v1804_v44, %v1740_v26  ;;  %v1872_v43 = vpop.f32.mrf.mxu0  ;;  %v1678_v51 = vadd.f32 %v1677_v31, %v3243_v11 }
 0x265   :  { %v3379_v33 = vadd.f32 %v1869_v18, %v1805_v54 }
 0x267   :  { %v1915_v22 = vmul.f32 %v3379_v33, %v3379_v33 }
 0x268   :  { %v1742_v46 = vpop.f32.mrf.mxu2 }
 0x269   :  { %v1743_v61 = vadd.f32 %v1742_v46, %v1678_v51  ;;  %v1807_v60 = vpop.f32.mrf.mxu3  ;;  %1932 = vadd.xlane.f32.xlu0 %v1915_v22 }
 0x26a   :  { %v1680_v6 = vpop.f32.mrf.mxu1 }
 0x26b   :  { %v1808_v0 = vadd.f32 %v1807_v60, %v1743_v61  ;;  %v1875_v12 = vpop.f32.mrf.mxu0  ;;  %v1681_v2 = vadd.f32 %v1680_v6, %v3254_v16 }
 0x26d   :  { %v3384_v5 = vadd.f32 %v1872_v43, %v1808_v0 }
 0x26f   :  { %v1916_v39 = vmul.f32 %v3384_v5, %v3384_v5 }
 0x270   :  { %v1745_v38 = vpop.f32.mrf.mxu2 }
 0x271   :  { %v1746_v1 = vadd.f32 %v1745_v38, %v1681_v2  ;;  %v1810_v11 = vpop.f32.mrf.mxu3  ;;  %1934 = vadd.xlane.f32.xlu1 %v1916_v39 }
 0x272   :  { %v1683_v15 = vpop.f32.mrf.mxu1 }
 0x273   :  { %v1811_v53 = vadd.f32 %v1810_v11, %v1746_v1  ;;  %v1878_v62 = vpop.f32.mrf.mxu0  ;;  %v1684_v35 = vadd.f32 %v1683_v15, %v3265_v41 }
 0x275   :  { %v3389_v40 = vadd.f32 %v1875_v12, %v1811_v53 }
 0x277   :  { %v1917_v48 = vmul.f32 %v3389_v40, %v3389_v40 }
 0x278   :  { %v1748_v7 = vpop.f32.mrf.mxu2 }
 0x279   :  { %v1749_v47 = vadd.f32 %v1748_v7, %v1684_v35  ;;  %v1813_v16 = vpop.f32.mrf.mxu3  ;;  %1936 = vadd.xlane.f32.xlu1 %v1917_v48 }
 0x27a   :  { %v1686_v24 = vpop.f32.mrf.mxu1 }
 0x27b   :  { %v1814_v23 = vadd.f32 %v1813_v16, %v1749_v47  ;;  %v1881_v10 = vpop.f32.mrf.mxu0  ;;  %v1687_v52 = vadd.f32 %v1686_v24, %v3276_v58 }
 0x27d   :  { %v3394_v3 = vadd.f32 %v1878_v62, %v1814_v23 }
 0x27f   :  { %v1918_v55 = vmul.f32 %v3394_v3, %v3394_v3 }
 0x280   :  { %v1751_v59 = vpop.f32.mrf.mxu2 }
 0x281   :  { %v1752_v56 = vadd.f32 %v1751_v59, %v1687_v52  ;;  %v1816_v41 = vpop.f32.mrf.mxu3  ;;  %1938 = vadd.xlane.f32.xlu2 %v1918_v55 }
 0x282   :  { %v1689_v49 = vpop.f32.mrf.mxu1 }
 0x283   :  { %v1817_v45 = vadd.f32 %v1816_v41, %v1752_v56  ;;  %v1884_v4 = vpop.f32.mrf.mxu0  ;;  %v1690_v37 = vadd.f32 %v1689_v49, %v3287_v36 }
 0x285   :  { %v3399_v29 = vadd.f32 %v1881_v10, %v1817_v45 }
 0x287   :  { %v1919_v19 = vmul.f32 %v3399_v29, %v3399_v29 }
 0x288   :  { %v1754_v28 = vpop.f32.mrf.mxu2 }
 0x289   :  { %v1755_v63 = vadd.f32 %v1754_v28, %v1690_v37  ;;  %v1819_v58 = vpop.f32.mrf.mxu3  ;;  %1940 = vadd.xlane.f32.xlu2 %v1919_v19 }
 0x28a   :  { %v1692_v8 = vpop.f32.mrf.mxu1 }
 0x28b   :  { %v1820_v13 = vadd.f32 %v1819_v58, %v1755_v63  ;;  %v1887_v18 = vpop.f32.mrf.mxu0  ;;  %v1693_v30 = vadd.f32 %v1692_v8, %v3298_v25 }
 0x28d   :  { %v3404_v27 = vadd.f32 %v1884_v4, %v1820_v13 }
 0x28f   :  { %v1920_v32 = vmul.f32 %v3404_v27, %v3404_v27 }
 0x290   :  { %v1757_v26 = vpop.f32.mrf.mxu2 }
 0x291   :  { %v1758_v44 = vadd.f32 %v1757_v26, %v1693_v30  ;;  %v1822_v36 = vpop.f32.mrf.mxu3  ;;  %1942 = vadd.xlane.f32.xlu0 %v1920_v32 }
 0x292   :  { %v1695_v31 = vpop.f32.mrf.mxu1 }
 0x293   :  { %v1823_v54 = vadd.f32 %v1822_v36, %v1758_v44  ;;  %v1890_v43 = vpop.f32.mrf.mxu0  ;;  %v1696_v22 = vadd.f32 %v1695_v31, %v3309_v34 }
 0x295   :  { %v3409_v51 = vadd.f32 %v1887_v18, %v1823_v54 }
 0x297   :  { %v1921_v46 = vmul.f32 %v3409_v51, %v3409_v51 }
 0x298   :  { %v1760_v61 = vpop.f32.mrf.mxu2 }
 0x299   :  { %v1761_v60 = vadd.f32 %v1760_v61, %v1696_v22  ;;  %v1825_v25 = vpop.f32.mrf.mxu3  ;;  %1944 = vadd.xlane.f32.xlu1 %v1921_v46 }
 0x29a   :  { %v1698_v6 = vpop.f32.mrf.mxu1 }
 0x29b   :  { %v1826_v0 = vadd.f32 %v1825_v25, %v1761_v60  ;;  %v1893_v12 = vpop.f32.mrf.mxu0  ;;  %v1699_v39 = vadd.f32 %v1698_v6, %v3320_v17 }
 0x29d   :  { %v3414_v2 = vadd.f32 %v1890_v43, %v1826_v0 }
 0x29f   :  { %v1922_v38 = vmul.f32 %v3414_v2, %v3414_v2 }
 0x2a0   :  { %v1763_v1 = vpop.f32.mrf.mxu2 }
 0x2a1   :  { %v1764_v11 = vadd.f32 %v1763_v1, %v1699_v39  ;;  %v1828_v34 = vpop.f32.mrf.mxu3  ;;  %1946 = vadd.xlane.f32.xlu2 %v1922_v38 }
 0x2a2   :  { %v1701_v15 = vpop.f32.mrf.mxu1 }
 0x2a3   :  { %v1829_v53 = vadd.f32 %v1828_v34, %v1764_v11  ;;  %v1896_v62 = vpop.f32.mrf.mxu0  ;;  %v1702_v48 = vadd.f32 %v1701_v15, %v3331_v57 }
 0x2a5   :  { %v3419_v35 = vadd.f32 %v1893_v12, %v1829_v53 }
 0x2a7   :  { %v1923_v7 = vmul.f32 %v3419_v35, %v3419_v35 }
 0x2a8   :  { %v1766_v47 = vpop.f32.mrf.mxu2 }
 0x2a9   :  { %v1767_v16 = vadd.f32 %v1766_v47, %v1702_v48  ;;  %v1831_v17 = vpop.f32.mrf.mxu3  ;;  %1948 = vadd.xlane.f32.xlu0 %v1923_v7 }
 0x2aa   :  { %v1704_v24 = vpop.f32.mrf.mxu1 }
 0x2ab   :  { %v1832_v23 = vadd.f32 %v1831_v17, %v1767_v16  ;;  %v1899_v10 = vpop.f32.mrf.mxu0  ;;  %v1705_v55 = vadd.f32 %v1704_v24, %v3342_v42 }
 0x2ad   :  { %v3424_v52 = vadd.f32 %v1896_v62, %v1832_v23 }
 0x2af   :  { %v1924_v59 = vmul.f32 %v3424_v52, %v3424_v52 }
 0x2b0   :  { %v1769_v56 = vpop.f32.mrf.mxu2 }
 0x2b1   :  { %v1770_v41 = vadd.f32 %v1769_v56, %v1705_v55  ;;  %v1834_v57 = vpop.f32.mrf.mxu3  ;;  %1950 = vadd.xlane.f32.xlu1 %v1924_v59 }
 0x2b2   :  { %v1707_v49 = vpop.f32.mrf.mxu1 }
 0x2b3   :  { %v1835_v45 = vadd.f32 %v1834_v57, %v1770_v41  ;;  %v1902_v37 = vpop.f32.mrf.mxu0  ;;  %v1708_v19 = vadd.f32 %v1707_v49, %v3354_v50 }
 0x2b5   :  { %v3429_v4 = vadd.f32 %v1899_v10, %v1835_v45 }
 0x2b7   :  { %v1925_v28 = vmul.f32 %v3429_v4, %v3429_v4 }
 0x2b8   :  { %v1772_v63 = vpop.f32.mrf.mxu2 }
 0x2b9   :  { %v1773_v58 = vadd.f32 %v1772_v63, %v1708_v19  ;;  %v1837_v42 = vpop.f32.mrf.mxu3  ;;  %1952 = vadd.xlane.f32.xlu2 %v1925_v28 }
 0x2ba   :  { %v1710_v8 = vpop.f32.mrf.mxu1 }
 0x2bb   :  { %v1838_v13 = vadd.f32 %v1837_v42, %v1773_v58  ;;  %v1711_v30 = vadd.f32 %v1710_v8, %v3365_v9  ;;  %v1905_v26 = vpop.f32.mrf.mxu0 }
 0x2bd   :  { %v3434_v18 = vadd.f32 %v1902_v37, %v1838_v13 }
 0x2bf   :  { %v1926_v32 = vmul.f32 %v3434_v18, %v3434_v18 }
 0x2c0   :  { %v1775_v44 = vpop.f32.mrf.mxu2 }
 0x2c1   :  { %v1776_v36 = vadd.f32 %v1775_v44, %v1711_v30  ;;  %v1840_v50 = vpop.f32.mrf.mxu3  ;;  %1954 = vadd.xlane.f32.xlu0 %v1926_v32 }
 0x2c2   :  { %v1713_v31 = vpop.f32.mrf.mxu1 }
 0x2c3   :  { %v1841_v54 = vadd.f32 %v1840_v50, %v1776_v36  ;;  %v1714_v22 = vadd.f32 %v1713_v31, %v3368_v20  ;;  %v1908_v25 = vpop.f32.mrf.mxu0 }
 0x2c5   :  { %v3439_v43 = vadd.f32 %v1905_v26, %v1841_v54 }
 0x2c7   :  { %v1927_v46 = vmul.f32 %v3439_v43, %v3439_v43 }
 0x2c8   :  { %v1778_v61 = vpop.f32.mrf.mxu2 }
 0x2c9   :  { %v1779_v60 = vadd.f32 %v1778_v61, %v1714_v22  ;;  %v1843_v9 = vpop.f32.mrf.mxu3  ;;  %1956 = vadd.xlane.f32.xlu1 %v1927_v46 }
 0x2ca   :  { %v1716_v0 = vpop.f32.mrf.mxu1 }
 0x2cb   :  { %v1844_v6 = vadd.f32 %v1843_v9, %v1779_v60  ;;  %v1717_v39 = vadd.f32 %v1716_v0, %v3371_v14  ;;  %v1911_v15 = vpop.f32.mrf.mxu0 }
 0x2cd   :  { %v3444_v12 = vadd.f32 %v1908_v25, %v1844_v6 }
 0x2cf   :  { %v1928_v38 = vmul.f32 %v3444_v12, %v3444_v12 }
 0x2d0   :  { %v1781_v1 = vpop.f32.mrf.mxu2 }
 0x2d1   :  { %v1782_v11 = vadd.f32 %v1781_v1, %v1717_v39  ;;  %1958 = vadd.xlane.f32.xlu2 %v1928_v38  ;;  %v1846_v20 = vpop.f32.mrf.mxu3 }
 0x2d3   :  { %v1847_v34 = vadd.f32 %v1846_v20, %v1782_v11 }
 0x2d4   :  { %v1931_v53 = vpop.xlane.xlu0 %1930 }
 0x2d5   :  { %v3449_v62 = vadd.f32 %v1911_v15, %v1847_v34  ;;  %v1962_v48 = vadd.f32 1e-12, %v1931_v53 }
 0x2d7   :  { %2283 = vrsqrt.f32 %v1962_v48  ;;  %v1929_v7 = vmul.f32 %v3449_v62, %v3449_v62  ;;  %vm1984_vm1 = vweird.f32 %v1962_v48 }
 0x2d9   :  { %1960 = vadd.xlane.f32.xlu0 %v1929_v7 }
 0x2dc   :  { %v1933_v47 = vpop.xlane.xlu0 %1932 }
 0x2dd   :  { %v2284_v14 = vpop.eup %2283  ;;  %v1963_v16 = vadd.f32 1e-12, %v1933_v47 }
 0x2de   :  { %v1979_v17 = vmul.f32 %v2284_v14, %v1962_v48  ;;  %vm1985_vm0 = vweird.f32 %v2284_v14 }
 0x2df   :  { %2285 = vrsqrt.f32 %v1963_v16  ;;  %vm1986_vm2 = vmor %vm1984_vm1, %vm1985_vm0  ;;  %vm1994_vm4 = vweird.f32 %v1963_v16 }
 0x2e0   :  { %v1980_v24 = vmul.f32 %v2284_v14, %v1979_v17 }
 0x2e2   :  { %v1981_v23 = vmul.f32 0.5, %v1980_v24 }
 0x2e4   :  { %v1982_v10 = vsub.f32 1.5, %v1981_v23  ;;  %v1935_v55 = vpop.xlane.xlu1 %1934 }
 0x2e5   :  { %v2286_v59 = vpop.eup %2285  ;;  %v1964_v56 = vadd.f32 1e-12, %v1935_v55 }
 0x2e6   :  { %v1983_v41 = vmul.f32 %v2284_v14, %v1982_v10  ;;  %v1989_v57 = vmul.f32 %v2286_v59, %v1963_v16  ;;  %vm1995_vm3 = vweird.f32 %v2286_v59 }
 0x2e7   :  { %2287 = vrsqrt.f32 %v1964_v56  ;;  %vm1996_vm5 = vmor %vm1994_vm4, %vm1995_vm3  ;;  %vm2004_vm7 = vweird.f32 %v1964_v56 }
 0x2e8   :  { %v1987_v49 = vsel %vm1986_vm2, %v2284_v14, %v1983_v41  ;;  %v1990_v45 = vmul.f32 %v2286_v59, %v1989_v57 }
 0x2e9   :  { %v2138_v37 = vmul.f32 %v1987_v49, %v3374_v21 }
 0x2ea   :  { %v1991_v19 = vmul.f32 0.5, %v1990_v45 }
 0x2eb   :  { %2154 = vst [vmem:[%s3526_s9] sm:$0xff] %v2138_v37 }
 0x2ec   :  { %v1992_v28 = vsub.f32 1.5, %v1991_v19  ;;  %v1937_v63 = vpop.xlane.xlu1 %1936 }
 0x2ed   :  { %v2288_v58 = vpop.eup %2287  ;;  %v1965_v42 = vadd.f32 1e-12, %v1937_v63 }
 0x2ee   :  { %v1993_v8 = vmul.f32 %v2286_v59, %v1992_v28  ;;  %v1999_v13 = vmul.f32 %v2288_v58, %v1964_v56  ;;  %vm2005_vm6 = vweird.f32 %v2288_v58 }
 0x2ef   :  { %2289 = vrsqrt.f32 %v1965_v42  ;;  %vm2006_vm8 = vmor %vm2004_vm7, %vm2005_vm6  ;;  %vm2014_vm10 = vweird.f32 %v1965_v42 }
 0x2f0   :  { %v1997_v30 = vsel %vm1996_vm5, %v2286_v59, %v1993_v8  ;;  %v2000_v32 = vmul.f32 %v2288_v58, %v1999_v13 }
 0x2f1   :  { %v2139_v26 = vmul.f32 %v1997_v30, %v3379_v33 }
 0x2f2   :  { %v2001_v21 = vmul.f32 0.5, %v2000_v32 }
 0x2f3   :  { %2155 = vst [vmem:[%s3526_s9 + $0x8] sm:$0xff] %v2139_v26 }
 0x2f4   :  { %v2002_v44 = vsub.f32 1.5, %v2001_v21  ;;  %v1939_v36 = vpop.xlane.xlu2 %1938 }
 0x2f5   :  { %v2290_v50 = vpop.eup %2289  ;;  %v1966_v31 = vadd.f32 1e-12, %v1939_v36 }
 0x2f6   :  { %v2003_v54 = vmul.f32 %v2288_v58, %v2002_v44  ;;  %v2009_v22 = vmul.f32 %v2290_v50, %v1965_v42  ;;  %vm2015_vm9 = vweird.f32 %v2290_v50 }
 0x2f7   :  { %2291 = vrsqrt.f32 %v1966_v31  ;;  %vm2016_vm11 = vmor %vm2014_vm10, %vm2015_vm9  ;;  %vm2024_vm13 = vweird.f32 %v1966_v31 }
 0x2f8   :  { %v2007_v46 = vsel %vm2006_vm8, %v2288_v58, %v2003_v54  ;;  %v2010_v61 = vmul.f32 %v2290_v50, %v2009_v22 }
 0x2f9   :  { %v2140_v60 = vmul.f32 %v2007_v46, %v3384_v5 }
 0x2fa   :  { %v2011_v33 = vmul.f32 0.5, %v2010_v61 }
 0x2fb   :  { %2156 = vst [vmem:[%s3526_s9 + $0x10] sm:$0xff] %v2140_v60 }
 0x2fc   :  { %v2012_v9 = vsub.f32 1.5, %v2011_v33  ;;  %v1941_v25 = vpop.xlane.xlu2 %1940 }
 0x2fd   :  { %v2292_v6 = vpop.eup %2291  ;;  %v1967_v0 = vadd.f32 1e-12, %v1941_v25 }
 0x2fe   :  { %v2013_v39 = vmul.f32 %v2290_v50, %v2012_v9  ;;  %v2019_v38 = vmul.f32 %v2292_v6, %v1966_v31  ;;  %vm2025_vm12 = vweird.f32 %v2292_v6 }
 0x2ff   :  { %2293 = vrsqrt.f32 %v1967_v0  ;;  %vm2026_vm14 = vmor %vm2024_vm13, %vm2025_vm12  ;;  %vm2034_vm0 = vweird.f32 %v1967_v0 }
 0x300   :  { %v2017_v1 = vsel %vm2016_vm11, %v2290_v50, %v2013_v39  ;;  %v2020_v11 = vmul.f32 %v2292_v6, %v2019_v38 }
 0x301   :  { %v2141_v20 = vmul.f32 %v2017_v1, %v3389_v40 }
 0x302   :  { %v2021_v5 = vmul.f32 0.5, %v2020_v11 }
 0x303   :  { %2157 = vst [vmem:[%s3526_s9 + $0x18] sm:$0xff] %v2141_v20 }
 0x304   :  { %v2022_v34 = vsub.f32 1.5, %v2021_v5  ;;  %v1943_v15 = vpop.xlane.xlu0 %1942 }
 0x305   :  { %v2294_v53 = vpop.eup %2293  ;;  %v1968_v48 = vadd.f32 1e-12, %v1943_v15 }
 0x306   :  { %v2023_v7 = vmul.f32 %v2292_v6, %v2022_v34  ;;  %v2029_v47 = vmul.f32 %v2294_v53, %v1967_v0  ;;  %vm2035_vm15 = vweird.f32 %v2294_v53 }
 0x307   :  { %2295 = vrsqrt.f32 %v1968_v48  ;;  %vm2036_vm1 = vmor %vm2034_vm0, %vm2035_vm15  ;;  %vm2044_vm3 = vweird.f32 %v1968_v48 }
 0x308   :  { %v2027_v14 = vsel %vm2026_vm14, %v2292_v6, %v2023_v7  ;;  %v2030_v16 = vmul.f32 %v2294_v53, %v2029_v47 }
 0x309   :  { %v2142_v17 = vmul.f32 %v2027_v14, %v3394_v3 }
 0x30a   :  { %v2031_v40 = vmul.f32 0.5, %v2030_v16 }
 0x30b   :  { %2158 = vst [vmem:[%s3526_s9 + $0x20] sm:$0xff] %v2142_v17 }
 0x30c   :  { %v2032_v24 = vsub.f32 1.5, %v2031_v40  ;;  %v1945_v23 = vpop.xlane.xlu1 %1944 }
 0x30d   :  { %v2296_v10 = vpop.eup %2295  ;;  %v1969_v55 = vadd.f32 1e-12, %v1945_v23 }
 0x30e   :  { %v2033_v59 = vmul.f32 %v2294_v53, %v2032_v24  ;;  %v2039_v56 = vmul.f32 %v2296_v10, %v1968_v48  ;;  %vm2045_vm2 = vweird.f32 %v2296_v10 }
 0x30f   :  { %2297 = vrsqrt.f32 %v1969_v55  ;;  %vm2046_vm4 = vmor %vm2044_vm3, %vm2045_vm2  ;;  %vm2054_vm6 = vweird.f32 %v1969_v55 }
 0x310   :  { %v2037_v41 = vsel %vm2036_vm1, %v2294_v53, %v2033_v59  ;;  %v2040_v57 = vmul.f32 %v2296_v10, %v2039_v56 }
 0x311   :  { %v2143_v49 = vmul.f32 %v2037_v41, %v3399_v29 }
 0x312   :  { %v2041_v3 = vmul.f32 0.5, %v2040_v57 }
 0x313   :  { %2159 = vst [vmem:[%s3526_s9 + $0x28] sm:$0xff] %v2143_v49 }
 0x314   :  { %v2042_v45 = vsub.f32 1.5, %v2041_v3  ;;  %v1947_v37 = vpop.xlane.xlu2 %1946 }
 0x315   :  { %v2298_v19 = vpop.eup %2297  ;;  %v1970_v28 = vadd.f32 1e-12, %v1947_v37 }
 0x316   :  { %v2043_v63 = vmul.f32 %v2296_v10, %v2042_v45  ;;  %v2049_v58 = vmul.f32 %v2298_v19, %v1969_v55  ;;  %vm2055_vm5 = vweird.f32 %v2298_v19 }
 0x317   :  { %2299 = vrsqrt.f32 %v1970_v28  ;;  %vm2056_vm7 = vmor %vm2054_vm6, %vm2055_vm5  ;;  %vm2064_vm9 = vweird.f32 %v1970_v28 }
 0x318   :  { %v2047_v42 = vsel %vm2046_vm4, %v2296_v10, %v2043_v63  ;;  %v2050_v8 = vmul.f32 %v2298_v19, %v2049_v58 }
 0x319   :  { %v2144_v13 = vmul.f32 %v2047_v42, %v3404_v27 }
 0x31a   :  { %v2051_v29 = vmul.f32 0.5, %v2050_v8 }
 0x31b   :  { %2160 = vst [vmem:[%s3526_s9 + $0x30] sm:$0xff] %v2144_v13 }
 0x31c   :  { %v2052_v30 = vsub.f32 1.5, %v2051_v29  ;;  %v1949_v32 = vpop.xlane.xlu0 %1948 }
 0x31d   :  { %v2300_v26 = vpop.eup %2299  ;;  %v1971_v21 = vadd.f32 1e-12, %v1949_v32 }
 0x31e   :  { %v2053_v44 = vmul.f32 %v2298_v19, %v2052_v30  ;;  %v2059_v36 = vmul.f32 %v2300_v26, %v1970_v28  ;;  %vm2065_vm8 = vweird.f32 %v2300_v26 }
 0x31f   :  { %2301 = vrsqrt.f32 %v1971_v21  ;;  %vm2066_vm10 = vmor %vm2064_vm9, %vm2065_vm8  ;;  %vm2074_vm12 = vweird.f32 %v1971_v21 }
 0x320   :  { %v2057_v50 = vsel %vm2056_vm7, %v2298_v19, %v2053_v44  ;;  %v2060_v31 = vmul.f32 %v2300_v26, %v2059_v36 }
 0x321   :  { %v2145_v54 = vmul.f32 %v2057_v50, %v3409_v51 }
 0x322   :  { %v2061_v27 = vmul.f32 0.5, %v2060_v31 }
 0x323   :  { %2161 = vst [vmem:[%s3526_s9 + $0x38] sm:$0xff] %v2145_v54 }
 0x324   :  { %v2062_v22 = vsub.f32 1.5, %v2061_v27  ;;  %v1951_v46 = vpop.xlane.xlu1 %1950 }
 0x325   :  { %v2302_v61 = vpop.eup %2301  ;;  %v1972_v60 = vadd.f32 1e-12, %v1951_v46 }
 0x326   :  { %v2063_v33 = vmul.f32 %v2300_v26, %v2062_v22  ;;  %v2069_v9 = vmul.f32 %v2302_v61, %v1971_v21  ;;  %vm2075_vm11 = vweird.f32 %v2302_v61 }
 0x327   :  { %2303 = vrsqrt.f32 %v1972_v60  ;;  %vm2076_vm13 = vmor %vm2074_vm12, %vm2075_vm11  ;;  %vm2084_vm15 = vweird.f32 %v1972_v60 }
 0x328   :  { %v2067_v25 = vsel %vm2066_vm10, %v2300_v26, %v2063_v33  ;;  %v2070_v6 = vmul.f32 %v2302_v61, %v2069_v9 }
 0x329   :  { %v2146_v0 = vmul.f32 %v2067_v25, %v3414_v2 }
 0x32a   :  { %v2071_v51 = vmul.f32 0.5, %v2070_v6 }
 0x32b   :  { %2162 = vst [vmem:[%s3526_s9 + $0x40] sm:$0xff] %v2146_v0 }
 0x32c   :  { %v2072_v39 = vsub.f32 1.5, %v2071_v51  ;;  %v1953_v38 = vpop.xlane.xlu2 %1952 }
 0x32d   :  { %v2304_v1 = vpop.eup %2303  ;;  %v1973_v11 = vadd.f32 1e-12, %v1953_v38 }
 0x32e   :  { %v2073_v20 = vmul.f32 %v2302_v61, %v2072_v39  ;;  %v2079_v5 = vmul.f32 %v2304_v1, %v1972_v60  ;;  %vm2085_vm14 = vweird.f32 %v2304_v1 }
 0x32f   :  { %2305 = vrsqrt.f32 %v1973_v11  ;;  %vm2086_vm0 = vmor %vm2084_vm15, %vm2085_vm14  ;;  %vm2094_vm2 = vweird.f32 %v1973_v11 }
 0x330   :  { %v2077_v34 = vsel %vm2076_vm13, %v2302_v61, %v2073_v20  ;;  %v2080_v15 = vmul.f32 %v2304_v1, %v2079_v5 }
 0x331   :  { %v2147_v53 = vmul.f32 %v2077_v34, %v3419_v35 }
 0x332   :  { %v2081_v2 = vmul.f32 0.5, %v2080_v15 }
 0x333   :  { %2163 = vst [vmem:[%s3526_s9 + $0x48] sm:$0xff] %v2147_v53 }
 0x334   :  { %v2082_v48 = vsub.f32 1.5, %v2081_v2  ;;  %v1955_v7 = vpop.xlane.xlu0 %1954 }
 0x335   :  { %v2306_v47 = vpop.eup %2305  ;;  %v1974_v14 = vadd.f32 1e-12, %v1955_v7 }
 0x336   :  { %v2083_v16 = vmul.f32 %v2304_v1, %v2082_v48  ;;  %v2089_v17 = vmul.f32 %v2306_v47, %v1973_v11  ;;  %vm2095_vm1 = vweird.f32 %v2306_v47 }
 0x337   :  { %2307 = vrsqrt.f32 %v1974_v14  ;;  %vm2096_vm3 = vmor %vm2094_vm2, %vm2095_vm1  ;;  %vm2104_vm5 = vweird.f32 %v1974_v14 }
 0x338   :  { %v2087_v40 = vsel %vm2086_vm0, %v2304_v1, %v2083_v16  ;;  %v2090_v24 = vmul.f32 %v2306_v47, %v2089_v17 }
 0x339   :  { %v2148_v23 = vmul.f32 %v2087_v40, %v3424_v52 }
 0x33a   :  { %v2091_v35 = vmul.f32 0.5, %v2090_v24 }
 0x33b   :  { %2164 = vst [vmem:[%s3526_s9 + $0x50] sm:$0xff] %v2148_v23 }
 0x33c   :  { %v2092_v10 = vsub.f32 1.5, %v2091_v35  ;;  %v1957_v55 = vpop.xlane.xlu1 %1956 }
 0x33d   :  { %v2308_v59 = vpop.eup %2307  ;;  %v1975_v56 = vadd.f32 1e-12, %v1957_v55 }
 0x33e   :  { %v2093_v41 = vmul.f32 %v2306_v47, %v2092_v10  ;;  %v2099_v57 = vmul.f32 %v2308_v59, %v1974_v14  ;;  %vm2105_vm4 = vweird.f32 %v2308_v59 }
 0x33f   :  { %2309 = vrsqrt.f32 %v1975_v56  ;;  %vm2106_vm6 = vmor %vm2104_vm5, %vm2105_vm4  ;;  %vm2114_vm8 = vweird.f32 %v1975_v56 }
 0x340   :  { %v2097_v49 = vsel %vm2096_vm3, %v2306_v47, %v2093_v41  ;;  %v2100_v3 = vmul.f32 %v2308_v59, %v2099_v57 }
 0x341   :  { %v2149_v45 = vmul.f32 %v2097_v49, %v3429_v4 }
 0x342   :  { %v2101_v52 = vmul.f32 0.5, %v2100_v3 }
 0x343   :  { %2165 = vst [vmem:[%s3526_s9 + $0x58] sm:$0xff] %v2149_v45 }
 0x344   :  { %v2102_v37 = vsub.f32 1.5, %v2101_v52  ;;  %v1959_v19 = vpop.xlane.xlu2 %1958 }
 0x345   :  { %v2310_v28 = vpop.eup %2309  ;;  %v1976_v63 = vadd.f32 1e-12, %v1959_v19 }
 0x346   :  { %v2103_v58 = vmul.f32 %v2308_v59, %v2102_v37  ;;  %v2109_v42 = vmul.f32 %v2310_v28, %v1975_v56  ;;  %vm2115_vm7 = vweird.f32 %v2310_v28 }
 0x347   :  { %2311 = vrsqrt.f32 %v1976_v63  ;;  %vm2116_vm9 = vmor %vm2114_vm8, %vm2115_vm7  ;;  %vm2124_vm11 = vweird.f32 %v1976_v63 }
 0x348   :  { %v2107_v8 = vsel %vm2106_vm6, %v2308_v59, %v2103_v58  ;;  %v2110_v13 = vmul.f32 %v2310_v28, %v2109_v42 }
 0x349   :  { %v2150_v29 = vmul.f32 %v2107_v8, %v3434_v18 }
 0x34a   :  { %v2111_v4 = vmul.f32 0.5, %v2110_v13 }
 0x34b   :  { %2166 = vst [vmem:[%s3526_s9 + $0x60] sm:$0xff] %v2150_v29 }
 0x34c   :  { %v2112_v30 = vsub.f32 1.5, %v2111_v4  ;;  %v1961_v32 = vpop.xlane.xlu0 %1960 }
 0x34d   :  { %v2312_v26 = vpop.eup %2311  ;;  %v1977_v21 = vadd.f32 1e-12, %v1961_v32 }
 0x34e   :  { %v2113_v44 = vmul.f32 %v2310_v28, %v2112_v30  ;;  %v2119_v36 = vmul.f32 %v2312_v26, %v1976_v63  ;;  %vm2125_vm10 = vweird.f32 %v2312_v26 }
 0x34f   :  { %2313 = vrsqrt.f32 %v1977_v21  ;;  %vm2126_vm12 = vmor %vm2124_vm11, %vm2125_vm10  ;;  %vm2134_vm14 = vweird.f32 %v1977_v21 }
 0x350   :  { %v2117_v50 = vsel %vm2116_vm9, %v2310_v28, %v2113_v44  ;;  %v2120_v31 = vmul.f32 %v2312_v26, %v2119_v36 }
 0x351   :  { %v2151_v54 = vmul.f32 %v2117_v50, %v3439_v43 }
 0x352   :  { %v2121_v18 = vmul.f32 0.5, %v2120_v31 }
 0x353   :  { %2167 = vst [vmem:[%s3526_s9 + $0x68] sm:$0xff] %v2151_v54 }
 0x354   :  { %v2122_v27 = vsub.f32 1.5, %v2121_v18 }
 0x355   :  { %v2314_v22 = vpop.eup %2313 }
 0x356   :  { %v2123_v46 = vmul.f32 %v2312_v26, %v2122_v27  ;;  %v2129_v61 = vmul.f32 %v2314_v22, %v1977_v21  ;;  %vm2135_vm13 = vweird.f32 %v2314_v22 }
 0x357   :  { %vm2136_vm15 = vmor %vm2134_vm14, %vm2135_vm13 }
 0x358   :  { %v2127_v60 = vsel %vm2126_vm12, %v2312_v26, %v2123_v46  ;;  %v2130_v33 = vmul.f32 %v2314_v22, %v2129_v61 }
 0x359   :  { %v2152_v9 = vmul.f32 %v2127_v60, %v3444_v12 }
 0x35a   :  { %v2131_v25 = vmul.f32 0.5, %v2130_v33 }
 0x35b   :  { %2168 = vst [vmem:[%s3526_s9 + $0x70] sm:$0xff] %v2152_v9 }
 0x35c   :  { %v2132_v43 = vsub.f32 1.5, %v2131_v25 }
 0x35e   :  { %v2133_v6 = vmul.f32 %v2314_v22, %v2132_v43 }
 0x360   :  { %v2137_v0 = vsel %vm2136_vm15, %v2314_v22, %v2133_v6 }
 0x361   :  { %v2153_v51 = vmul.f32 %v2137_v0, %v3449_v62 }
 0x363   :  { %2169 = vst [vmem:[%s3526_s9 + $0x78] sm:$0xff] %v2153_v51 }
 0x364   :  { %2178 = vsyncpa [#allocation3], 1 }
 0x365   :  { %2179 = vsyncpa [#allocation5], 1 }

</bundles_post_ra>
